<compile_context>
chip_gen: v5e
topology: v5e:2x2
jax: 0.10.0
libtpu: 0.0.40
codegen_flags: <defaults>
</compile_context>

<pallas_src>
import jax
import jax.numpy as jnp
from jax.experimental import pallas as pl
from jax.experimental.pallas import tpu as pltpu

# ----------------------------- sizes ---------------------------------------
V = 8             # number of nodes in the batched graph
E = 16            # number of directed edges
NODE_IN = 16      # in_atom_feat_dim
EDGE_IN = 8       # in_bond_feat_dim
H = 32            # hidden_dim == out_dim
NUM_GRAPHS = 2
NUM_MP_STEPS = 5  # MPNNNet passes num_step_message_passing=5

# Lane offsets inside the (32, MATS_W) packed matrix slab.
OFF_PROJ_W = 0       # (NODE_IN, H)
OFF_EDGE_W1 = 32     # (EDGE_IN, H)
OFF_GRU_WIH = 64     # (H, 3H)  packed [r|z|n]
OFF_GRU_WHH = 160    # (H, 3H)  packed [r|z|n]
OFF_MLP_W1 = 256     # (H, H//2)
OFF_MLP_W2 = 272     # (H//2, H//4)
OFF_MLP_W3 = 280     # (H//4, 2)
OFF_GMAT = 288       # (E, V)   one-hot gather of src node feats
OFF_SMAT = 296       # (V, E)   scatter-add to dst nodes
OFF_RMAT = 312       # (NUM_GRAPHS, V)  mean-readout matrix
MATS_W = 320
MATS_ROWS = 32

# Row layout of the (8, H*H) packed bias slab (each bias starts at lane 0).
(ROW_PROJ_B, ROW_EDGE_B1, ROW_EDGE_B2, ROW_GRU_BIH, ROW_GRU_BHH,
 ROW_MLP_B1, ROW_MLP_B2, ROW_MLP_B3) = range(8)


def _vmem_spec():
    return pl.BlockSpec(memory_space=pltpu.MemorySpace.VMEM)


# --------------------------- fused Pallas kernel ----------------------------

def _mpnn_fused_kernel(mats_ref, bias_ref, w2p_ref, colsum_ref,
                       node_ref, edge_ref, o_ref):
    """edge-net -> node proj -> 5x (NNConv(sum)+ReLU -> GRU) -> mean readout -> MLP."""
    # ---------- unpack packed slabs (static sublane/lane slices, one-time) ----------
    proj_w = mats_ref[0:NODE_IN, OFF_PROJ_W:OFF_PROJ_W + H]
    edge_w1 = mats_ref[0:EDGE_IN, OFF_EDGE_W1:OFF_EDGE_W1 + H]
    wih = mats_ref[0:H, OFF_GRU_WIH:OFF_GRU_WIH + 3 * H]
    whh = mats_ref[0:H, OFF_GRU_WHH:OFF_GRU_WHH + 3 * H]
    mlp_w1 = mats_ref[0:H, OFF_MLP_W1:OFF_MLP_W1 + H // 2]
    mlp_w2 = mats_ref[0:H // 2, OFF_MLP_W2:OFF_MLP_W2 + H // 4]
    mlp_w3 = mats_ref[0:H // 4, OFF_MLP_W3:OFF_MLP_W3 + 2]
    gmat = mats_ref[0:E, OFF_GMAT:OFF_GMAT + V]
    smat = mats_ref[0:V, OFF_SMAT:OFF_SMAT + E]
    rmat = mats_ref[0:NUM_GRAPHS, OFF_RMAT:OFF_RMAT + V]

    proj_b = bias_ref[ROW_PROJ_B:ROW_PROJ_B + 1, 0:H]
    edge_b1 = bias_ref[ROW_EDGE_B1:ROW_EDGE_B1 + 1, 0:H]
    edge_b2 = bias_ref[ROW_EDGE_B2:ROW_EDGE_B2 + 1, 0:H * H]   # already column-permuted
    bih = bias_ref[ROW_GRU_BIH:ROW_GRU_BIH + 1, 0:3 * H]
    bhh = bias_ref[ROW_GRU_BHH:ROW_GRU_BHH + 1, 0:3 * H]
    mlp_b1 = bias_ref[ROW_MLP_B1:ROW_MLP_B1 + 1, 0:H // 2]
    mlp_b2 = bias_ref[ROW_MLP_B2:ROW_MLP_B2 + 1, 0:H // 4]
    mlp_b3 = bias_ref[ROW_MLP_B3:ROW_MLP_B3 + 1, 0:2]

    colsum = colsum_ref[...]     # (H*H, H): colsum[j*H + i, j'] = (j == j')

    # ---------- NNConv edge network (loop-invariant, fused into this kernel) ----------
    e1 = jnp.maximum(
        jnp.dot(edge_ref[...], edge_w1, preferred_element_type=jnp.float32) + edge_b1,
        0.0)                                                                  # (E, H)
    # Output-major per-edge weights: e2p[e, j*H + i] = W_e[i, j]
    e2p = jnp.dot(e1, w2p_ref[...], preferred_element_type=jnp.float32) + edge_b2  # (E, H*H)

    # ---------- project_node_feats: Linear + ReLU ----------
    x = jnp.maximum(
        jnp.dot(node_ref[...], proj_w, preferred_element_type=jnp.float32) + proj_b,
        0.0)                                                                  # (V, H)
    h = x   # GRU hidden state (seq_len=1 -> GRU output == new hidden)

    for _ in range(NUM_MP_STEPS):
        # Tile node features H times along lanes: x_t[v, j*H + i] = x[v, i]
        x_t = jnp.concatenate([x] * H, axis=1)                                # (V, H*H)
        # Gather source node features for every edge (still tiled).          [MXU]
        xs_t = jnp.dot(gmat, x_t, preferred_element_type=jnp.float32)        # (E, H*H)
        # Per-edge message  m_e[j] = sum_i x_src[e, i] * W_e[i, j]           [VPU+MXU]
        msg = jnp.dot(xs_t * e2p, colsum, preferred_element_type=jnp.float32)  # (E, H)
        # Scatter-add to destination nodes (aggregator='sum').  DGL's NNConv bias is
        # zero-initialised and no checkpoint is loaded here, so the "+ bias" add is
        # dropped; re-add it if trained weights are ever ported.
        agg = jnp.dot(smat, msg, preferred_element_type=jnp.float32)         # (V, H)
        m = jnp.maximum(agg, 0.0)                                            # outer ReLU

        # --- GRU cell, PyTorch gate order (r, z, n), packed 3H-wide matmuls ---
        gi = jnp.dot(m, wih, preferred_element_type=jnp.float32) + bih       # (V, 3H)
        gh = jnp.dot(h, whh, preferred_element_type=jnp.float32) + bhh       # (V, 3H)
        r = jax.nn.sigmoid(gi[:, 0:H] + gh[:, 0:H])
        z = jax.nn.sigmoid(gi[:, H:2 * H] + gh[:, H:2 * H])
        n = jnp.tanh(gi[:, 2 * H:3 * H] + r * gh[:, 2 * H:3 * H])
        h = (1.0 - z) * n + z * h
        x = h

    # ---------- readout = 'mean' (dgl.mean_nodes) via (G, V) membership matmul ----------
    hg = jnp.dot(rmat, x, preferred_element_type=jnp.float32)                # (G, H)

    # ---------- MLPReadout(H, 2): H -> H//2 -> H//4 -> 2 ----------
    y = jnp.maximum(jnp.dot(hg, mlp_w1, preferred_element_type=jnp.float32) + mlp_b1, 0.0)
    y = jnp.maximum(jnp.dot(y, mlp_w2, preferred_element_type=jnp.float32) + mlp_b2, 0.0)
    o_ref[...] = jnp.dot(y, mlp_w3, preferred_element_type=jnp.float32) + mlp_b3


# ------------------------------- forward ------------------------------------

@jax.jit
def mpnn_net_forward(mats, biases, edge_w2p, colsum, node_feats, edge_feats):
    return pl.pallas_call(
        _mpnn_fused_kernel,
        out_shape=jax.ShapeDtypeStruct((NUM_GRAPHS, 2), jnp.float32),
        in_specs=[_vmem_spec() for _ in range(6)],
        out_specs=_vmem_spec(),
    )(mats, biases, edge_w2p, colsum, node_feats, edge_feats)


# ------------------------- parameters (deterministic) ------------------------

def init_params(key):
    keys = jax.random.split(key, 10)

    def lin(k, fan_in, fan_out):
        kw, kb = jax.random.split(k)
        bound = 1.0 / (fan_in ** 0.5)
        w = jax.random.uniform(kw, (fan_in, fan_out), jnp.float32, -bound, bound)
        b = jax.random.uniform(kb, (1, fan_out), jnp.float32, -bound, bound)
        return w, b

    p = {}
    # MPNNGNN.project_node_feats = Linear(NODE_IN, H) + ReLU
    p["proj_w"], p["proj_b"] = lin(keys[0], NODE_IN, H)
    # NNConv edge network: Linear(EDGE_IN, H) + ReLU + Linear(H, H*H)
    p["edge_w1"], p["edge_b1"] = lin(keys[1], EDGE_IN, H)
    p["edge_w2"], p["edge_b2"] = lin(keys[2], H, H * H)
    # GRU weights stored packed & transposed relative to nn.GRU's (3H, H):
    # columns are [r | z | n] blocks of width H.  (Porting hazard if real
    # checkpoint weights are loaded: transpose + re-pack required.)
    bound = 1.0 / (H ** 0.5)
    p["gru_wih"] = jax.random.uniform(keys[3], (H, 3 * H), jnp.float32, -bound, bound)
    p["gru_whh"] = jax.random.uniform(keys[4], (H, 3 * H), jnp.float32, -bound, bound)
    p["gru_bih"] = jax.random.uniform(keys[5], (1, 3 * H), jnp.float32, -bound, bound)
    p["gru_bhh"] = jax.random.uniform(keys[6], (1, 3 * H), jnp.float32, -bound, bound)
    # MLPReadout(H, 2): H -> H//2 -> H//4 -> 2
    p["mlp_w1"], p["mlp_b1"] = lin(keys[7], H, H // 2)
    p["mlp_w2"], p["mlp_b2"] = lin(keys[8], H // 2, H // 4)
    p["mlp_w3"], p["mlp_b3"] = lin(keys[9], H // 4, 2)
    return p


def pack_operands(params, gmat, smat, readout_mat):
    """One-time packing of weights / graph structure into DMA-friendly slabs."""
    def put(slab, arr, row, col):
        return slab.at[row:row + arr.shape[0], col:col + arr.shape[1]].set(arr)

    mats = jnp.zeros((MATS_ROWS, MATS_W), jnp.float32)
    mats = put(mats, params["proj_w"], 0, OFF_PROJ_W)
    mats = put(mats, params["edge_w1"], 0, OFF_EDGE_W1)
    mats = put(mats, params["gru_wih"], 0, OFF_GRU_WIH)
    mats = put(mats, params["gru_whh"], 0, OFF_GRU_WHH)
    mats = put(mats, params["mlp_w1"], 0, OFF_MLP_W1)
    mats = put(mats, params["mlp_w2"], 0, OFF_MLP_W2)
    mats = put(mats, params["mlp_w3"], 0, OFF_MLP_W3)
    mats = put(mats, gmat, 0, OFF_GMAT)
    mats = put(mats, smat, 0, OFF_SMAT)
    mats = put(mats, readout_mat, 0, OFF_RMAT)

    # Column permutation taking W_e's natural (i*H + j) layout (DGL's
    # .view(-1, in, out)) to the output-major (j*H + i) layout the kernel
    # consumes natively -- done once on static weights, so no in-kernel relayout.
    cp = jnp.arange(H * H)
    perm = (cp % H) * H + cp // H
    edge_w2p = params["edge_w2"][:, perm]                    # (H, H*H)
    edge_b2p = params["edge_b2"][:, perm]                    # (1, H*H)

    biases = jnp.zeros((8, H * H), jnp.float32)
    biases = put(biases, params["proj_b"], ROW_PROJ_B, 0)
    biases = put(biases, params["edge_b1"], ROW_EDGE_B1, 0)
    biases = put(biases, edge_b2p, ROW_EDGE_B2, 0)
    biases = put(biases, params["gru_bih"], ROW_GRU_BIH, 0)
    biases = put(biases, params["gru_bhh"], ROW_GRU_BHH, 0)
    biases = put(biases, params["mlp_b1"], ROW_MLP_B1, 0)
    biases = put(biases, params["mlp_b2"], ROW_MLP_B2, 0)
    biases = put(biases, params["mlp_b3"], ROW_MLP_B3, 0)

    # colsum[j*H + i, j'] = (j == j'): contracts the lane-tiled per-edge products
    # back to (E, H).  Precomputed constant (no in-kernel iota/mask build).
    colsum = jnp.repeat(jnp.eye(H, dtype=jnp.float32), H, axis=0)   # (H*H, H)
    return mats, biases, edge_w2p, colsum


# TODO(synk): transformer branch (Global_Reactivity_Attention / pair_atom_feats /
# unbatch_*), Set2Set readout and dropout are config-disabled here
# (use_transformer=False, readout='mean', eval-mode dropout) and not implemented.


if __name__ == "__main__":
    key = jax.random.PRNGKey(0)
    k_node, k_edge, k_param = jax.random.split(key, 3)

    node_feats = jax.random.normal(k_node, (V, NODE_IN), dtype=jnp.float32)
    edge_feats = jax.random.normal(k_edge, (E, EDGE_IN), dtype=jnp.float32)

    # Batched graph: 2 graphs of 4 nodes each, bidirectional ring edges per graph.
    src_list, dst_list = [], []
    for goff in (0, 4):
        for a, b in [(0, 1), (1, 2), (2, 3), (3, 0)]:
            src_list += [goff + a, goff + b]
            dst_list += [goff + b, goff + a]
    src = jnp.array(src_list, dtype=jnp.int32)   # (E,)
    dst = jnp.array(dst_list, dtype=jnp.int32)   # (E,)
    assert src.shape[0] == E

    gmat = jax.nn.one_hot(src, V, dtype=jnp.float32)        # (E, V) gather of src feats
    smat = jax.nn.one_hot(dst, V, dtype=jnp.float32).T      # (V, E) scatter-add to dst

    graph_ids = jnp.array([0] * 4 + [1] * 4, dtype=jnp.int32)
    counts = jnp.array([4.0, 4.0], dtype=jnp.float32)
    readout_mat = (jax.nn.one_hot(graph_ids, NUM_GRAPHS, dtype=jnp.float32).T
                   / counts[:, None])                        # (NUM_GRAPHS, V) mean readout

    params = init_params(k_param)
    mats, biases, edge_w2p, colsum = pack_operands(params, gmat, smat, readout_mat)

    out = mpnn_net_forward(mats, biases, edge_w2p, colsum, node_feats, edge_feats)
    out = jax.block_until_ready(out)
    assert out.shape == (NUM_GRAPHS, 2) and out.dtype == jnp.float32
    print("KERNEL_OK")
</pallas_src>

<mosaic_0001>
module attributes {stable_mosaic.version = 11 : i64} {
  func.func @_mpnn_fused_kernel(%arg0: memref<32x320xf32, #tpu.memory_space<vmem>>, %arg1: memref<8x1024xf32, #tpu.memory_space<vmem>>, %arg2: memref<32x1024xf32, #tpu.memory_space<vmem>>, %arg3: memref<1024x32xf32, #tpu.memory_space<vmem>>, %arg4: memref<8x16xf32, #tpu.memory_space<vmem>>, %arg5: memref<16x8xf32, #tpu.memory_space<vmem>>, %arg6: memref<2x2xf32, #tpu.memory_space<vmem>>) attributes {dimension_semantics = [], scalar_prefetch = 0 : i64, scratch_operands = 0 : i64, tpu.core_type = #tpu.core_type<tc>} {
    %c0 = arith.constant 0 : index
    %c0_0 = arith.constant 0 : index
    %0 = vector.load %arg0[%c0, %c0_0] : memref<32x320xf32, #tpu.memory_space<vmem>>, vector<16x32xf32>
    %c0_1 = arith.constant 0 : index
    %c32 = arith.constant 32 : index
    %1 = vector.load %arg0[%c0_1, %c32] : memref<32x320xf32, #tpu.memory_space<vmem>>, vector<8x32xf32>
    %c0_2 = arith.constant 0 : index
    %c64 = arith.constant 64 : index
    %2 = vector.load %arg0[%c0_2, %c64] : memref<32x320xf32, #tpu.memory_space<vmem>>, vector<32x96xf32>
    %c0_3 = arith.constant 0 : index
    %c160 = arith.constant 160 : index
    %3 = vector.load %arg0[%c0_3, %c160] : memref<32x320xf32, #tpu.memory_space<vmem>>, vector<32x96xf32>
    %c0_4 = arith.constant 0 : index
    %c256 = arith.constant 256 : index
    %4 = vector.load %arg0[%c0_4, %c256] : memref<32x320xf32, #tpu.memory_space<vmem>>, vector<32x16xf32>
    %c0_5 = arith.constant 0 : index
    %c272 = arith.constant 272 : index
    %5 = vector.load %arg0[%c0_5, %c272] : memref<32x320xf32, #tpu.memory_space<vmem>>, vector<16x8xf32>
    %c0_6 = arith.constant 0 : index
    %c280 = arith.constant 280 : index
    %6 = vector.load %arg0[%c0_6, %c280] : memref<32x320xf32, #tpu.memory_space<vmem>>, vector<8x2xf32>
    %c0_7 = arith.constant 0 : index
    %c288 = arith.constant 288 : index
    %7 = vector.load %arg0[%c0_7, %c288] : memref<32x320xf32, #tpu.memory_space<vmem>>, vector<16x8xf32>
    %c0_8 = arith.constant 0 : index
    %c296 = arith.constant 296 : index
    %8 = vector.load %arg0[%c0_8, %c296] : memref<32x320xf32, #tpu.memory_space<vmem>>, vector<8x16xf32>
    %c0_9 = arith.constant 0 : index
    %c312 = arith.constant 312 : index
    %9 = vector.load %arg0[%c0_9, %c312] : memref<32x320xf32, #tpu.memory_space<vmem>>, vector<2x8xf32>
    %c0_10 = arith.constant 0 : index
    %c0_11 = arith.constant 0 : index
    %10 = vector.load %arg1[%c0_10, %c0_11] : memref<8x1024xf32, #tpu.memory_space<vmem>>, vector<1x32xf32>
    %c1 = arith.constant 1 : index
    %c0_12 = arith.constant 0 : index
    %11 = vector.load %arg1[%c1, %c0_12] : memref<8x1024xf32, #tpu.memory_space<vmem>>, vector<1x32xf32>
    %c2 = arith.constant 2 : index
    %c0_13 = arith.constant 0 : index
    %12 = vector.load %arg1[%c2, %c0_13] : memref<8x1024xf32, #tpu.memory_space<vmem>>, vector<1x1024xf32>
    %c3 = arith.constant 3 : index
    %c0_14 = arith.constant 0 : index
    %13 = vector.load %arg1[%c3, %c0_14] : memref<8x1024xf32, #tpu.memory_space<vmem>>, vector<1x96xf32>
    %c4 = arith.constant 4 : index
    %c0_15 = arith.constant 0 : index
    %14 = vector.load %arg1[%c4, %c0_15] : memref<8x1024xf32, #tpu.memory_space<vmem>>, vector<1x96xf32>
    %c5 = arith.constant 5 : index
    %c0_16 = arith.constant 0 : index
    %15 = vector.load %arg1[%c5, %c0_16] : memref<8x1024xf32, #tpu.memory_space<vmem>>, vector<1x16xf32>
    %c6 = arith.constant 6 : index
    %c0_17 = arith.constant 0 : index
    %16 = vector.load %arg1[%c6, %c0_17] : memref<8x1024xf32, #tpu.memory_space<vmem>>, vector<1x8xf32>
    %c7 = arith.constant 7 : index
    %c0_18 = arith.constant 0 : index
    %17 = vector.load %arg1[%c7, %c0_18] : memref<8x1024xf32, #tpu.memory_space<vmem>>, vector<1x2xf32>
    %c0_19 = arith.constant 0 : index
    %c0_20 = arith.constant 0 : index
    %18 = vector.load %arg3[%c0_19, %c0_20] : memref<1024x32xf32, #tpu.memory_space<vmem>>, vector<1024x32xf32>
    %c0_21 = arith.constant 0 : index
    %c0_22 = arith.constant 0 : index
    %19 = vector.load %arg5[%c0_21, %c0_22] : memref<16x8xf32, #tpu.memory_space<vmem>>, vector<16x8xf32>
    %cst = arith.constant dense<0.000000e+00> : vector<16x32xf32>
    %20 = tpu.matmul %19, %1, %cst {dimension_numbers = #tpu.dot_dimension_numbers<[1], [0], [0], [1], [0, 0, 1, 1], [], []>} : vector<16x8xf32>, vector<8x32xf32>, vector<16x32xf32> -> vector<16x32xf32>
    %21 = vector.broadcast %11 : vector<1x32xf32> to vector<16x32xf32>
    %22 = arith.addf %20, %21 : vector<16x32xf32>
    %cst_23 = arith.constant 0.000000e+00 : f32
    %23 = vector.broadcast %cst_23 : f32 to vector<16x32xf32>
    %24 = arith.maximumf %22, %23 : vector<16x32xf32>
    %c0_24 = arith.constant 0 : index
    %c0_25 = arith.constant 0 : index
    %25 = vector.load %arg2[%c0_24, %c0_25] : memref<32x1024xf32, #tpu.memory_space<vmem>>, vector<32x1024xf32>
    %cst_26 = arith.constant dense<0.000000e+00> : vector<16x1024xf32>
    %26 = tpu.matmul %24, %25, %cst_26 {dimension_numbers = #tpu.dot_dimension_numbers<[1], [0], [0], [1], [0, 0, 1, 1], [], []>} : vector<16x32xf32>, vector<32x1024xf32>, vector<16x1024xf32> -> vector<16x1024xf32>
    %27 = vector.broadcast %12 : vector<1x1024xf32> to vector<16x1024xf32>
    %28 = arith.addf %26, %27 : vector<16x1024xf32>
    %c0_27 = arith.constant 0 : index
    %c0_28 = arith.constant 0 : index
    %29 = vector.load %arg4[%c0_27, %c0_28] : memref<8x16xf32, #tpu.memory_space<vmem>>, vector<8x16xf32>
    %cst_29 = arith.constant dense<0.000000e+00> : vector<8x32xf32>
    %30 = tpu.matmul %29, %0, %cst_29 {dimension_numbers = #tpu.dot_dimension_numbers<[1], [0], [0], [1], [0, 0, 1, 1], [], []>} : vector<8x16xf32>, vector<16x32xf32>, vector<8x32xf32> -> vector<8x32xf32>
    %31 = vector.broadcast %10 : vector<1x32xf32> to vector<8x32xf32>
    %32 = arith.addf %30, %31 : vector<8x32xf32>
    %cst_30 = arith.constant 0.000000e+00 : f32
    %33 = vector.broadcast %cst_30 : f32 to vector<8x32xf32>
    %34 = arith.maximumf %32, %33 : vector<8x32xf32>
    %35 = tpu.concatenate %34, %34, %34, %34, %34, %34, %34, %34, %34, %34, %34, %34, %34, %34, %34, %34 in 1 : vector<8x32xf32>, vector<8x32xf32>, vector<8x32xf32>, vector<8x32xf32>, vector<8x32xf32>, vector<8x32xf32>, vector<8x32xf32>, vector<8x32xf32>, vector<8x32xf32>, vector<8x32xf32>, vector<8x32xf32>, vector<8x32xf32>, vector<8x32xf32>, vector<8x32xf32>, vector<8x32xf32>, vector<8x32xf32> -> vector<8x512xf32>
    %36 = tpu.concatenate %34, %34, %34, %34, %34, %34, %34, %34, %34, %34, %34, %34, %34, %34, %34, %34 in 1 : vector<8x32xf32>, vector<8x32xf32>, vector<8x32xf32>, vector<8x32xf32>, vector<8x32xf32>, vector<8x32xf32>, vector<8x32xf32>, vector<8x32xf32>, vector<8x32xf32>, vector<8x32xf32>, vector<8x32xf32>, vector<8x32xf32>, vector<8x32xf32>, vector<8x32xf32>, vector<8x32xf32>, vector<8x32xf32> -> vector<8x512xf32>
    %37 = tpu.concatenate %35, %36 in 1 : vector<8x512xf32>, vector<8x512xf32> -> vector<8x1024xf32>
    %cst_31 = arith.constant dense<0.000000e+00> : vector<16x1024xf32>
    %38 = tpu.matmul %7, %37, %cst_31 {dimension_numbers = #tpu.dot_dimension_numbers<[1], [0], [0], [1], [0, 0, 1, 1], [], []>} : vector<16x8xf32>, vector<8x1024xf32>, vector<16x1024xf32> -> vector<16x1024xf32>
    %39 = arith.mulf %38, %28 : vector<16x1024xf32>
    %cst_32 = arith.constant dense<0.000000e+00> : vector<16x32xf32>
    %40 = tpu.matmul %39, %18, %cst_32 {dimension_numbers = #tpu.dot_dimension_numbers<[1], [0], [0], [1], [0, 0, 1, 1], [], []>} : vector<16x1024xf32>, vector<1024x32xf32>, vector<16x32xf32> -> vector<16x32xf32>
    %cst_33 = arith.constant dense<0.000000e+00> : vector<8x32xf32>
    %41 = tpu.matmul %8, %40, %cst_33 {dimension_numbers = #tpu.dot_dimension_numbers<[1], [0], [0], [1], [0, 0, 1, 1], [], []>} : vector<8x16xf32>, vector<16x32xf32>, vector<8x32xf32> -> vector<8x32xf32>
    %cst_34 = arith.constant 0.000000e+00 : f32
    %42 = vector.broadcast %cst_34 : f32 to vector<8x32xf32>
    %43 = arith.maximumf %41, %42 : vector<8x32xf32>
    %cst_35 = arith.constant dense<0.000000e+00> : vector<8x96xf32>
    %44 = tpu.matmul %43, %2, %cst_35 {dimension_numbers = #tpu.dot_dimension_numbers<[1], [0], [0], [1], [0, 0, 1, 1], [], []>} : vector<8x32xf32>, vector<32x96xf32>, vector<8x96xf32> -> vector<8x96xf32>
    %45 = vector.broadcast %13 : vector<1x96xf32> to vector<8x96xf32>
    %46 = arith.addf %44, %45 : vector<8x96xf32>
    %cst_36 = arith.constant dense<0.000000e+00> : vector<8x96xf32>
    %47 = tpu.matmul %34, %3, %cst_36 {dimension_numbers = #tpu.dot_dimension_numbers<[1], [0], [0], [1], [0, 0, 1, 1], [], []>} : vector<8x32xf32>, vector<32x96xf32>, vector<8x96xf32> -> vector<8x96xf32>
    %48 = vector.broadcast %14 : vector<1x96xf32> to vector<8x96xf32>
    %49 = arith.addf %47, %48 : vector<8x96xf32>
    %50 = vector.extract_strided_slice %46 {offsets = [0, 0], sizes = [8, 32], strides = [1, 1]} : vector<8x96xf32> to vector<8x32xf32>
    %51 = vector.extract_strided_slice %49 {offsets = [0, 0], sizes = [8, 32], strides = [1, 1]} : vector<8x96xf32> to vector<8x32xf32>
    %52 = arith.addf %50, %51 : vector<8x32xf32>
    %53 = arith.negf %52 : vector<8x32xf32>
    %54 = math.exp %53 : vector<8x32xf32>
    %cst_37 = arith.constant 1.000000e+00 : f32
    %55 = vector.broadcast %cst_37 : f32 to vector<8x32xf32>
    %56 = arith.addf %55, %54 : vector<8x32xf32>
    %57 = arith.divf %55, %56 : vector<8x32xf32>
    %58 = vector.extract_strided_slice %46 {offsets = [0, 32], sizes = [8, 32], strides = [1, 1]} : vector<8x96xf32> to vector<8x32xf32>
    %59 = vector.extract_strided_slice %49 {offsets = [0, 32], sizes = [8, 32], strides = [1, 1]} : vector<8x96xf32> to vector<8x32xf32>
    %60 = arith.addf %58, %59 : vector<8x32xf32>
    %61 = arith.negf %60 : vector<8x32xf32>
    %62 = math.exp %61 : vector<8x32xf32>
    %cst_38 = arith.constant 1.000000e+00 : f32
    %63 = vector.broadcast %cst_38 : f32 to vector<8x32xf32>
    %64 = arith.addf %63, %62 : vector<8x32xf32>
    %65 = arith.divf %63, %64 : vector<8x32xf32>
    %66 = vector.extract_strided_slice %46 {offsets = [0, 64], sizes = [8, 32], strides = [1, 1]} : vector<8x96xf32> to vector<8x32xf32>
    %67 = vector.extract_strided_slice %49 {offsets = [0, 64], sizes = [8, 32], strides = [1, 1]} : vector<8x96xf32> to vector<8x32xf32>
    %68 = arith.mulf %57, %67 : vector<8x32xf32>
    %69 = arith.addf %66, %68 : vector<8x32xf32>
    %70 = math.tanh %69 : vector<8x32xf32>
    %cst_39 = arith.constant 1.000000e+00 : f32
    %71 = vector.broadcast %cst_39 : f32 to vector<8x32xf32>
    %72 = arith.subf %71, %65 : vector<8x32xf32>
    %73 = arith.mulf %72, %70 : vector<8x32xf32>
    %74 = arith.mulf %65, %34 : vector<8x32xf32>
    %75 = arith.addf %73, %74 : vector<8x32xf32>
    %76 = tpu.concatenate %75, %75, %75, %75, %75, %75, %75, %75, %75, %75, %75, %75, %75, %75, %75, %75 in 1 : vector<8x32xf32>, vector<8x32xf32>, vector<8x32xf32>, vector<8x32xf32>, vector<8x32xf32>, vector<8x32xf32>, vector<8x32xf32>, vector<8x32xf32>, vector<8x32xf32>, vector<8x32xf32>, vector<8x32xf32>, vector<8x32xf32>, vector<8x32xf32>, vector<8x32xf32>, vector<8x32xf32>, vector<8x32xf32> -> vector<8x512xf32>
    %77 = tpu.concatenate %75, %75, %75, %75, %75, %75, %75, %75, %75, %75, %75, %75, %75, %75, %75, %75 in 1 : vector<8x32xf32>, vector<8x32xf32>, vector<8x32xf32>, vector<8x32xf32>, vector<8x32xf32>, vector<8x32xf32>, vector<8x32xf32>, vector<8x32xf32>, vector<8x32xf32>, vector<8x32xf32>, vector<8x32xf32>, vector<8x32xf32>, vector<8x32xf32>, vector<8x32xf32>, vector<8x32xf32>, vector<8x32xf32> -> vector<8x512xf32>
    %78 = tpu.concatenate %76, %77 in 1 : vector<8x512xf32>, vector<8x512xf32> -> vector<8x1024xf32>
    %cst_40 = arith.constant dense<0.000000e+00> : vector<16x1024xf32>
    %79 = tpu.matmul %7, %78, %cst_40 {dimension_numbers = #tpu.dot_dimension_numbers<[1], [0], [0], [1], [0, 0, 1, 1], [], []>} : vector<16x8xf32>, vector<8x1024xf32>, vector<16x1024xf32> -> vector<16x1024xf32>
    %80 = arith.mulf %79, %28 : vector<16x1024xf32>
    %cst_41 = arith.constant dense<0.000000e+00> : vector<16x32xf32>
    %81 = tpu.matmul %80, %18, %cst_41 {dimension_numbers = #tpu.dot_dimension_numbers<[1], [0], [0], [1], [0, 0, 1, 1], [], []>} : vector<16x1024xf32>, vector<1024x32xf32>, vector<16x32xf32> -> vector<16x32xf32>
    %cst_42 = arith.constant dense<0.000000e+00> : vector<8x32xf32>
    %82 = tpu.matmul %8, %81, %cst_42 {dimension_numbers = #tpu.dot_dimension_numbers<[1], [0], [0], [1], [0, 0, 1, 1], [], []>} : vector<8x16xf32>, vector<16x32xf32>, vector<8x32xf32> -> vector<8x32xf32>
    %cst_43 = arith.constant 0.000000e+00 : f32
    %83 = vector.broadcast %cst_43 : f32 to vector<8x32xf32>
    %84 = arith.maximumf %82, %83 : vector<8x32xf32>
    %cst_44 = arith.constant dense<0.000000e+00> : vector<8x96xf32>
    %85 = tpu.matmul %84, %2, %cst_44 {dimension_numbers = #tpu.dot_dimension_numbers<[1], [0], [0], [1], [0, 0, 1, 1], [], []>} : vector<8x32xf32>, vector<32x96xf32>, vector<8x96xf32> -> vector<8x96xf32>
    %86 = vector.broadcast %13 : vector<1x96xf32> to vector<8x96xf32>
    %87 = arith.addf %85, %86 : vector<8x96xf32>
    %cst_45 = arith.constant dense<0.000000e+00> : vector<8x96xf32>
    %88 = tpu.matmul %75, %3, %cst_45 {dimension_numbers = #tpu.dot_dimension_numbers<[1], [0], [0], [1], [0, 0, 1, 1], [], []>} : vector<8x32xf32>, vector<32x96xf32>, vector<8x96xf32> -> vector<8x96xf32>
    %89 = vector.broadcast %14 : vector<1x96xf32> to vector<8x96xf32>
    %90 = arith.addf %88, %89 : vector<8x96xf32>
    %91 = vector.extract_strided_slice %87 {offsets = [0, 0], sizes = [8, 32], strides = [1, 1]} : vector<8x96xf32> to vector<8x32xf32>
    %92 = vector.extract_strided_slice %90 {offsets = [0, 0], sizes = [8, 32], strides = [1, 1]} : vector<8x96xf32> to vector<8x32xf32>
    %93 = arith.addf %91, %92 : vector<8x32xf32>
    %94 = arith.negf %93 : vector<8x32xf32>
    %95 = math.exp %94 : vector<8x32xf32>
    %cst_46 = arith.constant 1.000000e+00 : f32
    %96 = vector.broadcast %cst_46 : f32 to vector<8x32xf32>
    %97 = arith.addf %96, %95 : vector<8x32xf32>
    %98 = arith.divf %96, %97 : vector<8x32xf32>
    %99 = vector.extract_strided_slice %87 {offsets = [0, 32], sizes = [8, 32], strides = [1, 1]} : vector<8x96xf32> to vector<8x32xf32>
    %100 = vector.extract_strided_slice %90 {offsets = [0, 32], sizes = [8, 32], strides = [1, 1]} : vector<8x96xf32> to vector<8x32xf32>
    %101 = arith.addf %99, %100 : vector<8x32xf32>
    %102 = arith.negf %101 : vector<8x32xf32>
    %103 = math.exp %102 : vector<8x32xf32>
    %cst_47 = arith.constant 1.000000e+00 : f32
    %104 = vector.broadcast %cst_47 : f32 to vector<8x32xf32>
    %105 = arith.addf %104, %103 : vector<8x32xf32>
    %106 = arith.divf %104, %105 : vector<8x32xf32>
    %107 = vector.extract_strided_slice %87 {offsets = [0, 64], sizes = [8, 32], strides = [1, 1]} : vector<8x96xf32> to vector<8x32xf32>
    %108 = vector.extract_strided_slice %90 {offsets = [0, 64], sizes = [8, 32], strides = [1, 1]} : vector<8x96xf32> to vector<8x32xf32>
    %109 = arith.mulf %98, %108 : vector<8x32xf32>
    %110 = arith.addf %107, %109 : vector<8x32xf32>
    %111 = math.tanh %110 : vector<8x32xf32>
    %cst_48 = arith.constant 1.000000e+00 : f32
    %112 = vector.broadcast %cst_48 : f32 to vector<8x32xf32>
    %113 = arith.subf %112, %106 : vector<8x32xf32>
    %114 = arith.mulf %113, %111 : vector<8x32xf32>
    %115 = arith.mulf %106, %75 : vector<8x32xf32>
    %116 = arith.addf %114, %115 : vector<8x32xf32>
    %117 = tpu.concatenate %116, %116, %116, %116, %116, %116, %116, %116, %116, %116, %116, %116, %116, %116, %116, %116 in 1 : vector<8x32xf32>, vector<8x32xf32>, vector<8x32xf32>, vector<8x32xf32>, vector<8x32xf32>, vector<8x32xf32>, vector<8x32xf32>, vector<8x32xf32>, vector<8x32xf32>, vector<8x32xf32>, vector<8x32xf32>, vector<8x32xf32>, vector<8x32xf32>, vector<8x32xf32>, vector<8x32xf32>, vector<8x32xf32> -> vector<8x512xf32>
    %118 = tpu.concatenate %116, %116, %116, %116, %116, %116, %116, %116, %116, %116, %116, %116, %116, %116, %116, %116 in 1 : vector<8x32xf32>, vector<8x32xf32>, vector<8x32xf32>, vector<8x32xf32>, vector<8x32xf32>, vector<8x32xf32>, vector<8x32xf32>, vector<8x32xf32>, vector<8x32xf32>, vector<8x32xf32>, vector<8x32xf32>, vector<8x32xf32>, vector<8x32xf32>, vector<8x32xf32>, vector<8x32xf32>, vector<8x32xf32> -> vector<8x512xf32>
    %119 = tpu.concatenate %117, %118 in 1 : vector<8x512xf32>, vector<8x512xf32> -> vector<8x1024xf32>
    %cst_49 = arith.constant dense<0.000000e+00> : vector<16x1024xf32>
    %120 = tpu.matmul %7, %119, %cst_49 {dimension_numbers = #tpu.dot_dimension_numbers<[1], [0], [0], [1], [0, 0, 1, 1], [], []>} : vector<16x8xf32>, vector<8x1024xf32>, vector<16x1024xf32> -> vector<16x1024xf32>
    %121 = arith.mulf %120, %28 : vector<16x1024xf32>
    %cst_50 = arith.constant dense<0.000000e+00> : vector<16x32xf32>
    %122 = tpu.matmul %121, %18, %cst_50 {dimension_numbers = #tpu.dot_dimension_numbers<[1], [0], [0], [1], [0, 0, 1, 1], [], []>} : vector<16x1024xf32>, vector<1024x32xf32>, vector<16x32xf32> -> vector<16x32xf32>
    %cst_51 = arith.constant dense<0.000000e+00> : vector<8x32xf32>
    %123 = tpu.matmul %8, %122, %cst_51 {dimension_numbers = #tpu.dot_dimension_numbers<[1], [0], [0], [1], [0, 0, 1, 1], [], []>} : vector<8x16xf32>, vector<16x32xf32>, vector<8x32xf32> -> vector<8x32xf32>
    %cst_52 = arith.constant 0.000000e+00 : f32
    %124 = vector.broadcast %cst_52 : f32 to vector<8x32xf32>
    %125 = arith.maximumf %123, %124 : vector<8x32xf32>
    %cst_53 = arith.constant dense<0.000000e+00> : vector<8x96xf32>
    %126 = tpu.matmul %125, %2, %cst_53 {dimension_numbers = #tpu.dot_dimension_numbers<[1], [0], [0], [1], [0, 0, 1, 1], [], []>} : vector<8x32xf32>, vector<32x96xf32>, vector<8x96xf32> -> vector<8x96xf32>
    %127 = vector.broadcast %13 : vector<1x96xf32> to vector<8x96xf32>
    %128 = arith.addf %126, %127 : vector<8x96xf32>
    %cst_54 = arith.constant dense<0.000000e+00> : vector<8x96xf32>
    %129 = tpu.matmul %116, %3, %cst_54 {dimension_numbers = #tpu.dot_dimension_numbers<[1], [0], [0], [1], [0, 0, 1, 1], [], []>} : vector<8x32xf32>, vector<32x96xf32>, vector<8x96xf32> -> vector<8x96xf32>
    %130 = vector.broadcast %14 : vector<1x96xf32> to vector<8x96xf32>
    %131 = arith.addf %129, %130 : vector<8x96xf32>
    %132 = vector.extract_strided_slice %128 {offsets = [0, 0], sizes = [8, 32], strides = [1, 1]} : vector<8x96xf32> to vector<8x32xf32>
    %133 = vector.extract_strided_slice %131 {offsets = [0, 0], sizes = [8, 32], strides = [1, 1]} : vector<8x96xf32> to vector<8x32xf32>
    %134 = arith.addf %132, %133 : vector<8x32xf32>
    %135 = arith.negf %134 : vector<8x32xf32>
    %136 = math.exp %135 : vector<8x32xf32>
    %cst_55 = arith.constant 1.000000e+00 : f32
    %137 = vector.broadcast %cst_55 : f32 to vector<8x32xf32>
    %138 = arith.addf %137, %136 : vector<8x32xf32>
    %139 = arith.divf %137, %138 : vector<8x32xf32>
    %140 = vector.extract_strided_slice %128 {offsets = [0, 32], sizes = [8, 32], strides = [1, 1]} : vector<8x96xf32> to vector<8x32xf32>
    %141 = vector.extract_strided_slice %131 {offsets = [0, 32], sizes = [8, 32], strides = [1, 1]} : vector<8x96xf32> to vector<8x32xf32>
    %142 = arith.addf %140, %141 : vector<8x32xf32>
    %143 = arith.negf %142 : vector<8x32xf32>
    %144 = math.exp %143 : vector<8x32xf32>
    %cst_56 = arith.constant 1.000000e+00 : f32
    %145 = vector.broadcast %cst_56 : f32 to vector<8x32xf32>
    %146 = arith.addf %145, %144 : vector<8x32xf32>
    %147 = arith.divf %145, %146 : vector<8x32xf32>
    %148 = vector.extract_strided_slice %128 {offsets = [0, 64], sizes = [8, 32], strides = [1, 1]} : vector<8x96xf32> to vector<8x32xf32>
    %149 = vector.extract_strided_slice %131 {offsets = [0, 64], sizes = [8, 32], strides = [1, 1]} : vector<8x96xf32> to vector<8x32xf32>
    %150 = arith.mulf %139, %149 : vector<8x32xf32>
    %151 = arith.addf %148, %150 : vector<8x32xf32>
    %152 = math.tanh %151 : vector<8x32xf32>
    %cst_57 = arith.constant 1.000000e+00 : f32
    %153 = vector.broadcast %cst_57 : f32 to vector<8x32xf32>
    %154 = arith.subf %153, %147 : vector<8x32xf32>
    %155 = arith.mulf %154, %152 : vector<8x32xf32>
    %156 = arith.mulf %147, %116 : vector<8x32xf32>
    %157 = arith.addf %155, %156 : vector<8x32xf32>
    %158 = tpu.concatenate %157, %157, %157, %157, %157, %157, %157, %157, %157, %157, %157, %157, %157, %157, %157, %157 in 1 : vector<8x32xf32>, vector<8x32xf32>, vector<8x32xf32>, vector<8x32xf32>, vector<8x32xf32>, vector<8x32xf32>, vector<8x32xf32>, vector<8x32xf32>, vector<8x32xf32>, vector<8x32xf32>, vector<8x32xf32>, vector<8x32xf32>, vector<8x32xf32>, vector<8x32xf32>, vector<8x32xf32>, vector<8x32xf32> -> vector<8x512xf32>
    %159 = tpu.concatenate %157, %157, %157, %157, %157, %157, %157, %157, %157, %157, %157, %157, %157, %157, %157, %157 in 1 : vector<8x32xf32>, vector<8x32xf32>, vector<8x32xf32>, vector<8x32xf32>, vector<8x32xf32>, vector<8x32xf32>, vector<8x32xf32>, vector<8x32xf32>, vector<8x32xf32>, vector<8x32xf32>, vector<8x32xf32>, vector<8x32xf32>, vector<8x32xf32>, vector<8x32xf32>, vector<8x32xf32>, vector<8x32xf32> -> vector<8x512xf32>
    %160 = tpu.concatenate %158, %159 in 1 : vector<8x512xf32>, vector<8x512xf32> -> vector<8x1024xf32>
    %cst_58 = arith.constant dense<0.000000e+00> : vector<16x1024xf32>
    %161 = tpu.matmul %7, %160, %cst_58 {dimension_numbers = #tpu.dot_dimension_numbers<[1], [0], [0], [1], [0, 0, 1, 1], [], []>} : vector<16x8xf32>, vector<8x1024xf32>, vector<16x1024xf32> -> vector<16x1024xf32>
    %162 = arith.mulf %161, %28 : vector<16x1024xf32>
    %cst_59 = arith.constant dense<0.000000e+00> : vector<16x32xf32>
    %163 = tpu.matmul %162, %18, %cst_59 {dimension_numbers = #tpu.dot_dimension_numbers<[1], [0], [0], [1], [0, 0, 1, 1], [], []>} : vector<16x1024xf32>, vector<1024x32xf32>, vector<16x32xf32> -> vector<16x32xf32>
    %cst_60 = arith.constant dense<0.000000e+00> : vector<8x32xf32>
    %164 = tpu.matmul %8, %163, %cst_60 {dimension_numbers = #tpu.dot_dimension_numbers<[1], [0], [0], [1], [0, 0, 1, 1], [], []>} : vector<8x16xf32>, vector<16x32xf32>, vector<8x32xf32> -> vector<8x32xf32>
    %cst_61 = arith.constant 0.000000e+00 : f32
    %165 = vector.broadcast %cst_61 : f32 to vector<8x32xf32>
    %166 = arith.maximumf %164, %165 : vector<8x32xf32>
    %cst_62 = arith.constant dense<0.000000e+00> : vector<8x96xf32>
    %167 = tpu.matmul %166, %2, %cst_62 {dimension_numbers = #tpu.dot_dimension_numbers<[1], [0], [0], [1], [0, 0, 1, 1], [], []>} : vector<8x32xf32>, vector<32x96xf32>, vector<8x96xf32> -> vector<8x96xf32>
    %168 = vector.broadcast %13 : vector<1x96xf32> to vector<8x96xf32>
    %169 = arith.addf %167, %168 : vector<8x96xf32>
    %cst_63 = arith.constant dense<0.000000e+00> : vector<8x96xf32>
    %170 = tpu.matmul %157, %3, %cst_63 {dimension_numbers = #tpu.dot_dimension_numbers<[1], [0], [0], [1], [0, 0, 1, 1], [], []>} : vector<8x32xf32>, vector<32x96xf32>, vector<8x96xf32> -> vector<8x96xf32>
    %171 = vector.broadcast %14 : vector<1x96xf32> to vector<8x96xf32>
    %172 = arith.addf %170, %171 : vector<8x96xf32>
    %173 = vector.extract_strided_slice %169 {offsets = [0, 0], sizes = [8, 32], strides = [1, 1]} : vector<8x96xf32> to vector<8x32xf32>
    %174 = vector.extract_strided_slice %172 {offsets = [0, 0], sizes = [8, 32], strides = [1, 1]} : vector<8x96xf32> to vector<8x32xf32>
    %175 = arith.addf %173, %174 : vector<8x32xf32>
    %176 = arith.negf %175 : vector<8x32xf32>
    %177 = math.exp %176 : vector<8x32xf32>
    %cst_64 = arith.constant 1.000000e+00 : f32
    %178 = vector.broadcast %cst_64 : f32 to vector<8x32xf32>
    %179 = arith.addf %178, %177 : vector<8x32xf32>
    %180 = arith.divf %178, %179 : vector<8x32xf32>
    %181 = vector.extract_strided_slice %169 {offsets = [0, 32], sizes = [8, 32], strides = [1, 1]} : vector<8x96xf32> to vector<8x32xf32>
    %182 = vector.extract_strided_slice %172 {offsets = [0, 32], sizes = [8, 32], strides = [1, 1]} : vector<8x96xf32> to vector<8x32xf32>
    %183 = arith.addf %181, %182 : vector<8x32xf32>
    %184 = arith.negf %183 : vector<8x32xf32>
    %185 = math.exp %184 : vector<8x32xf32>
    %cst_65 = arith.constant 1.000000e+00 : f32
    %186 = vector.broadcast %cst_65 : f32 to vector<8x32xf32>
    %187 = arith.addf %186, %185 : vector<8x32xf32>
    %188 = arith.divf %186, %187 : vector<8x32xf32>
    %189 = vector.extract_strided_slice %169 {offsets = [0, 64], sizes = [8, 32], strides = [1, 1]} : vector<8x96xf32> to vector<8x32xf32>
    %190 = vector.extract_strided_slice %172 {offsets = [0, 64], sizes = [8, 32], strides = [1, 1]} : vector<8x96xf32> to vector<8x32xf32>
    %191 = arith.mulf %180, %190 : vector<8x32xf32>
    %192 = arith.addf %189, %191 : vector<8x32xf32>
    %193 = math.tanh %192 : vector<8x32xf32>
    %cst_66 = arith.constant 1.000000e+00 : f32
    %194 = vector.broadcast %cst_66 : f32 to vector<8x32xf32>
    %195 = arith.subf %194, %188 : vector<8x32xf32>
    %196 = arith.mulf %195, %193 : vector<8x32xf32>
    %197 = arith.mulf %188, %157 : vector<8x32xf32>
    %198 = arith.addf %196, %197 : vector<8x32xf32>
    %199 = tpu.concatenate %198, %198, %198, %198, %198, %198, %198, %198, %198, %198, %198, %198, %198, %198, %198, %198 in 1 : vector<8x32xf32>, vector<8x32xf32>, vector<8x32xf32>, vector<8x32xf32>, vector<8x32xf32>, vector<8x32xf32>, vector<8x32xf32>, vector<8x32xf32>, vector<8x32xf32>, vector<8x32xf32>, vector<8x32xf32>, vector<8x32xf32>, vector<8x32xf32>, vector<8x32xf32>, vector<8x32xf32>, vector<8x32xf32> -> vector<8x512xf32>
    %200 = tpu.concatenate %198, %198, %198, %198, %198, %198, %198, %198, %198, %198, %198, %198, %198, %198, %198, %198 in 1 : vector<8x32xf32>, vector<8x32xf32>, vector<8x32xf32>, vector<8x32xf32>, vector<8x32xf32>, vector<8x32xf32>, vector<8x32xf32>, vector<8x32xf32>, vector<8x32xf32>, vector<8x32xf32>, vector<8x32xf32>, vector<8x32xf32>, vector<8x32xf32>, vector<8x32xf32>, vector<8x32xf32>, vector<8x32xf32> -> vector<8x512xf32>
    %201 = tpu.concatenate %199, %200 in 1 : vector<8x512xf32>, vector<8x512xf32> -> vector<8x1024xf32>
    %cst_67 = arith.constant dense<0.000000e+00> : vector<16x1024xf32>
    %202 = tpu.matmul %7, %201, %cst_67 {dimension_numbers = #tpu.dot_dimension_numbers<[1], [0], [0], [1], [0, 0, 1, 1], [], []>} : vector<16x8xf32>, vector<8x1024xf32>, vector<16x1024xf32> -> vector<16x1024xf32>
    %203 = arith.mulf %202, %28 : vector<16x1024xf32>
    %cst_68 = arith.constant dense<0.000000e+00> : vector<16x32xf32>
    %204 = tpu.matmul %203, %18, %cst_68 {dimension_numbers = #tpu.dot_dimension_numbers<[1], [0], [0], [1], [0, 0, 1, 1], [], []>} : vector<16x1024xf32>, vector<1024x32xf32>, vector<16x32xf32> -> vector<16x32xf32>
    %cst_69 = arith.constant dense<0.000000e+00> : vector<8x32xf32>
    %205 = tpu.matmul %8, %204, %cst_69 {dimension_numbers = #tpu.dot_dimension_numbers<[1], [0], [0], [1], [0, 0, 1, 1], [], []>} : vector<8x16xf32>, vector<16x32xf32>, vector<8x32xf32> -> vector<8x32xf32>
    %cst_70 = arith.constant 0.000000e+00 : f32
    %206 = vector.broadcast %cst_70 : f32 to vector<8x32xf32>
    %207 = arith.maximumf %205, %206 : vector<8x32xf32>
    %cst_71 = arith.constant dense<0.000000e+00> : vector<8x96xf32>
    %208 = tpu.matmul %207, %2, %cst_71 {dimension_numbers = #tpu.dot_dimension_numbers<[1], [0], [0], [1], [0, 0, 1, 1], [], []>} : vector<8x32xf32>, vector<32x96xf32>, vector<8x96xf32> -> vector<8x96xf32>
    %209 = vector.broadcast %13 : vector<1x96xf32> to vector<8x96xf32>
    %210 = arith.addf %208, %209 : vector<8x96xf32>
    %cst_72 = arith.constant dense<0.000000e+00> : vector<8x96xf32>
    %211 = tpu.matmul %198, %3, %cst_72 {dimension_numbers = #tpu.dot_dimension_numbers<[1], [0], [0], [1], [0, 0, 1, 1], [], []>} : vector<8x32xf32>, vector<32x96xf32>, vector<8x96xf32> -> vector<8x96xf32>
    %212 = vector.broadcast %14 : vector<1x96xf32> to vector<8x96xf32>
    %213 = arith.addf %211, %212 : vector<8x96xf32>
    %214 = vector.extract_strided_slice %210 {offsets = [0, 0], sizes = [8, 32], strides = [1, 1]} : vector<8x96xf32> to vector<8x32xf32>
    %215 = vector.extract_strided_slice %213 {offsets = [0, 0], sizes = [8, 32], strides = [1, 1]} : vector<8x96xf32> to vector<8x32xf32>
    %216 = arith.addf %214, %215 : vector<8x32xf32>
    %217 = arith.negf %216 : vector<8x32xf32>
    %218 = math.exp %217 : vector<8x32xf32>
    %cst_73 = arith.constant 1.000000e+00 : f32
    %219 = vector.broadcast %cst_73 : f32 to vector<8x32xf32>
    %220 = arith.addf %219, %218 : vector<8x32xf32>
    %221 = arith.divf %219, %220 : vector<8x32xf32>
    %222 = vector.extract_strided_slice %210 {offsets = [0, 32], sizes = [8, 32], strides = [1, 1]} : vector<8x96xf32> to vector<8x32xf32>
    %223 = vector.extract_strided_slice %213 {offsets = [0, 32], sizes = [8, 32], strides = [1, 1]} : vector<8x96xf32> to vector<8x32xf32>
    %224 = arith.addf %222, %223 : vector<8x32xf32>
    %225 = arith.negf %224 : vector<8x32xf32>
    %226 = math.exp %225 : vector<8x32xf32>
    %cst_74 = arith.constant 1.000000e+00 : f32
    %227 = vector.broadcast %cst_74 : f32 to vector<8x32xf32>
    %228 = arith.addf %227, %226 : vector<8x32xf32>
    %229 = arith.divf %227, %228 : vector<8x32xf32>
    %230 = vector.extract_strided_slice %210 {offsets = [0, 64], sizes = [8, 32], strides = [1, 1]} : vector<8x96xf32> to vector<8x32xf32>
    %231 = vector.extract_strided_slice %213 {offsets = [0, 64], sizes = [8, 32], strides = [1, 1]} : vector<8x96xf32> to vector<8x32xf32>
    %232 = arith.mulf %221, %231 : vector<8x32xf32>
    %233 = arith.addf %230, %232 : vector<8x32xf32>
    %234 = math.tanh %233 : vector<8x32xf32>
    %cst_75 = arith.constant 1.000000e+00 : f32
    %235 = vector.broadcast %cst_75 : f32 to vector<8x32xf32>
    %236 = arith.subf %235, %229 : vector<8x32xf32>
    %237 = arith.mulf %236, %234 : vector<8x32xf32>
    %238 = arith.mulf %229, %198 : vector<8x32xf32>
    %239 = arith.addf %237, %238 : vector<8x32xf32>
    %cst_76 = arith.constant dense<0.000000e+00> : vector<2x32xf32>
    %240 = tpu.matmul %9, %239, %cst_76 {dimension_numbers = #tpu.dot_dimension_numbers<[1], [0], [0], [1], [0, 0, 1, 1], [], []>} : vector<2x8xf32>, vector<8x32xf32>, vector<2x32xf32> -> vector<2x32xf32>
    %cst_77 = arith.constant dense<0.000000e+00> : vector<2x16xf32>
    %241 = tpu.matmul %240, %4, %cst_77 {dimension_numbers = #tpu.dot_dimension_numbers<[1], [0], [0], [1], [0, 0, 1, 1], [], []>} : vector<2x32xf32>, vector<32x16xf32>, vector<2x16xf32> -> vector<2x16xf32>
    %242 = vector.broadcast %15 : vector<1x16xf32> to vector<2x16xf32>
    %243 = arith.addf %241, %242 : vector<2x16xf32>
    %cst_78 = arith.constant 0.000000e+00 : f32
    %244 = vector.broadcast %cst_78 : f32 to vector<2x16xf32>
    %245 = arith.maximumf %243, %244 : vector<2x16xf32>
    %cst_79 = arith.constant dense<0.000000e+00> : vector<2x8xf32>
    %246 = tpu.matmul %245, %5, %cst_79 {dimension_numbers = #tpu.dot_dimension_numbers<[1], [0], [0], [1], [0, 0, 1, 1], [], []>} : vector<2x16xf32>, vector<16x8xf32>, vector<2x8xf32> -> vector<2x8xf32>
    %247 = vector.broadcast %16 : vector<1x8xf32> to vector<2x8xf32>
    %248 = arith.addf %246, %247 : vector<2x8xf32>
    %cst_80 = arith.constant 0.000000e+00 : f32
    %249 = vector.broadcast %cst_80 : f32 to vector<2x8xf32>
    %250 = arith.maximumf %248, %249 : vector<2x8xf32>
    %cst_81 = arith.constant dense<0.000000e+00> : vector<2x2xf32>
    %251 = tpu.matmul %250, %6, %cst_81 {dimension_numbers = #tpu.dot_dimension_numbers<[1], [0], [0], [1], [0, 0, 1, 1], [], []>} : vector<2x8xf32>, vector<8x2xf32>, vector<2x2xf32> -> vector<2x2xf32>
    %252 = vector.broadcast %17 : vector<1x2xf32> to vector<2x2xf32>
    %253 = arith.addf %251, %252 : vector<2x2xf32>
    %c0_82 = arith.constant 0 : index
    %c0_83 = arith.constant 0 : index
    %254 = vector.load %arg6[%c0_82, %c0_83] : memref<2x2xf32, #tpu.memory_space<vmem>>, vector<2x2xf32>
    tpu.vector_store %arg6[%c0_82, %c0_83], %253 {strides = array<i32>} : memref<2x2xf32, #tpu.memory_space<vmem>>, vector<2x2xf32>,
    return
  }
}

</mosaic_0001>

<bundles_post_ra>
// kernel: mpnn_net_forward.1
= control target key start
LH: loop header
LB: loop body
LE: loop exit
PB: predicated region body
PF: predicated region fallthrough
CT: control target
= control target key end

     0   :  { %s5577_s0 = inlined_call_operand.vmem [shape: f32[32,320], index: 0, kind: input, shape index: {}]   ;;  %s5578_s1 = inlined_call_operand.vmem [shape: f32[8,1024], index: 1, kind: input, shape index: {}]   ;;  %s5579_s2 = inlined_call_operand.vmem [shape: f32[32,1024], index: 2, kind: input, shape index: {}]   ;;  %s5580_s3 = inlined_call_operand.vmem [shape: f32[1024,32], index: 3, kind: input, shape index: {}]   ;;  %s5581_s4 = inlined_call_operand.vmem [shape: f32[8,16], index: 4, kind: input, shape index: {}]   ;;  %s5582_s5 = inlined_call_operand.vmem [shape: f32[16,8], index: 5, kind: input, shape index: {}]   ;;  %s5583_s6 = inlined_call_operand.hbm [shape: f32[2,2], index: 6, kind: output, shape index: {}]  }
   0x1   :  { %v2812_v0 = vld [vmem:[%s5577_s0] sm:$0xff] }
   0x2   :  { %11 = vsyncpa [#allocation3], 0  ;;  %s2766_s23 = smov 96   ;;  %v238_v1 = vld [vmem:[%s5579_s2 + $0xc0] sm:$0xff]  ;;  %v239_v2 = vld [vmem:[%s5579_s2 + $0xc8] sm:$0xff]  ;;  %vm182_vm0 = vcmask 64512  }
   0x3   :  { %179 = vrot.lane.b32.xlu0 %v2812_v0, %s2766_s23  ;;  %v240_v3 = vld [vmem:[%s5579_s2 + $0xd0] sm:$0xff]  ;;  %282 = vmatpush.msra.mxu1 %v238_v1  ;;  %v176_v4 = vld [vmem:[%s5582_s5] sm:$0xff]  ;;  %v241_v6 = vld [vmem:[%s5579_s2 + $0xd8] sm:$0xff]  ;;  %vm263_vm1 = vcmask 261120   ;;  %vm455_vm2 = vcmask 130048   ;;  %s2767_s30 = smov 64  }
   0x4   :  { %305 = vmatpush.msra.mxu2 %v239_v2  ;;  %328 = vmatpush.msra.mxu3 %v240_v3  ;;  %v177_v7 = vld [vmem:[%s5582_s5 + $0x8] sm:$0xff]  ;;  %v230_v8 = vld [vmem:[%s5579_s2 + $0x80] sm:$0xff]  ;;  %v232_v10 = vld [vmem:[%s5579_s2 + $0x90] sm:$0xff]  ;;  %s2768_s7 = smov 32   ;;  %vm491_vm3 = vcmask 523264   ;;  %vm493_vm4 = vcmask 785408  }
   0x5   :  { %v231_v9 = vld [vmem:[%s5579_s2 + $0x88] sm:$0xff]  ;;  %283 = vmatpush.msra.mxu1 %v230_v8  ;;  %v233_v11 = vld [vmem:[%s5579_s2 + $0x98] sm:$0xff]  ;;  %v222_v12 = vld [vmem:[%s5579_s2 + $0x40] sm:$0xff]  ;;  %s2770_s17 = smov 72   ;;  %s2772_s24 = smov 104  }
   0x6   :  { %306 = vmatpush.msra.mxu2 %v231_v9  ;;  %329 = vmatpush.msra.mxu3 %v232_v10  ;;  %v223_v13 = vld [vmem:[%s5579_s2 + $0x48] sm:$0xff]  ;;  %v224_v14 = vld [vmem:[%s5579_s2 + $0x50] sm:$0xff]  ;;  %v225_v15 = vld [vmem:[%s5579_s2 + $0x58] sm:$0xff]  ;;  %s2362_s10 = sshll.u32 %s5583_s6, 4  ;;  %s2363_s10 = int_to_ptr.hbm [resolvable:$true] %s2362_s10 }
   0x7   :  { %284 = vmatpush.msra.mxu1 %v222_v12  ;;  %v214_v16 = vld [vmem:[%s5579_s2] sm:$0xff]  ;;  %v215_v17 = vld [vmem:[%s5579_s2 + $0x8] sm:$0xff]  ;;  %v216_v18 = vld [vmem:[%s5579_s2 + $0x10] sm:$0xff] }
   0x8   :  { %307 = vmatpush.msra.mxu2 %v223_v13  ;;  %330 = vmatpush.msra.mxu3 %v224_v14  ;;  %v217_v19 = vld [vmem:[%s5579_s2 + $0x18] sm:$0xff]  ;;  %v242_v20 = vld [vmem:[%s5579_s2 + $0xe0] sm:$0xff]  ;;  %v243_v21 = vld [vmem:[%s5579_s2 + $0xe8] sm:$0xff] }
   0x9   :  { %285 = vmatpush.msra.mxu1 %v214_v16  ;;  %v244_v22 = vld [vmem:[%s5579_s2 + $0xf0] sm:$0xff]  ;;  %v245_v23 = vld [vmem:[%s5579_s2 + $0xf8] sm:$0xff]  ;;  %v234_v24 = vld [vmem:[%s5579_s2 + $0xa0] sm:$0xff] }
   0xa   :  { %308 = vmatpush.msra.mxu2 %v215_v17  ;;  %331 = vmatpush.msra.mxu3 %v216_v18  ;;  %v235_v25 = vld [vmem:[%s5579_s2 + $0xa8] sm:$0xff]  ;;  %v236_v26 = vld [vmem:[%s5579_s2 + $0xb0] sm:$0xff]  ;;  %v237_v27 = vld [vmem:[%s5579_s2 + $0xb8] sm:$0xff] }
   0xb   :  { %374 = vmatpush.msrb.mxu1 %v242_v20  ;;  %v226_v28 = vld [vmem:[%s5579_s2 + $0x60] sm:$0xff]  ;;  %v227_v29 = vld [vmem:[%s5579_s2 + $0x68] sm:$0xff]  ;;  %v228_v30 = vld [vmem:[%s5579_s2 + $0x70] sm:$0xff] }
   0xc   :  { %397 = vmatpush.msrb.mxu2 %v243_v21  ;;  %420 = vmatpush.msrb.mxu3 %v244_v22  ;;  %v229_v31 = vld [vmem:[%s5579_s2 + $0x78] sm:$0xff]  ;;  %v218_v32 = vld [vmem:[%s5579_s2 + $0x20] sm:$0xff]  ;;  %v219_v33 = vld [vmem:[%s5579_s2 + $0x28] sm:$0xff] }
   0xd   :  { %375 = vmatpush.msrb.mxu1 %v234_v24  ;;  %v220_v34 = vld [vmem:[%s5579_s2 + $0x30] sm:$0xff]  ;;  %v221_v35 = vld [vmem:[%s5579_s2 + $0x38] sm:$0xff]  ;;  %v38_v36 = vld [vmem:[%s5578_s1 + $0x1] ss:$0 sm:$0xff]  ;;  %s2769_s2 = smov 88  }
   0xe   :  { %398 = vmatpush.msrb.mxu2 %v235_v25  ;;  %421 = vmatpush.msrb.mxu3 %v236_v26  ;;  %v2926_v40 = vld [vmem:[%s5577_s0 + $0x18] sm:$0xff]  ;;  %v454_v44 = vld [vmem:[%s5581_s4] sm:$0xff]  ;;  %v2957_v47 = vld [vmem:[%s5577_s0 + $0x10] sm:$0xff]  ;;  %s2773_s4 = smov [#allocation2]  }
   0xf   :  { %376 = vmatpush.msrb.mxu1 %v226_v28  ;;  %5839 = vst [vmem:[#allocation5_spill] sm:$0xff] %v2926_v40  ;;  %497 = vrot.lane.b32.xlu2 %v2957_v47, %s2766_s23  ;;  %v33_v49 = vld [vmem:[%s5577_s0 + $0x28] sm:$0xff]  ;;  %v37_v51 = vld [vmem:[%s5578_s1] ss:$0 sm:$0xff]  ;;  %v2983_v55 = vld [vmem:[%s5577_s0 + $0x38] sm:$0xff]  ;;  %s2360_s29 = sshll.u32 %s2773_s4, 4  ;;  %s2361_s29 = int_to_ptr.vmem [resolvable:$true] %s2360_s29 }
  0x10   :  { %399 = vmatpush.msrb.mxu2 %v227_v29  ;;  %422 = vmatpush.msrb.mxu3 %v228_v30  ;;  %5840 = vst [vmem:[#allocation6_spill] sm:$0xff] %v2983_v55  ;;  %v2988_v56 = vld [vmem:[%s5577_s0 + $0x50] sm:$0xff]  ;;  %v2995_v58 = vld [vmem:[%s5580_s3 + $0x78] sm:$0xff]  ;;  %v3005_v60 = vld [vmem:[%s5577_s0 + $0x8] sm:$0xff] }
  0x11   :  { %377 = vmatpush.msrb.mxu1 %v218_v32  ;;  %5841 = vst [vmem:[#allocation7_spill] sm:$0xff] %v2988_v56  ;;  %v2434_v57 = vpack.i.bf16 %v2983_v55, %v2988_v56  ;;  %v3000_v59 = vld [vmem:[%s5580_s3 + $0xf8] sm:$0xff]  ;;  %v3017_v62 = vld [vmem:[%s5580_s3 + $0x70] sm:$0xff]  ;;  %v3023_v63 = vld [vmem:[%s5577_s0 + $0x20] sm:$0xff] }
  0x12   :  { %400 = vmatpush.msrb.mxu2 %v219_v33  ;;  %423 = vmatpush.msrb.mxu3 %v220_v34  ;;  %5842 = vst [vmem:[#allocation8_spill] sm:$0xff] %v3000_v59  ;;  %v3012_v61 = vld [vmem:[%s5580_s3 + $0x178] sm:$0xff]  ;;  %v3034_v1 = vld [vmem:[%s5580_s3 + $0x170] sm:$0xff]  ;;  %v3041_v2 = vld [vmem:[%s5580_s3 + $0x68] sm:$0xff]  ;;  %v2449_v8 = vpack.i.bf16 %v3005_v60, %v3023_v63 }
  0x13   :  { %5843 = vst [vmem:[#allocation9_spill] sm:$0xff] %v3005_v60  ;;  %v3046_v3 = vld [vmem:[%s5580_s3 + $0xe8] sm:$0xff]  ;;  %v3077_v9 = vld [vmem:[%s5580_s3 + $0x58] sm:$0xff]  ;;  %v3095_v12 = vld [vmem:[%s5580_s3 + $0x50] sm:$0xff] }
  0x14   :  { %5844 = vst [vmem:[#allocation10_spill] sm:$0xff] %v3023_v63  ;;  %v3082_v10 = vld [vmem:[%s5580_s3 + $0xd8] sm:$0xff]  ;;  %v3100_v13 = vld [vmem:[%s5580_s3 + $0xd0] sm:$0xff]  ;;  %v3119_v16 = vld [vmem:[%s5580_s3 + $0xc8] sm:$0xff] }
  0x15   :  { %5846 = vst [vmem:[#allocation12_spill] sm:$0xff] %v3046_v3  ;;  %v3107_v14 = vld [vmem:[%s5580_s3 + $0x150] sm:$0xff]  ;;  %v3126_v17 = vld [vmem:[%s5580_s3 + $0x148] sm:$0xff]  ;;  %v3137_v20 = vld [vmem:[%s5580_s3 + $0xc0] sm:$0xff] }
  0x16   :  { %5848 = vst [vmem:[#allocation14_spill] sm:$0xff] %v3082_v10  ;;  %v3144_v21 = vld [vmem:[%s5580_s3 + $0x140] sm:$0xff]  ;;  %v3157_v24 = vld [vmem:[%s5580_s3 + $0xb8] sm:$0xff]  ;;  %v3170_v26 = vld [vmem:[%s5580_s3 + $0x30] sm:$0xff] }
  0x17   :  { %499 = vrot.lane.b32.xlu2 %v33_v49, %s2766_s23  ;;  %5849 = vst [vmem:[#allocation15_spill] sm:$0xff] %v3100_v13  ;;  %v3164_v25 = vld [vmem:[%s5580_s3 + $0x138] sm:$0xff]  ;;  %v3185_v29 = vld [vmem:[%s5580_s3 + $0x130] sm:$0xff]  ;;  %v3198_v32 = vld [vmem:[%s5580_s3 + $0xa8] sm:$0xff] }
  0x18   :  { %5850 = vst [vmem:[#allocation16_spill] sm:$0xff] %v3119_v16  ;;  %v3205_v33 = vld [vmem:[%s5580_s3 + $0x128] sm:$0xff]  ;;  %v3256_v49 = vld [vmem:[%s5580_s3 + $0x118] sm:$0xff]  ;;  %v3627_v63 = vld [vmem:[%s5580_s3 + $0x230] sm:$0xff] }
  0x19   :  { %5851 = vst [vmem:[#allocation17_spill] sm:$0xff] %v3137_v20  ;;  %v3644_v60 = vld [vmem:[%s5580_s3 + $0x3b0] sm:$0xff]  ;;  %v3658_v56 = vld [vmem:[%s5580_s3 + $0x2a8] sm:$0xff] }
  0x1a   :  { %5853 = vst [vmem:[#allocation19_spill] sm:$0xff] %v3157_v24  ;;  %v3663_v55 = vld [vmem:[%s5580_s3 + $0x328] sm:$0xff] }
  0x1b   :  { %5856 = vst [vmem:[#allocation22_spill] sm:$0xff] %v3198_v32 }
  0x1c   :  { %5911 = vst [vmem:[#allocation77_spill] sm:$0xff] %v3627_v63 }
  0x1d   :  { %5914 = vst [vmem:[#allocation80_spill] sm:$0xff] %v3644_v60 }
  0x1e   :  { %5916 = vst [vmem:[#allocation82_spill] sm:$0xff] %v3658_v56 }
  0x1f   :  { %5917 = vst [vmem:[#allocation83_spill] sm:$0xff] %v3663_v55 }
  0x69   :  { %v3187_v30 = vpop.permute.xlu2 %497 }
  0x6a   :  { %5855 = vst [vmem:[#allocation21_spill] sm:$0xff] %v3187_v30 }
  0x75   :  { %v180_v5 = vpop.permute.xlu0 %179 }
  0x76   :  { %204 = vmatpush.msra.mxu0 %v180_v5  ;;  %v3057_v5 = vld [vmem:[%s5580_s3 + $0x60] sm:$0xff] }
  0x77   :  { %2373 = vmatmul.msk.f32.vlgmr.msra.gmra.mxu0 %vm182_vm0, %v176_v4  ;;  %v3051_v4 = vld [vmem:[%s5580_s3 + $0x168] sm:$0xff] }
  0x78   :  { %351 = vmatpush.msrb.mxu0 %v241_v6  ;;  %v3062_v6 = vld [vmem:[%s5580_s3 + $0xe0] sm:$0xff] }
  0x79   :  { %5847 = vst [vmem:[#allocation13_spill] sm:$0xff] %v3062_v6 }
  0x7a   :  { %352 = vmatpush.msrb.mxu0 %v233_v11  ;;  %v3089_v11 = vld [vmem:[%s5580_s3 + $0x158] sm:$0xff] }
  0x7c   :  { %353 = vmatpush.msrb.mxu0 %v225_v15  ;;  %v3114_v15 = vld [vmem:[%s5580_s3 + $0x48] sm:$0xff] }
  0x7e   :  { %354 = vmatpush.msrb.mxu0 %v217_v19  ;;  %v3132_v19 = vld [vmem:[%s5580_s3 + $0x40] sm:$0xff] }
  0x7f   :  { %2374 = vmatmul.msk.f32.gmra.mxu0 %vm182_vm0, %v177_v7  ;;  %v3069_v7 = vld [vmem:[%s5580_s3 + $0x160] sm:$0xff] }
  0x80   :  { %443 = vmatpush.msra.mxu0 %v245_v23  ;;  %v3152_v23 = vld [vmem:[%s5580_s3 + $0x38] sm:$0xff] }
  0x82   :  { %444 = vmatpush.msra.mxu0 %v237_v27  ;;  %v3175_v27 = vld [vmem:[%s5580_s3 + $0xb0] sm:$0xff] }
  0x83   :  { %5854 = vst [vmem:[#allocation20_spill] sm:$0xff] %v3175_v27 }
  0x84   :  { %445 = vmatpush.msra.mxu0 %v229_v31  ;;  %v3193_v31 = vld [vmem:[%s5580_s3 + $0x28] sm:$0xff] }
  0x86   :  { %446 = vmatpush.msra.mxu0 %v221_v35 }
  0xf4   :  { %v206_v37 = vpop.f32.mrf.mxu0 }
  0xf5   :  { %v207_v38 = vadd.f32 %v206_v37, %v38_v36 }
  0xf7   :  { %v212_v39 = vmax.f32 %v207_v38, 0.0  ;;  %v3218_v38 = vld [vmem:[%s5580_s3 + $0x1f8] sm:$0xff] }
  0xf8   :  { %5857 = vst [vmem:[#allocation23_spill] sm:$0xff] %v3218_v38 }
  0xf9   :  { %2375 = vmatmul.msk.f32.vlgmr.msra.gmra.mxu1 %vm263_vm1, %v212_v39  ;;  %2377 = vmatmul.msk.f32.vlgmr.msra.gmra.mxu2 %vm263_vm1, %v212_v39 }
  0xfa   :  { %2379 = vmatmul.msk.f32.vlgmr.msra.gmra.mxu3 %vm263_vm1, %v212_v39  ;;  %2381 = vmatmul.msk.f32.vlgmr.msrb.gmra.mxu0 %vm263_vm1, %v212_v39 }
  0xfb   :  { %473 = vmatpush.msra.mxu1 %v2926_v40  ;;  %544 = vmatpush.msra.mxu3 %v2995_v58  ;;  %v3632_v40 = vld [vmem:[%s5580_s3 + $0x2b0] sm:$0xff] }
  0xfc   :  { %v209_v41 = vpop.f32.mrf.mxu0  ;;  %567 = vmatpush.msrb.mxu0 %v3000_v59  ;;  %v3610_v59 = vld [vmem:[%s5580_s3 + $0x2b8] sm:$0xff]  ;;  %5912 = vst [vmem:[#allocation78_spill] sm:$0xff] %v3632_v40 }
  0xfd   :  { %v210_v42 = vadd.f32 %v209_v41, %v38_v36  ;;  %474 = vmatpush.msra.mxu1 %v2812_v0  ;;  %v3029_v0 = vld [vmem:[%s5580_s3 + $0xf0] sm:$0xff]  ;;  %545 = vmatpush.msra.mxu3 %v3017_v62  ;;  %v3212_v36 = vld [vmem:[%s5580_s3 + $0x20] sm:$0xff]  ;;  %5908 = vst [vmem:[#allocation74_spill] sm:$0xff] %v3610_v59 }
  0xfe   :  { %5845 = vst [vmem:[#allocation11_spill] sm:$0xff] %v3029_v0  ;;  %568 = vmatpush.msrb.mxu0 %v3029_v0  ;;  %v3231_v41 = vld [vmem:[%s5580_s3 + $0x120] sm:$0xff] }
  0xff   :  { %v213_v43 = vmax.f32 %v210_v42, 0.0  ;;  %546 = vmatpush.msra.mxu3 %v3041_v2  ;;  %v3236_v42 = vld [vmem:[%s5580_s3 + $0x18] sm:$0xff] }
 0x100   :  { %569 = vmatpush.msrb.mxu0 %v3046_v3  ;;  %v3594_v3 = vld [vmem:[%s5580_s3 + $0x3c0] sm:$0xff] }
 0x101   :  { %2376 = vmatmul.msk.f32.gmra.mxu1 %vm263_vm1, %v213_v43  ;;  %2378 = vmatmul.msk.f32.gmra.mxu2 %vm263_vm1, %v213_v43  ;;  %5906 = vst [vmem:[#allocation72_spill] sm:$0xff] %v3594_v3 }
 0x102   :  { %2380 = vmatmul.msk.f32.gmra.mxu3 %vm263_vm1, %v213_v43  ;;  %2382 = vmatmul.msk.f32.gmra.mxu0 %vm263_vm1, %v213_v43 }
 0x103   :  { %547 = vmatpush.msra.mxu3 %v3057_v5  ;;  %570 = vmatpush.msrb.mxu0 %v3062_v6  ;;  %v3582_v6 = vld [vmem:[%s5580_s3 + $0x2c0] sm:$0xff] }
 0x104   :  { %5904 = vst [vmem:[#allocation70_spill] sm:$0xff] %v3582_v6 }
 0x105   :  { %548 = vmatpush.msra.mxu3 %v3077_v9  ;;  %571 = vmatpush.msrb.mxu0 %v3082_v10  ;;  %v3480_v10 = vld [vmem:[%s5580_s3 + $0x1a0] sm:$0xff] }
 0x106   :  { %5888 = vst [vmem:[#allocation54_spill] sm:$0xff] %v3480_v10 }
 0x107   :  { %549 = vmatpush.msra.mxu3 %v3095_v12  ;;  %572 = vmatpush.msrb.mxu0 %v3100_v13  ;;  %v3470_v13 = vld [vmem:[%s5580_s3 + $0x2d0] sm:$0xff] }
 0x108   :  { %5886 = vst [vmem:[#allocation52_spill] sm:$0xff] %v3470_v13 }
 0x109   :  { %2383 = vmatmul.msk.f32.vlgmr.msrb.gmra.mxu1 %vm263_vm1, %v212_v39  ;;  %2385 = vmatmul.msk.f32.vlgmr.msrb.gmra.mxu2 %vm263_vm1, %v212_v39 }
 0x10a   :  { %2387 = vmatmul.msk.f32.vlgmr.msrb.gmra.mxu3 %vm263_vm1, %v212_v39  ;;  %2389 = vmatmul.msk.f32.vlgmr.msra.gmra.mxu0 %vm263_vm1, %v212_v39  ;;  %v3225_v39 = vld [vmem:[%s5580_s3 + $0xa0] sm:$0xff] }
 0x10b   :  { %590 = vmatpush.msrb.mxu1 %v3012_v61  ;;  %550 = vmatpush.msra.mxu3 %v3114_v15  ;;  %5858 = vst [vmem:[#allocation24_spill] sm:$0xff] %v3225_v39 }
 0x10c   :  { %573 = vmatpush.msrb.mxu0 %v3119_v16  ;;  %v3456_v16 = vld [vmem:[%s5580_s3 + $0x1a8] sm:$0xff] }
 0x10d   :  { %591 = vmatpush.msrb.mxu1 %v3034_v1  ;;  %551 = vmatpush.msra.mxu3 %v3132_v19  ;;  %5884 = vst [vmem:[#allocation50_spill] sm:$0xff] %v3456_v16 }
 0x10e   :  { %574 = vmatpush.msrb.mxu0 %v3137_v20  ;;  %v3446_v20 = vld [vmem:[%s5580_s3 + $0x2d8] sm:$0xff] }
 0x10f   :  { %592 = vmatpush.msrb.mxu1 %v3051_v4  ;;  %552 = vmatpush.msra.mxu3 %v3152_v23  ;;  %5882 = vst [vmem:[#allocation48_spill] sm:$0xff] %v3446_v20 }
 0x110   :  { %575 = vmatpush.msrb.mxu0 %v3157_v24  ;;  %v3432_v24 = vld [vmem:[%s5580_s3 + $0x1b0] sm:$0xff] }
 0x111   :  { %2384 = vmatmul.msk.f32.gmra.mxu1 %vm263_vm1, %v213_v43  ;;  %2386 = vmatmul.msk.f32.gmra.mxu2 %vm263_vm1, %v213_v43  ;;  %5881 = vst [vmem:[#allocation47_spill] sm:$0xff] %v3432_v24 }
 0x112   :  { %2388 = vmatmul.msk.f32.gmra.mxu3 %vm263_vm1, %v213_v43  ;;  %2390 = vmatmul.msk.f32.gmra.mxu0 %vm263_vm1, %v213_v43  ;;  %v3243_v43 = vld [vmem:[%s5580_s3 + $0x1f0] sm:$0xff] }
 0x113   :  { %593 = vmatpush.msrb.mxu1 %v3069_v7  ;;  %553 = vmatpush.msra.mxu3 %v3170_v26  ;;  %5859 = vst [vmem:[#allocation25_spill] sm:$0xff] %v3243_v43 }
 0x114   :  { %576 = vmatpush.msrb.mxu0 %v3175_v27  ;;  %v3422_v27 = vld [vmem:[%s5580_s3 + $0x2e0] sm:$0xff] }
 0x115   :  { %594 = vmatpush.msrb.mxu1 %v3089_v11  ;;  %554 = vmatpush.msra.mxu3 %v3193_v31  ;;  %5879 = vst [vmem:[#allocation45_spill] sm:$0xff] %v3422_v27 }
 0x116   :  { %577 = vmatpush.msrb.mxu0 %v3198_v32  ;;  %v3408_v32 = vld [vmem:[%s5580_s3 + $0x1b8] sm:$0xff] }
 0x117   :  { %595 = vmatpush.msrb.mxu1 %v3107_v14  ;;  %555 = vmatpush.msra.mxu3 %v3212_v36  ;;  %5878 = vst [vmem:[#allocation44_spill] sm:$0xff] %v3408_v32 }
 0x118   :  { %578 = vmatpush.msrb.mxu0 %v3225_v39  ;;  %v3398_v39 = vld [vmem:[%s5580_s3 + $0x2e8] sm:$0xff] }
 0x119   :  { %2391 = vmatmul.msk.f32.vlgmr.msra.gmra.mxu1 %vm455_vm2, %v454_v44  ;;  %v3249_v44 = vld [vmem:[%s5580_s3 + $0x98] sm:$0xff]  ;;  %556 = vmatpush.msra.mxu3 %v3236_v42  ;;  %5876 = vst [vmem:[#allocation42_spill] sm:$0xff] %v3398_v39 }
 0x11a   :  { %596 = vmatpush.msrb.mxu1 %v3126_v17  ;;  %5860 = vst [vmem:[#allocation26_spill] sm:$0xff] %v3249_v44  ;;  %579 = vmatpush.msrb.mxu0 %v3249_v44  ;;  %v3384_v44 = vld [vmem:[%s5580_s3 + $0x1c0] sm:$0xff] }
 0x11b   :  { %5875 = vst [vmem:[#allocation41_spill] sm:$0xff] %v3384_v44 }
 0x11c   :  { %597 = vmatpush.msrb.mxu1 %v3144_v21 }
 0x11e   :  { %598 = vmatpush.msrb.mxu1 %v3164_v25 }
 0x120   :  { %599 = vmatpush.msrb.mxu1 %v3185_v29 }
 0x122   :  { %600 = vmatpush.msrb.mxu1 %v3205_v33 }
 0x124   :  { %601 = vmatpush.msrb.mxu1 %v3231_v41 }
 0x126   :  { %602 = vmatpush.msrb.mxu1 %v3256_v49 }
 0x176   :  { %v2950_v45 = vpop.f32.mrf.mxu1 }
 0x17e   :  { %v2952_v46 = vpop.f32.mrf.mxu1 }
 0x186   :  { %v2961_v48 = vpop.f32.mrf.mxu1 }
 0x18e   :  { %v2967_v50 = vpop.f32.mrf.mxu1 }
 0x196   :  { %v476_v52 = vpop.f32.mrf.mxu1 }
 0x197   :  { %v477_v53 = vadd.f32 %v476_v52, %v37_v51  ;;  %v3261_v51 = vld [vmem:[%s5580_s3 + $0x10] sm:$0xff]  ;;  %v3266_v52 = vld [vmem:[%s5580_s3 + $0x1e8] sm:$0xff] }
 0x198   :  { %5861 = vst [vmem:[#allocation27_spill] sm:$0xff] %v3266_v52  ;;  %557 = vmatpush.msra.mxu3 %v3261_v51 }
 0x199   :  { %v2972_v54 = vmax.f32 %v477_v53, 0.0  ;;  %v3273_v53 = vld [vmem:[%s5580_s3 + $0x90] sm:$0xff] }
 0x19a   :  { %5862 = vst [vmem:[#allocation28_spill] sm:$0xff] %v3273_v53  ;;  %580 = vmatpush.msrb.mxu0 %v3273_v53  ;;  %v3374_v53 = vld [vmem:[%s5580_s3 + $0x2f0] sm:$0xff] }
 0x19b   :  { %484 = vrot.lane.b32.xlu1 %v2972_v54, %s2767_s30  ;;  %481 = vrot.lane.b32.xlu0 %v2972_v54, %s2768_s7  ;;  %5873 = vst [vmem:[#allocation39_spill] sm:$0xff] %v3374_v53 }
 0x1a3   :  { %487 = vrot.lane.b32.xlu1 %v2972_v54, %s2766_s23  ;;  %728 = vrot.lane.b32.xlu0 %v2957_v47, %s2769_s2  ;;  %v3565_v47 = vld [vmem:[%s5580_s3 + $0x348] sm:$0xff] }
 0x1a4   :  { %5901 = vst [vmem:[#allocation67_spill] sm:$0xff] %v3565_v47 }
 0x1ab   :  { %2435 = vrot.lane.b32.xlu1 %v2434_v57, %s2766_s23  ;;  %v3280_v57 = vld [vmem:[%s5580_s3 + $0x110] sm:$0xff] }
 0x1ac   :  { %603 = vmatpush.msrb.mxu1 %v3280_v57 }
 0x1b3   :  { %2450 = vrot.lane.b32.xlu1 %v2449_v8, %s2766_s23  ;;  %v3285_v8 = vld [vmem:[%s5580_s3 + $0x8] sm:$0xff] }
 0x1b4   :  { %558 = vmatpush.msra.mxu3 %v3285_v8 }
 0x20d   :  { %v485_v18 = vpop.permute.xlu1 %484  ;;  %v3146_v22 = vpop.permute.xlu0 %481 }
 0x20e   :  { %5852 = vst [vmem:[#allocation18_spill] sm:$0xff] %v3146_v22  ;;  %v490_v28 = vsel %vm263_vm1, %v2972_v54, %v3146_v22  ;;  %v3355_v22 = vld [vmem:[%s5580_s3 + $0x378] sm:$0xff] }
 0x20f   :  { %v492_v35 = vsel %vm491_vm3, %v490_v28, %v485_v18  ;;  %v3290_v18 = vld [vmem:[%s5580_s3 + $0x1e0] sm:$0xff]  ;;  %v3297_v28 = vld [vmem:[%s5580_s3 + $0x88] sm:$0xff]  ;;  %5871 = vst [vmem:[#allocation37_spill] sm:$0xff] %v3355_v22 }
 0x210   :  { %5863 = vst [vmem:[#allocation29_spill] sm:$0xff] %v3290_v18  ;;  %581 = vmatpush.msrb.mxu0 %v3297_v28 }
 0x211   :  { %5864 = vst [vmem:[#allocation30_spill] sm:$0xff] %v3297_v28  ;;  %v3360_v28 = vld [vmem:[%s5580_s3 + $0x1c8] sm:$0xff] }
 0x212   :  { %5872 = vst [vmem:[#allocation38_spill] sm:$0xff] %v3360_v28 }
 0x215   :  { %v488_v34 = vpop.permute.xlu1 %487 }
 0x216   :  { %v494_v37 = vsel %vm493_vm4, %v492_v35, %v488_v34  ;;  %v3299_v34 = vpop.permute.xlu2 %499  ;;  %v3306_v35 = vld [vmem:[%s5580_s3 + $0x108] sm:$0xff] }
 0x217   :  { %520 = vmatpush.msra.mxu2 %v494_v37  ;;  %5865 = vst [vmem:[#allocation31_spill] sm:$0xff] %v3299_v34  ;;  %v3311_v37 = vld [vmem:[%s5580_s3 + $0x1d8] sm:$0xff]  ;;  %604 = vmatpush.msrb.mxu1 %v3306_v35 }
 0x218   :  { %2392 = vmatmul.msk.f32.vlgmr.msra.gmra.mxu2 %vm182_vm0, %v3187_v30  ;;  %5866 = vst [vmem:[#allocation32_spill] sm:$0xff] %v3311_v37  ;;  %v3337_v30 = vld [vmem:[%s5580_s3 + $0x1d0] sm:$0xff] }
 0x219   :  { %613 = vmatpush.msrb.mxu2 %v3218_v38  ;;  %v3330_v38 = vld [vmem:[%s5580_s3 + $0x100] sm:$0xff]  ;;  %5869 = vst [vmem:[#allocation35_spill] sm:$0xff] %v3337_v30 }
 0x21a   :  { %5868 = vst [vmem:[#allocation34_spill] sm:$0xff] %v3330_v38  ;;  %605 = vmatpush.msrb.mxu1 %v3330_v38 }
 0x21b   :  { %614 = vmatpush.msrb.mxu2 %v3243_v43  ;;  %v3325_v43 = vld [vmem:[%s5580_s3 + $0x80] sm:$0xff] }
 0x21c   :  { %5867 = vst [vmem:[#allocation33_spill] sm:$0xff] %v3325_v43  ;;  %582 = vmatpush.msrb.mxu0 %v3325_v43  ;;  %v3379_v43 = vld [vmem:[%s5580_s3 + $0x370] sm:$0xff]  ;;  %682 = vmatpush.msra.mxu1 %v3355_v22 }
 0x21d   :  { %615 = vmatpush.msrb.mxu2 %v3266_v52  ;;  %v3318_v52 = vld [vmem:[%s5580_s3] sm:$0xff]  ;;  %5874 = vst [vmem:[#allocation40_spill] sm:$0xff] %v3379_v43 }
 0x21e   :  { %559 = vmatpush.msra.mxu3 %v3318_v52  ;;  %683 = vmatpush.msra.mxu1 %v3379_v43 }
 0x21f   :  { %616 = vmatpush.msrb.mxu2 %v3290_v18  ;;  %v3343_v18 = vld [vmem:[%s5580_s3 + $0x278] sm:$0xff] }
 0x220   :  { %2393 = vmatmul.msk.f32.gmra.mxu2 %vm182_vm0, %v3299_v34  ;;  %v3350_v34 = vld [vmem:[%s5580_s3 + $0x2f8] sm:$0xff]  ;;  %636 = vmatpush.msrb.mxu3 %v3343_v18 }
 0x221   :  { %617 = vmatpush.msrb.mxu2 %v3311_v37  ;;  %5870 = vst [vmem:[#allocation36_spill] sm:$0xff] %v3350_v34  ;;  %v3367_v37 = vld [vmem:[%s5580_s3 + $0x270] sm:$0xff]  ;;  %659 = vmatpush.msra.mxu0 %v3350_v34  ;;  %v3403_v34 = vld [vmem:[%s5580_s3 + $0x368] sm:$0xff] }
 0x222   :  { %637 = vmatpush.msrb.mxu3 %v3367_v37  ;;  %5877 = vst [vmem:[#allocation43_spill] sm:$0xff] %v3403_v34  ;;  %684 = vmatpush.msra.mxu1 %v3403_v34 }
 0x223   :  { %618 = vmatpush.msrb.mxu2 %v3337_v30  ;;  %v3391_v30 = vld [vmem:[%s5580_s3 + $0x268] sm:$0xff]  ;;  %660 = vmatpush.msra.mxu0 %v3374_v53  ;;  %v3427_v53 = vld [vmem:[%s5580_s3 + $0x360] sm:$0xff] }
 0x224   :  { %638 = vmatpush.msrb.mxu3 %v3391_v30  ;;  %5880 = vst [vmem:[#allocation46_spill] sm:$0xff] %v3427_v53  ;;  %685 = vmatpush.msra.mxu1 %v3427_v53 }
 0x225   :  { %619 = vmatpush.msrb.mxu2 %v3360_v28  ;;  %v3415_v28 = vld [vmem:[%s5580_s3 + $0x260] sm:$0xff]  ;;  %661 = vmatpush.msra.mxu0 %v3398_v39  ;;  %v3451_v39 = vld [vmem:[%s5580_s3 + $0x358] sm:$0xff] }
 0x226   :  { %639 = vmatpush.msrb.mxu3 %v3415_v28  ;;  %5883 = vst [vmem:[#allocation49_spill] sm:$0xff] %v3451_v39  ;;  %686 = vmatpush.msra.mxu1 %v3451_v39 }
 0x227   :  { %620 = vmatpush.msrb.mxu2 %v3384_v44  ;;  %v3439_v44 = vld [vmem:[%s5580_s3 + $0x258] sm:$0xff]  ;;  %662 = vmatpush.msra.mxu0 %v3422_v27  ;;  %v3475_v27 = vld [vmem:[%s5580_s3 + $0x350] sm:$0xff] }
 0x228   :  { %640 = vmatpush.msrb.mxu3 %v3439_v44  ;;  %5887 = vst [vmem:[#allocation53_spill] sm:$0xff] %v3475_v27  ;;  %687 = vmatpush.msra.mxu1 %v3475_v27  ;;  %v3747_v27 = vld [vmem:[%s5580_s3 + $0x208] sm:$0xff] }
 0x229   :  { %621 = vmatpush.msrb.mxu2 %v3408_v32  ;;  %v3463_v32 = vld [vmem:[%s5580_s3 + $0x250] sm:$0xff]  ;;  %663 = vmatpush.msra.mxu0 %v3446_v20  ;;  %5931 = vst [vmem:[#allocation97_spill] sm:$0xff] %v3747_v27 }
 0x22a   :  { %5885 = vst [vmem:[#allocation51_spill] sm:$0xff] %v3463_v32  ;;  %641 = vmatpush.msrb.mxu3 %v3463_v32  ;;  %v3497_v20 = vld [vmem:[%s5580_s3 + $0x190] sm:$0xff]  ;;  %688 = vmatpush.msra.mxu1 %v3565_v47 }
 0x22b   :  { %622 = vmatpush.msrb.mxu2 %v3432_v24  ;;  %v3489_v24 = vld [vmem:[%s5580_s3 + $0x198] sm:$0xff]  ;;  %664 = vmatpush.msra.mxu0 %v3470_v13  ;;  %5890 = vst [vmem:[#allocation56_spill] sm:$0xff] %v3497_v20  ;;  %v3509_v13 = vld [vmem:[%s5580_s3 + $0x180] sm:$0xff] }
 0x22c   :  { %5889 = vst [vmem:[#allocation55_spill] sm:$0xff] %v3489_v24 }
 0x22d   :  { %623 = vmatpush.msrb.mxu2 %v3456_v16  ;;  %v3503_v16 = vld [vmem:[%s5580_s3 + $0x188] sm:$0xff]  ;;  %5892 = vst [vmem:[#allocation58_spill] sm:$0xff] %v3509_v13 }
 0x22e   :  { %5891 = vst [vmem:[#allocation57_spill] sm:$0xff] %v3503_v16 }
 0x22f   :  { %624 = vmatpush.msrb.mxu2 %v3480_v10  ;;  %v3515_v10 = vld [vmem:[%s5580_s3 + $0x3f8] sm:$0xff] }
 0x230   :  { %5893 = vst [vmem:[#allocation59_spill] sm:$0xff] %v3515_v10 }
 0x231   :  { %625 = vmatpush.msrb.mxu2 %v3489_v24  ;;  %v3521_v24 = vld [vmem:[%s5580_s3 + $0x3f0] sm:$0xff] }
 0x232   :  { %5894 = vst [vmem:[#allocation60_spill] sm:$0xff] %v3521_v24 }
 0x233   :  { %626 = vmatpush.msrb.mxu2 %v3497_v20  ;;  %v3527_v20 = vld [vmem:[%s5580_s3 + $0x3e8] sm:$0xff] }
 0x234   :  { %5895 = vst [vmem:[#allocation61_spill] sm:$0xff] %v3527_v20 }
 0x235   :  { %627 = vmatpush.msrb.mxu2 %v3503_v16  ;;  %v3533_v16 = vld [vmem:[%s5580_s3 + $0x3e0] sm:$0xff] }
 0x236   :  { %5896 = vst [vmem:[#allocation62_spill] sm:$0xff] %v3533_v16 }
 0x237   :  { %628 = vmatpush.msrb.mxu2 %v3509_v13  ;;  %v3539_v13 = vld [vmem:[%s5580_s3 + $0x3d8] sm:$0xff] }
 0x238   :  { %5897 = vst [vmem:[#allocation63_spill] sm:$0xff] %v3539_v13 }
 0x239   :  { %705 = vmatpush.msra.mxu2 %v3515_v10  ;;  %v3545_v10 = vld [vmem:[%s5580_s3 + $0x3d0] sm:$0xff] }
 0x23a   :  { %5898 = vst [vmem:[#allocation64_spill] sm:$0xff] %v3545_v10 }
 0x23b   :  { %706 = vmatpush.msra.mxu2 %v3521_v24  ;;  %v3555_v24 = vld [vmem:[%s5580_s3 + $0x248] sm:$0xff] }
 0x23c   :  { %5899 = vst [vmem:[#allocation65_spill] sm:$0xff] %v3555_v24  ;;  %642 = vmatpush.msrb.mxu3 %v3555_v24 }
 0x23d   :  { %707 = vmatpush.msra.mxu2 %v3527_v20  ;;  %v3550_v20 = vpop.f32.mrf.mxu2 }
 0x23f   :  { %708 = vmatpush.msra.mxu2 %v3533_v16  ;;  %v3560_v16 = vld [vmem:[%s5580_s3 + $0x2c8] sm:$0xff] }
 0x240   :  { %5900 = vst [vmem:[#allocation66_spill] sm:$0xff] %v3560_v16  ;;  %665 = vmatpush.msra.mxu0 %v3560_v16  ;;  %v3589_v16 = vld [vmem:[%s5580_s3 + $0x340] sm:$0xff] }
 0x241   :  { %709 = vmatpush.msra.mxu2 %v3539_v13  ;;  %v3577_v13 = vld [vmem:[%s5580_s3 + $0x240] sm:$0xff]  ;;  %5905 = vst [vmem:[#allocation71_spill] sm:$0xff] %v3589_v16  ;;  %689 = vmatpush.msra.mxu1 %v3589_v16  ;;  %v3711_v16 = vld [vmem:[%s5580_s3 + $0x318] sm:$0xff] }
 0x242   :  { %5903 = vst [vmem:[#allocation69_spill] sm:$0xff] %v3577_v13  ;;  %643 = vmatpush.msrb.mxu3 %v3577_v13  ;;  %666 = vmatpush.msra.mxu0 %v3582_v6  ;;  %v3615_v6 = vld [vmem:[%s5580_s3 + $0x338] sm:$0xff] }
 0x243   :  { %710 = vmatpush.msra.mxu2 %v3545_v10  ;;  %v3572_v10 = vld [vmem:[%s5580_s3 + $0x3c8] sm:$0xff]  ;;  %5909 = vst [vmem:[#allocation75_spill] sm:$0xff] %v3615_v6  ;;  %690 = vmatpush.msra.mxu1 %v3615_v6  ;;  %v3692_v6 = vld [vmem:[%s5580_s3 + $0x3a0] sm:$0xff] }
 0x244   :  { %5902 = vst [vmem:[#allocation68_spill] sm:$0xff] %v3572_v10  ;;  %667 = vmatpush.msra.mxu0 %v3610_v59  ;;  %v3639_v59 = vld [vmem:[%s5580_s3 + $0x330] sm:$0xff] }
 0x245   :  { %711 = vmatpush.msra.mxu2 %v3572_v10  ;;  %v3598_v0 = vpop.f32.mrf.mxu2  ;;  %v3605_v10 = vld [vmem:[%s5580_s3 + $0x238] sm:$0xff]  ;;  %5913 = vst [vmem:[#allocation79_spill] sm:$0xff] %v3639_v59  ;;  %691 = vmatpush.msra.mxu1 %v3639_v59  ;;  %v3680_v59 = vld [vmem:[%s5580_s3 + $0x2a0] sm:$0xff] }
 0x246   :  { %5907 = vst [vmem:[#allocation73_spill] sm:$0xff] %v3605_v10  ;;  %644 = vmatpush.msrb.mxu3 %v3605_v10  ;;  %668 = vmatpush.msra.mxu0 %v3632_v40  ;;  %v3675_v40 = vld [vmem:[%s5580_s3 + $0x220] sm:$0xff] }
 0x247   :  { %712 = vmatpush.msra.mxu2 %v3594_v3  ;;  %v3622_v3 = vld [vmem:[%s5580_s3 + $0x3b8] sm:$0xff]  ;;  %5919 = vst [vmem:[#allocation85_spill] sm:$0xff] %v3675_v40  ;;  %692 = vmatpush.msra.mxu1 %v3663_v55 }
 0x248   :  { %5910 = vst [vmem:[#allocation76_spill] sm:$0xff] %v3622_v3  ;;  %645 = vmatpush.msrb.mxu3 %v3627_v63  ;;  %669 = vmatpush.msra.mxu0 %v3658_v56  ;;  %v3687_v56 = vld [vmem:[%s5580_s3 + $0x320] sm:$0xff]  ;;  %v3706_v55 = vld [vmem:[%s5580_s3 + $0x298] sm:$0xff] }
 0x249   :  { %713 = vmatpush.msra.mxu2 %v3622_v3  ;;  %v3653_v3 = vld [vmem:[%s5580_s3 + $0x228] sm:$0xff]  ;;  %5920 = vst [vmem:[#allocation86_spill] sm:$0xff] %v3680_v59  ;;  %693 = vmatpush.msra.mxu1 %v3687_v56 }
 0x24a   :  { %5915 = vst [vmem:[#allocation81_spill] sm:$0xff] %v3653_v3  ;;  %646 = vmatpush.msrb.mxu3 %v3653_v3  ;;  %670 = vmatpush.msra.mxu0 %v3680_v59  ;;  %v3723_v59 = vld [vmem:[%s5580_s3 + $0x210] sm:$0xff] }
 0x24b   :  { %714 = vmatpush.msra.mxu2 %v3644_v60  ;;  %v3670_v60 = vld [vmem:[%s5580_s3 + $0x3a8] sm:$0xff]  ;;  %5921 = vst [vmem:[#allocation87_spill] sm:$0xff] %v3687_v56  ;;  %v3728_v56 = vld [vmem:[%s5580_s3 + $0x290] sm:$0xff]  ;;  %694 = vmatpush.msra.mxu1 %v3711_v16 }
 0x24c   :  { %5918 = vst [vmem:[#allocation84_spill] sm:$0xff] %v3670_v60  ;;  %647 = vmatpush.msrb.mxu3 %v3675_v40  ;;  %671 = vmatpush.msra.mxu0 %v3706_v55  ;;  %v3764_v40 = vld [vmem:[%s5580_s3 + $0x388] sm:$0xff] }
 0x24d   :  { %715 = vmatpush.msra.mxu2 %v3670_v60  ;;  %5922 = vst [vmem:[#allocation88_spill] sm:$0xff] %v3692_v6  ;;  %v3701_v60 = vld [vmem:[%s5580_s3 + $0x218] sm:$0xff]  ;;  %v3730_v47 = vpop.f32.mrf.mxu2 }
 0x24e   :  { %5923 = vst [vmem:[#allocation89_spill] sm:$0xff] %v3701_v60  ;;  %648 = vmatpush.msrb.mxu3 %v3701_v60  ;;  %v3742_v60 = vld [vmem:[%s5580_s3 + $0x390] sm:$0xff]  ;;  %672 = vmatpush.msra.mxu0 %v3728_v56 }
 0x24f   :  { %716 = vmatpush.msra.mxu2 %v3692_v6  ;;  %5924 = vst [vmem:[#allocation90_spill] sm:$0xff] %v3706_v55  ;;  %v3718_v6 = vld [vmem:[%s5580_s3 + $0x398] sm:$0xff]  ;;  %v3737_v55 = vld [vmem:[%s5580_s3 + $0x310] sm:$0xff] }
 0x250   :  { %5925 = vst [vmem:[#allocation91_spill] sm:$0xff] %v3711_v16  ;;  %649 = vmatpush.msrb.mxu3 %v3723_v59  ;;  %v3759_v16 = vld [vmem:[%s5580_s3 + $0x308] sm:$0xff]  ;;  %695 = vmatpush.msra.mxu1 %v3737_v55 }
 0x251   :  { %5926 = vst [vmem:[#allocation92_spill] sm:$0xff] %v3718_v6  ;;  %717 = vmatpush.msra.mxu2 %v3718_v6  ;;  %v3754_v6 = vld [vmem:[%s5580_s3 + $0x288] sm:$0xff] }
 0x252   :  { %5927 = vst [vmem:[#allocation93_spill] sm:$0xff] %v3723_v59  ;;  %v3776_v59 = vld [vmem:[%s5580_s3 + $0x280] sm:$0xff]  ;;  %650 = vmatpush.msrb.mxu3 %v3747_v27  ;;  %673 = vmatpush.msra.mxu0 %v3754_v6 }
 0x253   :  { %5928 = vst [vmem:[#allocation94_spill] sm:$0xff] %v3728_v56  ;;  %718 = vmatpush.msra.mxu2 %v3742_v60  ;;  %v3771_v56 = vld [vmem:[%s5580_s3 + $0x200] sm:$0xff]  ;;  %696 = vmatpush.msra.mxu1 %v3759_v16 }
 0x254   :  { %5929 = vst [vmem:[#allocation95_spill] sm:$0xff] %v3737_v55  ;;  %v3783_v55 = vld [vmem:[%s5580_s3 + $0x300] sm:$0xff]  ;;  %651 = vmatpush.msrb.mxu3 %v3771_v56  ;;  %674 = vmatpush.msra.mxu0 %v3776_v59 }
 0x255   :  { %5930 = vst [vmem:[#allocation96_spill] sm:$0xff] %v3742_v60  ;;  %v3788_v60 = vld [vmem:[%s5580_s3 + $0x380] sm:$0xff]  ;;  %719 = vmatpush.msra.mxu2 %v3764_v40  ;;  %697 = vmatpush.msra.mxu1 %v3783_v55  ;;  %v3804_v3 = vpop.f32.mrf.mxu2 }
 0x256   :  { %5932 = vst [vmem:[#allocation98_spill] sm:$0xff] %v3754_v6  ;;  %v2371_v6 = vld [vmem:[%s5578_s1 + $0x2] ss:$8 sm:$0xf] }
 0x257   :  { %5933 = vst [vmem:[#allocation99_spill] sm:$0xff] %v3759_v16  ;;  %v2372_v27 = vld [vmem:[%s5578_s1 + $0x2] ss:$8 sm:$0xf0]  ;;  %720 = vmatpush.msra.mxu2 %v3788_v60  ;;  %v356_v16 = vpop.f32.mrf.mxu0 }
 0x258   :  { %5934 = vst [vmem:[#allocation100_spill] sm:$0xff] %v3764_v40  ;;  %v3802_v39 = vor.u32 %v2372_v27, %v2371_v6  ;;  %v333_v40 = vpop.f32.mrf.mxu3 }
 0x259   :  { %5935 = vst [vmem:[#allocation101_spill] sm:$0xff] %v3771_v56  ;;  %v2436_v56 = vpop.permute.xlu1 %2435 }
 0x25a   :  { %5936 = vst [vmem:[#allocation102_spill] sm:$0xff] %v3776_v59  ;;  %v247_v59 = vperm.slane %v3802_v39, 0  ;;  %v250_v53 = vperm.slane %v3802_v39, 3  ;;  %v248_v63 = vperm.slane %v3802_v39, 1  ;;  %v249_v34 = vperm.slane %v3802_v39, 2 }
 0x25b   :  { %5937 = vst [vmem:[#allocation103_spill] sm:$0xff] %v3783_v55  ;;  %v3820_v43 = vunpack.i.l.bf16 %v2436_v56 }
 0x25c   :  { %5938 = vst [vmem:[#allocation104_spill] sm:$0xff] %v3788_v60  ;;  %v3811_v10 = vadd.f32 %v2950_v45, %v247_v59  ;;  %v3813_v55 = vadd.f32 %v356_v16, %v250_v53  ;;  %v3816_v6 = vadd.f32 %v3550_v20, %v248_v63  ;;  %v3818_v27 = vadd.f32 %v333_v40, %v249_v34 }
 0x25d   :  { %v3826_v20 = vunpack.i.h.bf16 %v2436_v56 }
 0x25e   :  { %5939 = vst [vmem:[#allocation105_spill] sm:$0xff] %v3811_v10 }
 0x25f   :  { %5940 = vst [vmem:[#allocation106_spill] sm:$0xff] %v3813_v55  ;;  %v359_v13 = vpop.f32.mrf.mxu0 }
 0x260   :  { %5941 = vst [vmem:[#allocation107_spill] sm:$0xff] %v3816_v6  ;;  %v336_v22 = vpop.f32.mrf.mxu3 }
 0x261   :  { %5942 = vst [vmem:[#allocation108_spill] sm:$0xff] %v3818_v27  ;;  %v2451_v16 = vpop.permute.xlu1 %2450 }
 0x262   :  { %v3829_v40 = vunpack.i.l.bf16 %v2451_v16 }
 0x264   :  { %5943 = vst [vmem:[#allocation109_spill] sm:$0xff] %v3829_v40 }
 0x29b   :  { %v522_v60 = vpop.f32.mrf.mxu2 }
 0x29c   :  { %v528_v24 = vmul.f32 %v522_v60, %v3811_v10  ;;  %v529_v38 = vmul.f32 %v522_v60, %v3816_v6  ;;  %v530_v32 = vmul.f32 %v522_v60, %v3818_v27  ;;  %v531_v45 = vmul.f32 %v522_v60, %v3813_v55 }
 0x29d   :  { %v3833_v10 = vadd.f32 %v2952_v46, %v247_v59  ;;  %v3835_v6 = vadd.f32 %v359_v13, %v250_v53  ;;  %v3838_v55 = vadd.f32 %v3598_v0, %v248_v63  ;;  %v251_v63 = vperm.slane %v3802_v39, 4  ;;  %v448_v0 = vpop.f32.mrf.mxu0  ;;  %v425_v13 = vpop.f32.mrf.mxu3 }
 0x29e   :  { %560 = vmatmul.f32.vlgmr.msra.gmra.mxu3 %v528_v24  ;;  %583 = vmatmul.f32.vlgmr.msrb.gmra.mxu0 %v529_v38  ;;  %v3840_v24 = vadd.f32 %v336_v22, %v249_v34  ;;  %v254_v22 = vperm.slane %v3802_v39, 7  ;;  %v253_v53 = vperm.slane %v3802_v39, 6 }
 0x29f   :  { %606 = vmatmul.f32.vlgmr.msrb.gmra.mxu1 %v530_v32  ;;  %629 = vmatmul.f32.vlgmr.msrb.gmra.mxu2 %v531_v45  ;;  %5944 = vst [vmem:[#allocation110_spill] sm:$0xff] %v3833_v10  ;;  %v3844_v32 = vunpack.i.h.bf16 %v2451_v16 }
 0x2a0   :  { %833 = vmatpush.msrb.mxu0 %v3820_v43  ;;  %932 = vmatpush.msrb.mxu2 %v2995_v58  ;;  %5945 = vst [vmem:[#allocation111_spill] sm:$0xff] %v3835_v6  ;;  %v3865_v45 = vadd.f32 %v448_v0, %v254_v22  ;;  %v3867_v16 = vadd.f32 %v425_v13, %v253_v53  ;;  %v30_v13 = vld [vmem:[%s5577_s0 + $0x48] sm:$0xff] }
 0x2a1   :  { %5946 = vst [vmem:[#allocation112_spill] sm:$0xff] %v3838_v55 }
 0x2a2   :  { %5947 = vst [vmem:[#allocation113_spill] sm:$0xff] %v3840_v24  ;;  %834 = vmatpush.msrb.mxu0 %v3826_v20  ;;  %933 = vmatpush.msrb.mxu2 %v3017_v62  ;;  %v252_v62 = vperm.slane %v3802_v39, 5 }
 0x2a3   :  { %v525_v56 = vpop.f32.mrf.mxu2  ;;  %5948 = vst [vmem:[#allocation114_spill] sm:$0xff] %v3844_v32 }
 0x2a4   :  { %v536_v38 = vmul.f32 %v525_v56, %v3833_v10  ;;  %v537_v58 = vmul.f32 %v525_v56, %v3838_v55  ;;  %v538_v46 = vmul.f32 %v525_v56, %v3840_v24  ;;  %v539_v59 = vmul.f32 %v525_v56, %v3835_v6  ;;  %835 = vmatpush.msrb.mxu0 %v3829_v40 }
 0x2a5   :  { %934 = vmatpush.msrb.mxu2 %v3041_v2  ;;  %v3859_v2 = vadd.f32 %v2961_v48, %v251_v63  ;;  %v3862_v34 = vadd.f32 %v3730_v47, %v252_v62  ;;  %5951 = vst [vmem:[#allocation117_spill] sm:$0xff] %v3865_v45  ;;  %v535_v48 = vmul.f32 %v522_v60, %v3865_v45  ;;  %v451_v47 = vpop.f32.mrf.mxu0 }
 0x2a6   :  { %563 = vmatmul.f32.gmra.mxu3 %v536_v38  ;;  %586 = vmatmul.f32.gmra.mxu0 %v537_v58  ;;  %5952 = vst [vmem:[#allocation118_spill] sm:$0xff] %v3867_v16  ;;  %v3877_v58 = vadd.f32 %v2967_v50, %v251_v63 }
 0x2a7   :  { %609 = vmatmul.f32.gmra.mxu1 %v538_v46  ;;  %632 = vmatmul.f32.gmra.mxu2 %v539_v59  ;;  %5949 = vst [vmem:[#allocation115_spill] sm:$0xff] %v3859_v2  ;;  %v532_v39 = vmul.f32 %v522_v60, %v3859_v2  ;;  %v533_v38 = vmul.f32 %v522_v60, %v3862_v34 }
 0x2a8   :  { %836 = vmatpush.msrb.mxu0 %v3844_v32  ;;  %935 = vmatpush.msrb.mxu2 %v3057_v5  ;;  %5950 = vst [vmem:[#allocation116_spill] sm:$0xff] %v3862_v34  ;;  %v534_v5 = vmul.f32 %v522_v60, %v3867_v16  ;;  %v3880_v46 = vadd.f32 %v3804_v3, %v252_v62  ;;  %v28_v62 = vld [vmem:[%s5577_s0 + $0x30] sm:$0xff] }
 0x2a9   :  { %5953 = vst [vmem:[#allocation119_spill] sm:$0xff] %v3877_v58  ;;  %v3884_v60 = vadd.f32 %v451_v47, %v254_v22  ;;  %v540_v59 = vmul.f32 %v525_v56, %v3877_v58  ;;  %v5985_v22 = vld [vmem:[#allocation6_spill] sm:$0xff] }
 0x2aa   :  { %936 = vmatpush.msrb.mxu2 %v3077_v9  ;;  %v428_v9 = vpop.f32.mrf.mxu3  ;;  %5954 = vst [vmem:[#allocation120_spill] sm:$0xff] %v3880_v46 }
 0x2ab   :  { %5955 = vst [vmem:[#allocation121_spill] sm:$0xff] %v3884_v60  ;;  %v543_v3 = vmul.f32 %v525_v56, %v3884_v60 }
 0x2ac   :  { %937 = vmatpush.msrb.mxu2 %v3095_v12  ;;  %v3886_v12 = vadd.f32 %v428_v9, %v253_v53  ;;  %v2444_v53 = vpack.i.bf16 %v5985_v22, %v28_v62 }
 0x2ae   :  { %652 = vmatmul.f32.vlgmr.msrb.gmra.mxu3 %v532_v39  ;;  %675 = vmatmul.f32.vlgmr.msra.gmra.mxu0 %v533_v38  ;;  %5956 = vst [vmem:[#allocation122_spill] sm:$0xff] %v3886_v12  ;;  %v542_v50 = vmul.f32 %v525_v56, %v3886_v12  ;;  %v5986_v39 = vld [vmem:[#allocation7_spill] sm:$0xff] }
 0x2af   :  { %698 = vmatmul.f32.vlgmr.msra.gmra.mxu1 %v534_v5  ;;  %721 = vmatmul.f32.vlgmr.msra.gmra.mxu2 %v535_v48  ;;  %v2439_v38 = vpack.i.bf16 %v5986_v39, %v30_v13  ;;  %v3969_v39 = vld [vmem:[%s5578_s1 + $0x4] ss:$0 sm:$0xff] }
 0x2b0   :  { %978 = vmatpush.msra.mxu0 %v3012_v61  ;;  %938 = vmatpush.msrb.mxu2 %v3114_v15  ;;  %v541_v61 = vmul.f32 %v525_v56, %v3880_v46  ;;  %v5963_v15 = vld [vmem:[#allocation73_spill] sm:$0xff] }
 0x2b1   :  { %2445 = vrot.lane.b32.xlu0 %v2444_v53, %s2767_s30  ;;  %2440 = vrot.lane.b32.xlu2 %v2439_v38, %s2767_s30 }
 0x2b2   :  { %979 = vmatpush.msra.mxu0 %v3034_v1  ;;  %939 = vmatpush.msrb.mxu2 %v3132_v19  ;;  %v5958_v1 = vld [vmem:[#allocation34_spill] sm:$0xff]  ;;  %v5965_v19 = vld [vmem:[#allocation77_spill] sm:$0xff] }
 0x2b4   :  { %980 = vmatpush.msra.mxu0 %v3051_v4  ;;  %940 = vmatpush.msrb.mxu2 %v3152_v23  ;;  %v5959_v4 = vld [vmem:[#allocation65_spill] sm:$0xff] }
 0x2b5   :  { %v5967_v23 = vld [vmem:[#allocation81_spill] sm:$0xff] }
 0x2b6   :  { %655 = vmatmul.f32.gmra.mxu3 %v540_v59  ;;  %678 = vmatmul.f32.gmra.mxu0 %v541_v61  ;;  %v2499_v61 = vld [vmem:[%s5577_s0] sm:$0xff] }
 0x2b7   :  { %701 = vmatmul.f32.gmra.mxu1 %v542_v50  ;;  %724 = vmatmul.f32.gmra.mxu2 %v543_v3  ;;  %v5987_v50 = vld [vmem:[#allocation9_spill] sm:$0xff] }
 0x2b8   :  { %981 = vmatpush.msra.mxu0 %v3069_v7  ;;  %941 = vmatpush.msrb.mxu2 %v3170_v26  ;;  %v5960_v7 = vld [vmem:[#allocation37_spill] sm:$0xff]  ;;  %v2459_v3 = vpack.i.bf16 %v5987_v50, %v2499_v61 }
 0x2b9   :  { %v5969_v26 = vld [vmem:[#allocation85_spill] sm:$0xff] }
 0x2ba   :  { %982 = vmatpush.msra.mxu0 %v3089_v11  ;;  %942 = vmatpush.msrb.mxu2 %v3193_v31  ;;  %v5961_v11 = vld [vmem:[#allocation69_spill] sm:$0xff]  ;;  %v5972_v31 = vld [vmem:[#allocation67_spill] sm:$0xff] }
 0x2bb   :  { %2460 = vrot.lane.b32.xlu0 %v2459_v3, %s2767_s30 }
 0x2bc   :  { %983 = vmatpush.msra.mxu0 %v3107_v14  ;;  %943 = vmatpush.msrb.mxu2 %v3212_v36  ;;  %v5962_v14 = vld [vmem:[#allocation40_spill] sm:$0xff]  ;;  %v5974_v36 = vld [vmem:[#allocation71_spill] sm:$0xff] }
 0x2be   :  { %2396 = vmatmul.msk.f32.vlgmr.msrb.gmra.mxu0 %vm263_vm1, %v2972_v54  ;;  %944 = vmatpush.msrb.mxu2 %v3236_v42  ;;  %v5957_v54 = vld [vmem:[#allocation51_spill] sm:$0xff] }
 0x2bf   :  { %984 = vmatpush.msra.mxu0 %v3126_v17  ;;  %v5964_v17 = vld [vmem:[#allocation43_spill] sm:$0xff] }
 0x2c0   :  { %945 = vmatpush.msrb.mxu2 %v3261_v51  ;;  %v5976_v42 = vld [vmem:[#allocation75_spill] sm:$0xff] }
 0x2c1   :  { %985 = vmatpush.msra.mxu0 %v3144_v21  ;;  %v5966_v21 = vld [vmem:[#allocation46_spill] sm:$0xff]  ;;  %v5979_v51 = vld [vmem:[#allocation83_spill] sm:$0xff] }
 0x2c2   :  { %946 = vmatpush.msrb.mxu2 %v3285_v8  ;;  %v5982_v8 = vld [vmem:[#allocation95_spill] sm:$0xff] }
 0x2c3   :  { %986 = vmatpush.msra.mxu0 %v3164_v25  ;;  %v5968_v25 = vld [vmem:[#allocation49_spill] sm:$0xff] }
 0x2c4   :  { %947 = vmatpush.msrb.mxu2 %v3318_v52  ;;  %v5980_v52 = vld [vmem:[#allocation87_spill] sm:$0xff] }
 0x2c5   :  { %987 = vmatpush.msra.mxu0 %v3185_v29  ;;  %v5970_v29 = vld [vmem:[#allocation53_spill] sm:$0xff] }
 0x2c6   :  { %1024 = vmatpush.msra.mxu2 %v3343_v18  ;;  %v5983_v18 = vld [vmem:[#allocation99_spill] sm:$0xff] }
 0x2c7   :  { %988 = vmatpush.msra.mxu0 %v3205_v33  ;;  %v5973_v33 = vld [vmem:[#allocation93_spill] sm:$0xff] }
 0x2c8   :  { %1025 = vmatpush.msra.mxu2 %v3367_v37 }
 0x2c9   :  { %989 = vmatpush.msra.mxu0 %v3231_v41  ;;  %v5975_v41 = vld [vmem:[#allocation97_spill] sm:$0xff] }
 0x2ca   :  { %1026 = vmatpush.msra.mxu2 %v3391_v30  ;;  %v5971_v30 = vld [vmem:[#allocation89_spill] sm:$0xff] }
 0x2cb   :  { %990 = vmatpush.msra.mxu0 %v3256_v49  ;;  %v5978_v49 = vld [vmem:[#allocation79_spill] sm:$0xff] }
 0x2cc   :  { %1027 = vmatpush.msra.mxu2 %v3415_v28  ;;  %v5984_v28 = vld [vmem:[#allocation103_spill] sm:$0xff] }
 0x2cd   :  { %991 = vmatpush.msra.mxu0 %v3280_v57  ;;  %v5981_v57 = vld [vmem:[#allocation91_spill] sm:$0xff] }
 0x2ce   :  { %1028 = vmatpush.msra.mxu2 %v3439_v44  ;;  %v5977_v44 = vld [vmem:[#allocation101_spill] sm:$0xff] }
 0x2cf   :  { %992 = vmatpush.msra.mxu0 %v3306_v35 }
 0x2d0   :  { %1029 = vmatpush.msra.mxu2 %v5957_v54  ;;  %v5988_v54 = vld [vmem:[#allocation5_spill] sm:$0xff] }
 0x2d1   :  { %993 = vmatpush.msra.mxu0 %v5958_v1  ;;  %v5989_v1 = vld [vmem:[#allocation10_spill] sm:$0xff] }
 0x2d2   :  { %1030 = vmatpush.msra.mxu2 %v5959_v4 }
 0x2d3   :  { %1070 = vmatpush.msrb.mxu0 %v5960_v7  ;;  %v2454_v7 = vpack.i.bf16 %v5989_v1, %v5988_v54  ;;  %v3976_v54 = vpop.permute.xlu0 %728 }
 0x2d4   :  { %1031 = vmatpush.msra.mxu2 %v5961_v11 }
 0x2d5   :  { %1071 = vmatpush.msrb.mxu0 %v5962_v14  ;;  %2455 = vrot.lane.b32.xlu2 %v2454_v7, %s2767_s30 }
 0x2d6   :  { %1032 = vmatpush.msra.mxu2 %v5963_v15 }
 0x2d7   :  { %1072 = vmatpush.msrb.mxu0 %v5964_v17 }
 0x2d8   :  { %1033 = vmatpush.msra.mxu2 %v5965_v19 }
 0x2d9   :  { %1073 = vmatpush.msrb.mxu0 %v5966_v21 }
 0x2da   :  { %1034 = vmatpush.msra.mxu2 %v5967_v23 }
 0x2db   :  { %1074 = vmatpush.msrb.mxu0 %v5968_v25 }
 0x2dc   :  { %1035 = vmatpush.msra.mxu2 %v5969_v26 }
 0x2dd   :  { %1075 = vmatpush.msrb.mxu0 %v5970_v29 }
 0x2de   :  { %1036 = vmatpush.msra.mxu2 %v5971_v30 }
 0x2df   :  { %1076 = vmatpush.msrb.mxu0 %v5972_v31 }
 0x2e0   :  { %1037 = vmatpush.msra.mxu2 %v5973_v33 }
 0x2e1   :  { %1077 = vmatpush.msrb.mxu0 %v5974_v36 }
 0x2e2   :  { %1038 = vmatpush.msra.mxu2 %v5975_v41 }
 0x2e3   :  { %1078 = vmatpush.msrb.mxu0 %v5976_v42 }
 0x2e4   :  { %1039 = vmatpush.msra.mxu2 %v5977_v44 }
 0x2e5   :  { %1079 = vmatpush.msrb.mxu0 %v5978_v49 }
 0x2e7   :  { %1080 = vmatpush.msrb.mxu0 %v5979_v51 }
 0x2e9   :  { %1081 = vmatpush.msrb.mxu0 %v5980_v52 }
 0x2eb   :  { %1082 = vmatpush.msrb.mxu0 %v5981_v57 }
 0x2ed   :  { %1083 = vmatpush.msrb.mxu0 %v5982_v8 }
 0x2ef   :  { %1084 = vmatpush.msrb.mxu0 %v5983_v18 }
 0x2f1   :  { %1085 = vmatpush.msrb.mxu0 %v5984_v28 }
 0x31b   :  { %v584_v35 = vpop.f32.mrf.mxu0 }
 0x31c   :  { %v607_v37 = vpop.f32.mrf.mxu1 }
 0x321   :  { %v561_v56 = vpop.f32.mrf.mxu3 }
 0x322   :  { %v630_v63 = vpop.f32.mrf.mxu2  ;;  %v585_v59 = vadd.f32 %v584_v35, %v561_v56 }
 0x323   :  { %v587_v0 = vpop.f32.mrf.mxu0 }
 0x324   :  { %v610_v5 = vpop.f32.mrf.mxu1  ;;  %v608_v14 = vadd.f32 %v607_v37, %v585_v59 }
 0x326   :  { %v631_v62 = vadd.f32 %v630_v63, %v608_v14 }
 0x329   :  { %v564_v48 = vpop.f32.mrf.mxu3 }
 0x32a   :  { %v633_v47 = vpop.f32.mrf.mxu2  ;;  %v588_v17 = vadd.f32 %v587_v0, %v564_v48 }
 0x32b   :  { %v676_v9 = vpop.f32.mrf.mxu0 }
 0x32c   :  { %v699_v25 = vpop.f32.mrf.mxu1  ;;  %v611_v35 = vadd.f32 %v610_v5, %v588_v17  ;;  %v2446_v17 = vpop.permute.xlu0 %2445 }
 0x32e   :  { %v634_v22 = vadd.f32 %v633_v47, %v611_v35 }
 0x331   :  { %v653_v21 = vpop.f32.mrf.mxu3 }
 0x332   :  { %v722_v56 = vpop.f32.mrf.mxu2  ;;  %v654_v13 = vadd.f32 %v653_v21, %v631_v62  ;;  %v2448_v21 = vunpack.i.h.bf16 %v2446_v17 }
 0x333   :  { %v679_v29 = vpop.f32.mrf.mxu0 }
 0x334   :  { %v677_v37 = vadd.f32 %v676_v9, %v654_v13  ;;  %v702_v61 = vpop.f32.mrf.mxu1  ;;  %v2441_v9 = vpop.permute.xlu2 %2440 }
 0x335   :  { %v2443_v1 = vunpack.i.h.bf16 %v2441_v9  ;;  %v2442_v7 = vunpack.i.l.bf16 %v2441_v9  ;;  %v2461_v35 = vpop.permute.xlu0 %2460  ;;  %v5998_v9 = vld [vmem:[#allocation19_spill] sm:$0xff] }
 0x336   :  { %v700_v50 = vadd.f32 %v699_v25, %v677_v37  ;;  %v2447_v25 = vunpack.i.l.bf16 %v2446_v17  ;;  %v6001_v17 = vld [vmem:[#allocation24_spill] sm:$0xff] }
 0x337   :  { %v3981_v14 = vsel %vm491_vm3, %v2442_v7, %v2443_v1  ;;  %v5999_v1 = vld [vmem:[#allocation20_spill] sm:$0xff]  ;;  %v6000_v7 = vld [vmem:[#allocation22_spill] sm:$0xff] }
 0x338   :  { %v723_v3 = vadd.f32 %v722_v56, %v700_v50  ;;  %v5993_v50 = vld [vmem:[#allocation13_spill] sm:$0xff] }
 0x339   :  { %v656_v53 = vpop.f32.mrf.mxu3 }
 0x33a   :  { %v657_v0 = vadd.f32 %v656_v53, %v634_v22  ;;  %v725_v5 = vpop.f32.mrf.mxu2  ;;  %v2463_v22 = vunpack.i.h.bf16 %v2461_v35  ;;  %v2462_v53 = vunpack.i.l.bf16 %v2461_v35  ;;  %v6004_v35 = vld [vmem:[#allocation30_spill] sm:$0xff] }
 0x33b   :  { %v838_v38 = vpop.f32.mrf.mxu0 }
 0x33c   :  { %v680_v48 = vadd.f32 %v679_v29, %v657_v0  ;;  %v3972_v59 = vadd.f32 %v838_v38, %v3969_v39  ;;  %v3985_v29 = vsel %vm491_vm3, %v2447_v25, %v2448_v21  ;;  %v2456_v62 = vpop.permute.xlu2 %2455  ;;  %v3993_v0 = vsel %vm491_vm3, %v2462_v53, %v2463_v22  ;;  %v5990_v38 = vld [vmem:[#allocation8_spill] sm:$0xff]  ;;  %v6002_v21 = vld [vmem:[#allocation26_spill] sm:$0xff]  ;;  %v6007_v53 = vld [vmem:[#allocation39_spill] sm:$0xff] }
 0x33d   :  { %v2458_v56 = vunpack.i.h.bf16 %v2456_v62  ;;  %v2457_v13 = vunpack.i.l.bf16 %v2456_v62  ;;  %v6003_v25 = vld [vmem:[#allocation28_spill] sm:$0xff] }
 0x33e   :  { %v703_v63 = vadd.f32 %v702_v61, %v680_v48  ;;  %862 = vrot.lane.b32.xlu1 %v3972_v59, %s2767_s30  ;;  %v5991_v48 = vld [vmem:[#allocation11_spill] sm:$0xff]  ;;  %v5992_v61 = vld [vmem:[#allocation12_spill] sm:$0xff] }
 0x33f   :  { %v3989_v37 = vsel %vm491_vm3, %v2457_v13, %v2458_v56  ;;  %v6005_v13 = vld [vmem:[#allocation33_spill] sm:$0xff]  ;;  %v6006_v22 = vld [vmem:[#allocation36_spill] sm:$0xff] }
 0x340   :  { %v726_v47 = vadd.f32 %v725_v5, %v703_v63  ;;  %v5994_v63 = vld [vmem:[#allocation14_spill] sm:$0xff]  ;;  %v5995_v5 = vld [vmem:[#allocation15_spill] sm:$0xff] }
 0x342   :  { %746 = vmatpush.msra.mxu3 %v726_v47  ;;  %v5996_v47 = vld [vmem:[#allocation16_spill] sm:$0xff] }
 0x344   :  { %747 = vmatpush.msra.mxu3 %v723_v3  ;;  %v5997_v3 = vld [vmem:[#allocation17_spill] sm:$0xff] }
 0x345   :  { %2394 = vmatmul.msk.f32.vlgmr.msra.gmra.mxu3 %vm455_vm2, %v3976_v54 }
 0x346   :  { %799 = vmatpush.msrb.mxu3 %v3981_v14 }
 0x348   :  { %800 = vmatpush.msrb.mxu3 %v3985_v29 }
 0x34a   :  { %801 = vmatpush.msrb.mxu3 %v3989_v37 }
 0x34c   :  { %802 = vmatpush.msrb.mxu3 %v3993_v0 }
 0x34e   :  { %955 = vmatpush.msra.mxu3 %v5990_v38  ;;  %v6008_v38 = vld [vmem:[#allocation42_spill] sm:$0xff] }
 0x350   :  { %956 = vmatpush.msra.mxu3 %v5991_v48  ;;  %v6009_v48 = vld [vmem:[#allocation45_spill] sm:$0xff] }
 0x352   :  { %957 = vmatpush.msra.mxu3 %v5992_v61  ;;  %v6010_v61 = vld [vmem:[#allocation48_spill] sm:$0xff] }
 0x354   :  { %958 = vmatpush.msra.mxu3 %v5993_v50  ;;  %v6011_v50 = vld [vmem:[#allocation52_spill] sm:$0xff] }
 0x356   :  { %959 = vmatpush.msra.mxu3 %v5994_v63  ;;  %v6012_v63 = vld [vmem:[#allocation66_spill] sm:$0xff] }
 0x358   :  { %960 = vmatpush.msra.mxu3 %v5995_v5  ;;  %v6013_v5 = vld [vmem:[#allocation70_spill] sm:$0xff] }
 0x35a   :  { %961 = vmatpush.msra.mxu3 %v5996_v47  ;;  %v6014_v47 = vld [vmem:[#allocation74_spill] sm:$0xff] }
 0x35c   :  { %962 = vmatpush.msra.mxu3 %v5997_v3  ;;  %v6015_v3 = vld [vmem:[#allocation78_spill] sm:$0xff] }
 0x35e   :  { %963 = vmatpush.msra.mxu3 %v5998_v9  ;;  %v6016_v9 = vld [vmem:[#allocation82_spill] sm:$0xff] }
 0x360   :  { %964 = vmatpush.msra.mxu3 %v5999_v1  ;;  %v6017_v1 = vld [vmem:[#allocation86_spill] sm:$0xff] }
 0x362   :  { %965 = vmatpush.msra.mxu3 %v6000_v7  ;;  %v6018_v7 = vld [vmem:[#allocation90_spill] sm:$0xff] }
 0x364   :  { %966 = vmatpush.msra.mxu3 %v6001_v17  ;;  %v6019_v17 = vld [vmem:[#allocation94_spill] sm:$0xff] }
 0x366   :  { %967 = vmatpush.msra.mxu3 %v6002_v21  ;;  %v6020_v21 = vld [vmem:[#allocation98_spill] sm:$0xff] }
 0x368   :  { %968 = vmatpush.msra.mxu3 %v6003_v25  ;;  %v6021_v25 = vld [vmem:[#allocation102_spill] sm:$0xff] }
 0x36a   :  { %969 = vmatpush.msra.mxu3 %v6004_v35 }
 0x36c   :  { %970 = vmatpush.msra.mxu3 %v6005_v13 }
 0x3c8   :  { %v749_v62 = vpop.f32.mrf.mxu3 }
 0x3c9   :  { %v752_v56 = vmax.f32 %v749_v62, 0.0  ;;  %v4032_v62 = vld [vmem:[%s5578_s1 + $0x3] ss:$0 sm:$0xff] }
 0x3cb   :  { %2395 = vmatmul.msk.f32.vlgmr.msrb.gmra.mxu3 %vm263_vm1, %v752_v56 }
 0x3cc   :  { %1047 = vmatpush.msrb.mxu3 %v6006_v22 }
 0x3ce   :  { %1048 = vmatpush.msrb.mxu3 %v6007_v53 }
 0x3d0   :  { %1049 = vmatpush.msrb.mxu3 %v6008_v38 }
 0x3d2   :  { %1050 = vmatpush.msrb.mxu3 %v6009_v48 }
 0x3d4   :  { %1051 = vmatpush.msrb.mxu3 %v6010_v61 }
 0x3d6   :  { %1052 = vmatpush.msrb.mxu3 %v6011_v50 }
 0x3d8   :  { %1053 = vmatpush.msrb.mxu3 %v6012_v63 }
 0x3da   :  { %1054 = vmatpush.msrb.mxu3 %v6013_v5 }
 0x3dc   :  { %1055 = vmatpush.msrb.mxu3 %v6014_v47 }
 0x3de   :  { %1056 = vmatpush.msrb.mxu3 %v6015_v3 }
 0x3e0   :  { %1057 = vmatpush.msrb.mxu3 %v6016_v9 }
 0x3e2   :  { %1058 = vmatpush.msrb.mxu3 %v6017_v1 }
 0x3e4   :  { %1059 = vmatpush.msrb.mxu3 %v6018_v7  ;;  %v863_v7 = vpop.permute.xlu1 %862 }
 0x3e6   :  { %1060 = vmatpush.msrb.mxu3 %v6019_v17 }
 0x3e8   :  { %1061 = vmatpush.msrb.mxu3 %v6020_v21 }
 0x3ea   :  { %1062 = vmatpush.msrb.mxu3 %v6021_v25 }
 0x44e   :  { %v804_v35 = vpop.f32.mrf.mxu3 }
 0x44f   :  { %v805_v56 = vadd.f32 %v804_v35, %v4032_v62 }
 0x451   :  { %v841_v13 = vadd.f32 %v3972_v59, %v805_v56 }
 0x453   :  { %v2397_v22 = vmul.f32 -1.442695, %v841_v13 }
 0x455   :  { %2469 = vpow2.f32 %v2397_v22 }
 0x45b   :  { %v2470_v53 = vpop.eup %2469 }
 0x45c   :  { %v845_v38 = vadd.f32 1.0, %v2470_v53  ;;  %v6022_v53 = vld [vmem:[#allocation18_spill] sm:$0xff] }
 0x45e   :  { %2471 = vrcp.f32 %v845_v38  ;;  %v857_v63 = vand.u32 2147483648, %v845_v38  ;;  %v855_v47 = vand.u32 2147483647, %v845_v38  ;;  %vm851_vm6 = vweird.f32 %v845_v38 }
 0x460   :  { %v858_v9 = vor.u32 1.1754944e-38, %v857_v63  ;;  %vm856_vm8 = vcmp.eq.f32.partialorder %v855_v47, 8.507059e+37 }
 0x464   :  { %v2472_v48 = vpop.eup %2471 }
 0x465   :  { %v847_v61 = vmul.f32 %v2472_v48, %v845_v38  ;;  %vm852_vm5 = vweird.f32 %v2472_v48 }
 0x466   :  { %vm853_vm7 = vmor %vm851_vm6, %vm852_vm5 }
 0x467   :  { %v848_v50 = vsub.f32 1.0, %v847_v61 }
 0x469   :  { %v849_v5 = vmul.f32 %v2472_v48, %v848_v50 }
 0x46b   :  { %v850_v3 = vadd.f32 %v2472_v48, %v849_v5 }
 0x46d   :  { %v854_v1 = vsel %vm853_vm7, %v2472_v48, %v850_v3 }
 0x46e   :  { %v859_v59 = vsel %vm856_vm8, %v858_v9, %v854_v1  ;;  %v6023_v9 = vld [vmem:[#allocation21_spill] sm:$0xff]  ;;  %v6024_v1 = vld [vmem:[#allocation23_spill] sm:$0xff] }
 0x46f   :  { %v865_v17 = vmul.f32 %v863_v7, %v859_v59  ;;  %v872_v13 = vsub.f32 1.0, %v859_v59  ;;  %v878_v61 = vmul.f32 %v859_v59, %v6022_v53  ;;  %v6025_v7 = vld [vmem:[#allocation25_spill] sm:$0xff]  ;;  %v6026_v59 = vld [vmem:[#allocation27_spill] sm:$0xff]  ;;  %v6033_v53 = vld [vmem:[#allocation44_spill] sm:$0xff] }
 0x471   :  { %867 = vrot.lane.b32.xlu2 %v865_v17, %s2767_s30  ;;  %v6027_v17 = vld [vmem:[#allocation29_spill] sm:$0xff] }
 0x4cb   :  { %v868_v21 = vpop.permute.xlu2 %867 }
 0x4cc   :  { %v870_v25 = vadd.f32 %v868_v21, %v805_v56  ;;  %v6028_v21 = vld [vmem:[#allocation31_spill] sm:$0xff] }
 0x4ce   :  { %2473 = vtanh.f32 %v870_v25  ;;  %v6029_v25 = vld [vmem:[#allocation32_spill] sm:$0xff] }
 0x4d4   :  { %v2474_v35 = vpop.eup %2473 }
 0x4d5   :  { %874 = vrot.lane.b32.xlu0 %v2474_v35, %s2766_s23  ;;  %v6030_v35 = vld [vmem:[#allocation35_spill] sm:$0xff] }
 0x547   :  { %v875_v22 = vpop.permute.xlu0 %874 }
 0x548   :  { %v877_v38 = vmul.f32 %v875_v22, %v872_v13  ;;  %v6031_v13 = vld [vmem:[#allocation38_spill] sm:$0xff]  ;;  %v6032_v22 = vld [vmem:[#allocation41_spill] sm:$0xff] }
 0x54a   :  { %v4039_v50 = vadd.f32 %v878_v61, %v877_v38  ;;  %v6034_v61 = vld [vmem:[#allocation47_spill] sm:$0xff]  ;;  %v6035_v38 = vld [vmem:[#allocation50_spill] sm:$0xff] }
 0x54c   :  { %887 = vrot.lane.b32.xlu0 %v4039_v50, %s2767_s30  ;;  %884 = vrot.lane.b32.xlu2 %v4039_v50, %s2768_s7 }
 0x54d   :  { %881 = vrot.lane.b32.xlu1 %v4039_v50, %s2766_s23 }
 0x5a6   :  { %v885_v48 = vpop.permute.xlu2 %884 }
 0x5be   :  { %v888_v5 = vpop.permute.xlu0 %887 }
 0x5bf   :  { %v4047_v56 = vpop.permute.xlu1 %881 }
 0x5c0   :  { %v890_v63 = vsel %vm263_vm1, %v4047_v56, %v4039_v50 }
 0x5c1   :  { %v891_v47 = vsel %vm491_vm3, %v890_v63, %v885_v48  ;;  %v6036_v48 = vld [vmem:[#allocation54_spill] sm:$0xff]  ;;  %v6037_v63 = vld [vmem:[#allocation55_spill] sm:$0xff] }
 0x5c2   :  { %v892_v3 = vsel %vm493_vm4, %v891_v47, %v888_v5  ;;  %v6038_v5 = vld [vmem:[#allocation56_spill] sm:$0xff]  ;;  %v6039_v47 = vld [vmem:[#allocation57_spill] sm:$0xff] }
 0x5c3   :  { %908 = vmatpush.msrb.mxu1 %v892_v3  ;;  %v6040_v3 = vld [vmem:[#allocation58_spill] sm:$0xff] }
 0x5c4   :  { %2398 = vmatmul.msk.f32.vlgmr.msrb.gmra.mxu1 %vm182_vm0, %v6023_v9 }
 0x5c5   :  { %1001 = vmatpush.msra.mxu1 %v6024_v1  ;;  %v6041_v1 = vld [vmem:[#allocation59_spill] sm:$0xff] }
 0x5c7   :  { %1002 = vmatpush.msra.mxu1 %v6025_v7  ;;  %v6042_v7 = vld [vmem:[#allocation60_spill] sm:$0xff] }
 0x5c9   :  { %1003 = vmatpush.msra.mxu1 %v6026_v59  ;;  %v6043_v59 = vld [vmem:[#allocation61_spill] sm:$0xff] }
 0x5cb   :  { %1004 = vmatpush.msra.mxu1 %v6027_v17  ;;  %v6044_v17 = vld [vmem:[#allocation62_spill] sm:$0xff] }
 0x5cc   :  { %2399 = vmatmul.msk.f32.gmra.mxu1 %vm182_vm0, %v6028_v21 }
 0x5cd   :  { %1005 = vmatpush.msra.mxu1 %v6029_v25  ;;  %v6045_v25 = vld [vmem:[#allocation63_spill] sm:$0xff] }
 0x5cf   :  { %1006 = vmatpush.msra.mxu1 %v6030_v35  ;;  %v6046_v35 = vld [vmem:[#allocation64_spill] sm:$0xff] }
 0x5d1   :  { %1007 = vmatpush.msra.mxu1 %v6031_v13  ;;  %v6047_v13 = vld [vmem:[#allocation68_spill] sm:$0xff] }
 0x5d3   :  { %1008 = vmatpush.msra.mxu1 %v6032_v22  ;;  %v6048_v22 = vld [vmem:[#allocation72_spill] sm:$0xff] }
 0x5d5   :  { %1009 = vmatpush.msra.mxu1 %v6033_v53  ;;  %v6049_v53 = vld [vmem:[#allocation76_spill] sm:$0xff] }
 0x5d7   :  { %1010 = vmatpush.msra.mxu1 %v6034_v61  ;;  %v6050_v61 = vld [vmem:[#allocation80_spill] sm:$0xff] }
 0x5d9   :  { %1011 = vmatpush.msra.mxu1 %v6035_v38  ;;  %v6051_v38 = vld [vmem:[#allocation84_spill] sm:$0xff] }
 0x5db   :  { %1012 = vmatpush.msra.mxu1 %v6036_v48  ;;  %v6052_v48 = vld [vmem:[#allocation88_spill] sm:$0xff] }
 0x5dd   :  { %1013 = vmatpush.msra.mxu1 %v6037_v63  ;;  %v6053_v63 = vld [vmem:[#allocation92_spill] sm:$0xff] }
 0x5df   :  { %1014 = vmatpush.msra.mxu1 %v6038_v5  ;;  %v6054_v5 = vld [vmem:[#allocation96_spill] sm:$0xff] }
 0x5e1   :  { %1015 = vmatpush.msra.mxu1 %v6039_v47  ;;  %v6055_v47 = vld [vmem:[#allocation100_spill] sm:$0xff] }
 0x5e3   :  { %1016 = vmatpush.msra.mxu1 %v6040_v3  ;;  %v6056_v3 = vld [vmem:[#allocation104_spill] sm:$0xff] }
 0x5e5   :  { %1093 = vmatpush.msrb.mxu1 %v6041_v1 }
 0x5e7   :  { %1094 = vmatpush.msrb.mxu1 %v6042_v7  ;;  %v6057_v7 = vld [vmem:[#allocation105_spill] sm:$0xff] }
 0x5e9   :  { %1095 = vmatpush.msrb.mxu1 %v6043_v59 }
 0x5eb   :  { %1096 = vmatpush.msrb.mxu1 %v6044_v17  ;;  %v6058_v17 = vld [vmem:[#allocation107_spill] sm:$0xff] }
 0x5ed   :  { %1097 = vmatpush.msrb.mxu1 %v6045_v25 }
 0x5ef   :  { %1098 = vmatpush.msrb.mxu1 %v6046_v35 }
 0x5f1   :  { %1099 = vmatpush.msrb.mxu1 %v6047_v13  ;;  %v6059_v13 = vld [vmem:[#allocation106_spill] sm:$0xff] }
 0x5f3   :  { %1100 = vmatpush.msrb.mxu1 %v6048_v22 }
 0x5f5   :  { %1101 = vmatpush.msrb.mxu1 %v6049_v53  ;;  %v4098_v53 = vld [vmem:[%s5580_s3 + $0x78] sm:$0xff] }
 0x5f7   :  { %1102 = vmatpush.msrb.mxu1 %v6050_v61  ;;  %v4105_v61 = vld [vmem:[%s5580_s3 + $0x70] sm:$0xff] }
 0x5f9   :  { %1103 = vmatpush.msrb.mxu1 %v6051_v38 }
 0x5fb   :  { %1104 = vmatpush.msrb.mxu1 %v6052_v48 }
 0x5fd   :  { %1105 = vmatpush.msrb.mxu1 %v6053_v63 }
 0x5ff   :  { %1106 = vmatpush.msrb.mxu1 %v6054_v5 }
 0x601   :  { %1107 = vmatpush.msrb.mxu1 %v6055_v47 }
 0x603   :  { %1108 = vmatpush.msrb.mxu1 %v6056_v3  ;;  %v4116_v3 = vld [vmem:[%s5580_s3 + $0x68] sm:$0xff] }
 0x641   :  { %v910_v1 = vpop.f32.mrf.mxu1 }
 0x642   :  { %v916_v59 = vmul.f32 %v910_v1, %v6057_v7  ;;  %v917_v25 = vmul.f32 %v910_v1, %v6058_v17  ;;  %v918_v35 = vmul.f32 %v910_v1, %v3818_v27  ;;  %v919_v22 = vmul.f32 %v910_v1, %v6059_v13 }
 0x644   :  { %948 = vmatmul.f32.vlgmr.msrb.gmra.mxu2 %v916_v59  ;;  %971 = vmatmul.f32.vlgmr.msra.gmra.mxu3 %v917_v25  ;;  %v4123_v59 = vld [vmem:[%s5580_s3 + $0x60] sm:$0xff]  ;;  %v4129_v25 = vld [vmem:[%s5580_s3 + $0x58] sm:$0xff] }
 0x645   :  { %994 = vmatmul.f32.vlgmr.msra.gmra.mxu0 %v918_v35  ;;  %1017 = vmatmul.f32.vlgmr.msra.gmra.mxu1 %v919_v22  ;;  %v920_v35 = vmul.f32 %v910_v1, %v3859_v2  ;;  %v921_v22 = vmul.f32 %v910_v1, %v3862_v34 }
 0x646   :  { %1174 = vmatpush.msra.mxu3 %v3820_v43  ;;  %1273 = vmatpush.msra.mxu1 %v4098_v53 }
 0x648   :  { %1175 = vmatpush.msra.mxu3 %v3826_v20  ;;  %1274 = vmatpush.msra.mxu1 %v4105_v61 }
 0x649   :  { %v913_v38 = vpop.f32.mrf.mxu1 }
 0x64a   :  { %1176 = vmatpush.msra.mxu3 %v3829_v40  ;;  %v924_v48 = vmul.f32 %v913_v38, %v3833_v10  ;;  %v925_v63 = vmul.f32 %v913_v38, %v3838_v55  ;;  %v926_v5 = vmul.f32 %v913_v38, %v3840_v24  ;;  %v927_v47 = vmul.f32 %v913_v38, %v3835_v6 }
 0x64b   :  { %1275 = vmatpush.msra.mxu1 %v4116_v3 }
 0x64c   :  { %1177 = vmatpush.msra.mxu3 %v3844_v32  ;;  %951 = vmatmul.f32.gmra.mxu2 %v924_v48  ;;  %v922_v48 = vmul.f32 %v910_v1, %v3867_v16  ;;  %v4151_v16 = vld [vmem:[%s5580_s3 + $0x48] sm:$0xff] }
 0x64d   :  { %974 = vmatmul.f32.gmra.mxu3 %v925_v63  ;;  %997 = vmatmul.f32.gmra.mxu0 %v926_v5  ;;  %v4138_v63 = vld [vmem:[%s5580_s3 + $0x50] sm:$0xff]  ;;  %v923_v5 = vmul.f32 %v910_v1, %v3865_v45  ;;  %6060 = vst [vmem:[#allocation51_spill] sm:$0xff] %v4151_v16 }
 0x64e   :  { %1020 = vmatmul.f32.gmra.mxu1 %v927_v47  ;;  %v4145_v47 = vld [vmem:[%s5580_s3 + $0x178] sm:$0xff]  ;;  %v4157_v1 = vld [vmem:[%s5580_s3 + $0x170] sm:$0xff] }
 0x64f   :  { %1276 = vmatpush.msra.mxu1 %v4123_v59  ;;  %6061 = vst [vmem:[#allocation34_spill] sm:$0xff] %v4157_v1 }
 0x651   :  { %1277 = vmatpush.msra.mxu1 %v4129_v25 }
 0x653   :  { %1278 = vmatpush.msra.mxu1 %v4138_v63 }
 0x654   :  { %1040 = vmatmul.f32.vlgmr.msra.gmra.mxu2 %v920_v35  ;;  %v4163_v35 = vld [vmem:[%s5580_s3 + $0x40] sm:$0xff] }
 0x655   :  { %1063 = vmatmul.f32.vlgmr.msrb.gmra.mxu3 %v921_v22  ;;  %1086 = vmatmul.f32.vlgmr.msrb.gmra.mxu0 %v922_v48  ;;  %6062 = vst [vmem:[#allocation65_spill] sm:$0xff] %v4163_v35  ;;  %v928_v22 = vmul.f32 %v913_v38, %v3877_v58  ;;  %v4170_v48 = vld [vmem:[%s5580_s3 + $0x168] sm:$0xff]  ;;  %v931_v58 = vmul.f32 %v913_v38, %v3884_v60 }
 0x656   :  { %1109 = vmatmul.f32.vlgmr.msrb.gmra.mxu1 %v923_v5  ;;  %1319 = vmatpush.msrb.mxu3 %v4145_v47  ;;  %v929_v5 = vmul.f32 %v913_v38, %v3880_v46 }
 0x657   :  { %1279 = vmatpush.msra.mxu1 %v4151_v16  ;;  %v4178_v16 = vld [vmem:[%s5580_s3 + $0x38] sm:$0xff] }
 0x658   :  { %1320 = vmatpush.msrb.mxu3 %v4157_v1  ;;  %v930_v1 = vmul.f32 %v913_v38, %v3886_v12  ;;  %v4191_v12 = vld [vmem:[%s5580_s3 + $0x158] sm:$0xff]  ;;  %v4197_v38 = vld [vmem:[%s5580_s3 + $0x30] sm:$0xff] }
 0x659   :  { %1280 = vmatpush.msra.mxu1 %v4163_v35  ;;  %v4185_v35 = vld [vmem:[%s5580_s3 + $0x160] sm:$0xff]  ;;  %6064 = vst [vmem:[#allocation69_spill] sm:$0xff] %v4191_v12 }
 0x65a   :  { %1321 = vmatpush.msrb.mxu3 %v4170_v48  ;;  %6063 = vst [vmem:[#allocation37_spill] sm:$0xff] %v4185_v35 }
 0x65b   :  { %1281 = vmatpush.msra.mxu1 %v4178_v16  ;;  %6065 = vst [vmem:[#allocation40_spill] sm:$0xff] %v4197_v38 }
 0x65c   :  { %1043 = vmatmul.f32.gmra.mxu2 %v928_v22  ;;  %1322 = vmatpush.msrb.mxu3 %v4185_v35  ;;  %v4203_v22 = vld [vmem:[%s5580_s3 + $0x150] sm:$0xff] }
 0x65d   :  { %1066 = vmatmul.f32.gmra.mxu3 %v929_v5  ;;  %1089 = vmatmul.f32.gmra.mxu0 %v930_v1  ;;  %6066 = vst [vmem:[#allocation73_spill] sm:$0xff] %v4203_v22  ;;  %v4215_v1 = vld [vmem:[%s5580_s3 + $0x148] sm:$0xff]  ;;  %v4221_v5 = vld [vmem:[%s5580_s3 + $0x20] sm:$0xff] }
 0x65e   :  { %1112 = vmatmul.f32.gmra.mxu1 %v931_v58  ;;  %1323 = vmatpush.msrb.mxu3 %v4191_v12  ;;  %v4209_v58 = vld [vmem:[%s5580_s3 + $0x28] sm:$0xff]  ;;  %6068 = vst [vmem:[#allocation77_spill] sm:$0xff] %v4215_v1 }
 0x65f   :  { %1282 = vmatpush.msra.mxu1 %v4197_v38  ;;  %6067 = vst [vmem:[#allocation43_spill] sm:$0xff] %v4209_v58 }
 0x660   :  { %1324 = vmatpush.msrb.mxu3 %v4203_v22  ;;  %6069 = vst [vmem:[#allocation46_spill] sm:$0xff] %v4221_v5  ;;  %v4227_v22 = vld [vmem:[%s5580_s3 + $0x140] sm:$0xff] }
 0x661   :  { %1283 = vmatpush.msra.mxu1 %v4209_v58  ;;  %6070 = vst [vmem:[#allocation81_spill] sm:$0xff] %v4227_v22 }
 0x662   :  { %1325 = vmatpush.msrb.mxu3 %v4215_v1  ;;  %v4235_v1 = vld [vmem:[%s5580_s3 + $0x18] sm:$0xff] }
 0x663   :  { %1284 = vmatpush.msra.mxu1 %v4221_v5  ;;  %6071 = vst [vmem:[#allocation49_spill] sm:$0xff] %v4235_v1  ;;  %v4241_v5 = vld [vmem:[%s5580_s3 + $0x138] sm:$0xff] }
 0x664   :  { %1326 = vmatpush.msrb.mxu3 %v4227_v22  ;;  %6072 = vst [vmem:[#allocation85_spill] sm:$0xff] %v4241_v5  ;;  %v4247_v22 = vld [vmem:[%s5580_s3 + $0x10] sm:$0xff] }
 0x665   :  { %2402 = vmatmul.msk.f32.vlgmr.msra.gmra.mxu3 %vm263_vm1, %v4047_v56  ;;  %1285 = vmatpush.msra.mxu1 %v4235_v1  ;;  %6073 = vst [vmem:[#allocation53_spill] sm:$0xff] %v4247_v22  ;;  %v4253_v56 = vld [vmem:[%s5580_s3 + $0x130] sm:$0xff]  ;;  %v4259_v1 = vld [vmem:[%s5580_s3 + $0x8] sm:$0xff] }
 0x666   :  { %1327 = vmatpush.msrb.mxu3 %v4241_v5  ;;  %6074 = vst [vmem:[#allocation89_spill] sm:$0xff] %v4253_v56  ;;  %v4265_v5 = vld [vmem:[%s5580_s3 + $0x128] sm:$0xff] }
 0x667   :  { %1286 = vmatpush.msra.mxu1 %v4247_v22  ;;  %6075 = vst [vmem:[#allocation67_spill] sm:$0xff] %v4259_v1  ;;  %v4271_v22 = vld [vmem:[%s5580_s3] sm:$0xff] }
 0x668   :  { %1328 = vmatpush.msrb.mxu3 %v4253_v56  ;;  %6076 = vst [vmem:[#allocation93_spill] sm:$0xff] %v4265_v5  ;;  %v4277_v56 = vld [vmem:[%s5580_s3 + $0x120] sm:$0xff] }
 0x669   :  { %1287 = vmatpush.msra.mxu1 %v4259_v1  ;;  %6077 = vst [vmem:[#allocation71_spill] sm:$0xff] %v4271_v22  ;;  %v4283_v1 = vld [vmem:[%s5580_s3 + $0x278] sm:$0xff] }
 0x66a   :  { %1329 = vmatpush.msrb.mxu3 %v4265_v5  ;;  %6078 = vst [vmem:[#allocation97_spill] sm:$0xff] %v4277_v56  ;;  %v4289_v5 = vld [vmem:[%s5580_s3 + $0x118] sm:$0xff] }
 0x66b   :  { %1288 = vmatpush.msra.mxu1 %v4271_v22  ;;  %6079 = vst [vmem:[#allocation75_spill] sm:$0xff] %v4283_v1  ;;  %v4295_v22 = vld [vmem:[%s5580_s3 + $0x270] sm:$0xff] }
 0x66c   :  { %1330 = vmatpush.msrb.mxu3 %v4277_v56  ;;  %6080 = vst [vmem:[#allocation101_spill] sm:$0xff] %v4289_v5  ;;  %v4301_v56 = vld [vmem:[%s5580_s3 + $0x110] sm:$0xff] }
 0x66d   :  { %1365 = vmatpush.msrb.mxu1 %v4283_v1  ;;  %6081 = vst [vmem:[#allocation79_spill] sm:$0xff] %v4295_v22  ;;  %v4307_v1 = vld [vmem:[%s5580_s3 + $0x268] sm:$0xff] }
 0x66e   :  { %1331 = vmatpush.msrb.mxu3 %v4289_v5  ;;  %6082 = vst [vmem:[#allocation83_spill] sm:$0xff] %v4301_v56  ;;  %v4313_v5 = vld [vmem:[%s5580_s3 + $0x108] sm:$0xff] }
 0x66f   :  { %1366 = vmatpush.msrb.mxu1 %v4295_v22  ;;  %6083 = vst [vmem:[#allocation87_spill] sm:$0xff] %v4307_v1  ;;  %v4319_v22 = vld [vmem:[%s5580_s3 + $0x260] sm:$0xff] }
 0x670   :  { %1332 = vmatpush.msrb.mxu3 %v4301_v56  ;;  %6084 = vst [vmem:[#allocation91_spill] sm:$0xff] %v4313_v5  ;;  %v4325_v56 = vld [vmem:[%s5580_s3 + $0x100] sm:$0xff] }
 0x671   :  { %1367 = vmatpush.msrb.mxu1 %v4307_v1  ;;  %6085 = vst [vmem:[#allocation95_spill] sm:$0xff] %v4319_v22  ;;  %v4331_v1 = vld [vmem:[%s5580_s3 + $0x258] sm:$0xff] }
 0x672   :  { %1333 = vmatpush.msrb.mxu3 %v4313_v5  ;;  %6086 = vst [vmem:[#allocation99_spill] sm:$0xff] %v4325_v56  ;;  %v4337_v5 = vld [vmem:[%s5580_s3 + $0x378] sm:$0xff] }
 0x673   :  { %1368 = vmatpush.msrb.mxu1 %v4319_v22  ;;  %6087 = vst [vmem:[#allocation103_spill] sm:$0xff] %v4331_v1  ;;  %v4343_v22 = vld [vmem:[%s5580_s3 + $0x250] sm:$0xff] }
 0x674   :  { %1334 = vmatpush.msrb.mxu3 %v4325_v56  ;;  %6088 = vst [vmem:[#allocation6_spill] sm:$0xff] %v4337_v5  ;;  %v4349_v56 = vld [vmem:[%s5580_s3 + $0x370] sm:$0xff] }
 0x675   :  { %1369 = vmatpush.msrb.mxu1 %v4331_v1  ;;  %6089 = vst [vmem:[#allocation7_spill] sm:$0xff] %v4343_v22 }
 0x676   :  { %1411 = vmatpush.msra.mxu3 %v4337_v5  ;;  %6090 = vst [vmem:[#allocation9_spill] sm:$0xff] %v4349_v56  ;;  %v4356_v5 = vld [vmem:[%s5580_s3 + $0x368] sm:$0xff] }
 0x677   :  { %1370 = vmatpush.msrb.mxu1 %v4343_v22  ;;  %6091 = vst [vmem:[#allocation5_spill] sm:$0xff] %v4356_v5  ;;  %v4363_v22 = vld [vmem:[%s5580_s3 + $0x360] sm:$0xff] }
 0x678   :  { %1412 = vmatpush.msra.mxu3 %v4349_v56  ;;  %6092 = vst [vmem:[#allocation10_spill] sm:$0xff] %v4363_v22 }
 0x679   :  { %1371 = vmatpush.msrb.mxu1 %v5959_v4  ;;  %v4370_v4 = vld [vmem:[%s5580_s3 + $0x358] sm:$0xff] }
 0x67a   :  { %1413 = vmatpush.msra.mxu3 %v4356_v5  ;;  %6093 = vst [vmem:[#allocation8_spill] sm:$0xff] %v4370_v4 }
 0x67b   :  { %1372 = vmatpush.msrb.mxu1 %v5961_v11  ;;  %v4377_v11 = vld [vmem:[%s5580_s3 + $0x350] sm:$0xff] }
 0x67c   :  { %1414 = vmatpush.msra.mxu3 %v4363_v22  ;;  %6094 = vst [vmem:[#allocation11_spill] sm:$0xff] %v4377_v11 }
 0x67d   :  { %1373 = vmatpush.msrb.mxu1 %v5963_v15 }
 0x67e   :  { %1415 = vmatpush.msra.mxu3 %v4370_v4 }
 0x67f   :  { %1374 = vmatpush.msrb.mxu1 %v5965_v19 }
 0x680   :  { %1416 = vmatpush.msra.mxu3 %v4377_v11 }
 0x681   :  { %1375 = vmatpush.msrb.mxu1 %v5967_v23 }
 0x682   :  { %1417 = vmatpush.msra.mxu3 %v5972_v31 }
 0x683   :  { %1376 = vmatpush.msrb.mxu1 %v5969_v26 }
 0x684   :  { %1418 = vmatpush.msra.mxu3 %v5974_v36 }
 0x685   :  { %1377 = vmatpush.msrb.mxu1 %v5971_v30 }
 0x686   :  { %1419 = vmatpush.msra.mxu3 %v5976_v42 }
 0x687   :  { %1378 = vmatpush.msrb.mxu1 %v5973_v33 }
 0x688   :  { %1420 = vmatpush.msra.mxu3 %v5978_v49 }
 0x689   :  { %1379 = vmatpush.msrb.mxu1 %v5975_v41 }
 0x68a   :  { %1421 = vmatpush.msra.mxu3 %v5979_v51 }
 0x68b   :  { %1380 = vmatpush.msrb.mxu1 %v5977_v44 }
 0x68c   :  { %1422 = vmatpush.msra.mxu3 %v5980_v52 }
 0x68e   :  { %1423 = vmatpush.msra.mxu3 %v5981_v57 }
 0x690   :  { %1424 = vmatpush.msra.mxu3 %v5982_v8 }
 0x692   :  { %1425 = vmatpush.msra.mxu3 %v5983_v18 }
 0x694   :  { %1426 = vmatpush.msra.mxu3 %v5984_v28 }
 0x6c2   :  { %v995_v15 = vpop.f32.mrf.mxu0  ;;  %v1018_v19 = vpop.f32.mrf.mxu1 }
 0x6c7   :  { %v949_v23 = vpop.f32.mrf.mxu2  ;;  %v972_v26 = vpop.f32.mrf.mxu3 }
 0x6c8   :  { %v973_v41 = vadd.f32 %v972_v26, %v949_v23 }
 0x6ca   :  { %v998_v30 = vpop.f32.mrf.mxu0  ;;  %v996_v42 = vadd.f32 %v995_v15, %v973_v41  ;;  %v4500_v41 = vld [vmem:[%s5580_s3 + $0x80] sm:$0xff] }
 0x6cb   :  { %v1021_v36 = vpop.f32.mrf.mxu1  ;;  %6098 = vst [vmem:[#allocation15_spill] sm:$0xff] %v4500_v41 }
 0x6cc   :  { %v1019_v8 = vadd.f32 %v1018_v19, %v996_v42  ;;  %v4476_v19 = vld [vmem:[%s5580_s3 + $0xa0] sm:$0xff] }
 0x6cf   :  { %v952_v31 = vpop.f32.mrf.mxu2 }
 0x6d0   :  { %v975_v33 = vpop.f32.mrf.mxu3 }
 0x6d1   :  { %v976_v44 = vadd.f32 %v975_v33, %v952_v31  ;;  %v4488_v33 = vld [vmem:[%s5580_s3 + $0x90] sm:$0xff] }
 0x6d2   :  { %v1087_v52 = vpop.f32.mrf.mxu0  ;;  %6096 = vst [vmem:[#allocation13_spill] sm:$0xff] %v4488_v33 }
 0x6d3   :  { %v999_v57 = vadd.f32 %v998_v30, %v976_v44  ;;  %v1110_v11 = vpop.f32.mrf.mxu1  ;;  %v4482_v30 = vld [vmem:[%s5580_s3 + $0x98] sm:$0xff] }
 0x6d4   :  { %6095 = vst [vmem:[#allocation12_spill] sm:$0xff] %v4482_v30 }
 0x6d5   :  { %v1022_v4 = vadd.f32 %v1021_v36, %v999_v57  ;;  %v4494_v36 = vld [vmem:[%s5580_s3 + $0x88] sm:$0xff]  ;;  %v4525_v57 = vld [vmem:[%s5580_s3 + $0x2e0] sm:$0xff] }
 0x6d6   :  { %6097 = vst [vmem:[#allocation14_spill] sm:$0xff] %v4494_v36 }
 0x6d7   :  { %v1041_v49 = vpop.f32.mrf.mxu2  ;;  %6102 = vst [vmem:[#allocation20_spill] sm:$0xff] %v4525_v57 }
 0x6d8   :  { %v1064_v51 = vpop.f32.mrf.mxu3  ;;  %v1042_v18 = vadd.f32 %v1041_v49, %v1019_v8  ;;  %v4507_v49 = vld [vmem:[%s5580_s3 + $0x2f8] sm:$0xff] }
 0x6d9   :  { %6099 = vst [vmem:[#allocation16_spill] sm:$0xff] %v4507_v49  ;;  %v4531_v8 = vld [vmem:[%s5580_s3 + $0x2d8] sm:$0xff] }
 0x6da   :  { %v1065_v22 = vadd.f32 %v1064_v51, %v1042_v18  ;;  %v1090_v58 = vpop.f32.mrf.mxu0  ;;  %v4513_v51 = vld [vmem:[%s5580_s3 + $0x2f0] sm:$0xff]  ;;  %6103 = vst [vmem:[#allocation22_spill] sm:$0xff] %v4531_v8 }
 0x6db   :  { %v1113_v35 = vpop.f32.mrf.mxu1  ;;  %6100 = vst [vmem:[#allocation17_spill] sm:$0xff] %v4513_v51  ;;  %v4537_v18 = vld [vmem:[%s5580_s3 + $0x2d0] sm:$0xff] }
 0x6dc   :  { %v1088_v38 = vadd.f32 %v1087_v52, %v1065_v22  ;;  %v4434_v22 = vld [vmem:[%s5580_s3 + $0xd8] sm:$0xff]  ;;  %v4519_v52 = vld [vmem:[%s5580_s3 + $0x2e8] sm:$0xff]  ;;  %6104 = vst [vmem:[#allocation24_spill] sm:$0xff] %v4537_v18 }
 0x6dd   :  { %6101 = vst [vmem:[#allocation19_spill] sm:$0xff] %v4519_v52 }
 0x6de   :  { %v1111_v26 = vadd.f32 %v1110_v11, %v1088_v38  ;;  %v4428_v38 = vld [vmem:[%s5580_s3 + $0xe0] sm:$0xff]  ;;  %v4470_v11 = vld [vmem:[%s5580_s3 + $0xa8] sm:$0xff] }
 0x6df   :  { %v1044_v28 = vpop.f32.mrf.mxu2 }
 0x6e0   :  { %v1045_v5 = vadd.f32 %v1044_v28, %v1022_v4  ;;  %v1067_v56 = vpop.f32.mrf.mxu3  ;;  %v4464_v4 = vld [vmem:[%s5580_s3 + $0xb0] sm:$0xff]  ;;  %v4543_v28 = vld [vmem:[%s5580_s3 + $0x2c8] sm:$0xff] }
 0x6e1   :  { %6105 = vst [vmem:[#allocation26_spill] sm:$0xff] %v4543_v28 }
 0x6e2   :  { %v1068_v1 = vadd.f32 %v1067_v56, %v1045_v5  ;;  %v4452_v5 = vld [vmem:[%s5580_s3 + $0xc0] sm:$0xff]  ;;  %v4458_v56 = vld [vmem:[%s5580_s3 + $0xb8] sm:$0xff] }
 0x6e4   :  { %v1091_v12 = vadd.f32 %v1090_v58, %v1068_v1  ;;  %v4440_v58 = vld [vmem:[%s5580_s3 + $0xd0] sm:$0xff]  ;;  %v4446_v1 = vld [vmem:[%s5580_s3 + $0xc8] sm:$0xff] }
 0x6e6   :  { %v1114_v23 = vadd.f32 %v1113_v35, %v1091_v12  ;;  %v4410_v12 = vld [vmem:[%s5580_s3 + $0xf8] sm:$0xff]  ;;  %v4422_v35 = vld [vmem:[%s5580_s3 + $0xe8] sm:$0xff] }
 0x6e8   :  { %v1179_v15 = vpop.f32.mrf.mxu3  ;;  %1130 = vmatpush.msrb.mxu2 %v1114_v23  ;;  %v4549_v23 = vld [vmem:[%s5580_s3 + $0x2c0] sm:$0xff] }
 0x6e9   :  { %v4397_v31 = vadd.f32 %v1179_v15, %v3969_v39  ;;  %v4416_v39 = vld [vmem:[%s5580_s3 + $0xf0] sm:$0xff]  ;;  %6106 = vst [vmem:[#allocation28_spill] sm:$0xff] %v4549_v23  ;;  %v4555_v15 = vld [vmem:[%s5580_s3 + $0x2b8] sm:$0xff] }
 0x6ea   :  { %1131 = vmatpush.msrb.mxu2 %v1111_v26  ;;  %6107 = vst [vmem:[#allocation30_spill] sm:$0xff] %v4555_v15  ;;  %v4561_v26 = vld [vmem:[%s5580_s3 + $0x2b0] sm:$0xff] }
 0x6eb   :  { %1203 = vrot.lane.b32.xlu1 %v4397_v31, %s2767_s30  ;;  %2400 = vmatmul.msk.f32.vlgmr.msrb.gmra.mxu2 %vm455_vm2, %v3976_v54  ;;  %6108 = vst [vmem:[#allocation33_spill] sm:$0xff] %v4561_v26 }
 0x6ec   :  { %1152 = vmatpush.msra.mxu2 %v3981_v14 }
 0x6ee   :  { %1153 = vmatpush.msra.mxu2 %v3985_v29 }
 0x6f0   :  { %1154 = vmatpush.msra.mxu2 %v3989_v37 }
 0x6f2   :  { %1155 = vmatpush.msra.mxu2 %v3993_v0 }
 0x6f4   :  { %1296 = vmatpush.msrb.mxu2 %v4410_v12 }
 0x6f6   :  { %1297 = vmatpush.msrb.mxu2 %v4416_v39 }
 0x6f8   :  { %1298 = vmatpush.msrb.mxu2 %v4422_v35 }
 0x6fa   :  { %1299 = vmatpush.msrb.mxu2 %v4428_v38 }
 0x6fc   :  { %1300 = vmatpush.msrb.mxu2 %v4434_v22 }
 0x6fe   :  { %1301 = vmatpush.msrb.mxu2 %v4440_v58 }
 0x700   :  { %1302 = vmatpush.msrb.mxu2 %v4446_v1 }
 0x702   :  { %1303 = vmatpush.msrb.mxu2 %v4452_v5 }
 0x704   :  { %1304 = vmatpush.msrb.mxu2 %v4458_v56 }
 0x706   :  { %1305 = vmatpush.msrb.mxu2 %v4464_v4 }
 0x708   :  { %1306 = vmatpush.msrb.mxu2 %v4470_v11 }
 0x70a   :  { %1307 = vmatpush.msrb.mxu2 %v4476_v19 }
 0x70c   :  { %1308 = vmatpush.msrb.mxu2 %v4482_v30 }
 0x70e   :  { %1309 = vmatpush.msrb.mxu2 %v4488_v33 }
 0x710   :  { %1310 = vmatpush.msrb.mxu2 %v4494_v36 }
 0x712   :  { %1311 = vmatpush.msrb.mxu2 %v4500_v41 }
 0x76e   :  { %v1133_v42 = vpop.f32.mrf.mxu2 }
 0x76f   :  { %v1136_v44 = vmax.f32 %v1133_v42, 0.0  ;;  %v4567_v42 = vld [vmem:[%s5580_s3 + $0x2a8] sm:$0xff] }
 0x770   :  { %6109 = vst [vmem:[#allocation36_spill] sm:$0xff] %v4567_v42 }
 0x771   :  { %2401 = vmatmul.msk.f32.vlgmr.msra.gmra.mxu2 %vm263_vm1, %v1136_v44  ;;  %v4573_v44 = vld [vmem:[%s5580_s3 + $0x2a0] sm:$0xff] }
 0x772   :  { %1388 = vmatpush.msra.mxu2 %v4507_v49  ;;  %6110 = vst [vmem:[#allocation39_spill] sm:$0xff] %v4573_v44 }
 0x774   :  { %1389 = vmatpush.msra.mxu2 %v4513_v51 }
 0x776   :  { %1390 = vmatpush.msra.mxu2 %v4519_v52 }
 0x778   :  { %1391 = vmatpush.msra.mxu2 %v4525_v57 }
 0x77a   :  { %1392 = vmatpush.msra.mxu2 %v4531_v8 }
 0x77c   :  { %1393 = vmatpush.msra.mxu2 %v4537_v18 }
 0x77e   :  { %1394 = vmatpush.msra.mxu2 %v4543_v28 }
 0x780   :  { %1395 = vmatpush.msra.mxu2 %v4549_v23 }
 0x782   :  { %1396 = vmatpush.msra.mxu2 %v4555_v15  ;;  %v4579_v15 = vld [vmem:[%s5580_s3 + $0x298] sm:$0xff] }
 0x783   :  { %6111 = vst [vmem:[#allocation42_spill] sm:$0xff] %v4579_v15 }
 0x784   :  { %1397 = vmatpush.msra.mxu2 %v4561_v26  ;;  %v4585_v26 = vld [vmem:[%s5580_s3 + $0x290] sm:$0xff] }
 0x785   :  { %6112 = vst [vmem:[#allocation45_spill] sm:$0xff] %v4585_v26 }
 0x786   :  { %1398 = vmatpush.msra.mxu2 %v4567_v42  ;;  %v4591_v42 = vld [vmem:[%s5580_s3 + $0x288] sm:$0xff] }
 0x787   :  { %6113 = vst [vmem:[#allocation48_spill] sm:$0xff] %v4591_v42 }
 0x788   :  { %1399 = vmatpush.msra.mxu2 %v4573_v44  ;;  %v4597_v44 = vld [vmem:[%s5580_s3 + $0x280] sm:$0xff] }
 0x789   :  { %6114 = vst [vmem:[#allocation52_spill] sm:$0xff] %v4597_v44 }
 0x78a   :  { %1400 = vmatpush.msra.mxu2 %v4579_v15 }
 0x78c   :  { %1401 = vmatpush.msra.mxu2 %v4585_v26 }
 0x78e   :  { %1402 = vmatpush.msra.mxu2 %v4591_v42 }
 0x790   :  { %1403 = vmatpush.msra.mxu2 %v4597_v44 }
 0x7f4   :  { %v1157_v15 = vpop.f32.mrf.mxu2 }
 0x7f5   :  { %v1158_v23 = vadd.f32 %v1157_v15, %v4032_v62  ;;  %v1204_v62 = vpop.permute.xlu1 %1203 }
 0x7f7   :  { %v1182_v28 = vadd.f32 %v4397_v31, %v1158_v23 }
 0x7f9   :  { %v2403_v26 = vmul.f32 -1.442695, %v1182_v28 }
 0x7fb   :  { %2475 = vpow2.f32 %v2403_v26 }
 0x801   :  { %v2476_v18 = vpop.eup %2475 }
 0x802   :  { %v1186_v8 = vadd.f32 1.0, %v2476_v18 }
 0x804   :  { %2477 = vrcp.f32 %v1186_v8  ;;  %v1198_v51 = vand.u32 2147483648, %v1186_v8  ;;  %v1196_v41 = vand.u32 2147483647, %v1186_v8  ;;  %vm1192_vm10 = vweird.f32 %v1186_v8 }
 0x806   :  { %v1199_v44 = vor.u32 1.1754944e-38, %v1198_v51  ;;  %vm1197_vm12 = vcmp.eq.f32.partialorder %v1196_v41, 8.507059e+37 }
 0x80a   :  { %v2478_v57 = vpop.eup %2477 }
 0x80b   :  { %v1188_v52 = vmul.f32 %v2478_v57, %v1186_v8  ;;  %vm1193_vm9 = vweird.f32 %v2478_v57 }
 0x80c   :  { %vm1194_vm11 = vmor %vm1192_vm10, %vm1193_vm9 }
 0x80d   :  { %v1189_v42 = vsub.f32 1.0, %v1188_v52 }
 0x80f   :  { %v1190_v49 = vmul.f32 %v2478_v57, %v1189_v42 }
 0x811   :  { %v1191_v36 = vadd.f32 %v2478_v57, %v1190_v49 }
 0x813   :  { %v1195_v33 = vsel %vm1194_vm11, %v2478_v57, %v1191_v36 }
 0x814   :  { %v1200_v31 = vsel %vm1197_vm12, %v1199_v44, %v1195_v33  ;;  %v4631_v44 = vld [vmem:[%s5580_s3 + $0x1f0] sm:$0xff] }
 0x815   :  { %v1206_v28 = vmul.f32 %v1204_v62, %v1200_v31  ;;  %v1213_v52 = vsub.f32 1.0, %v1200_v31  ;;  %v1219_v49 = vmul.f32 %v1200_v31, %v4039_v50  ;;  %v4637_v62 = vld [vmem:[%s5580_s3 + $0x1e8] sm:$0xff]  ;;  %v4643_v31 = vld [vmem:[%s5580_s3 + $0x1e0] sm:$0xff] }
 0x817   :  { %1208 = vrot.lane.b32.xlu2 %v1206_v28, %s2767_s30  ;;  %v4651_v28 = vld [vmem:[%s5580_s3 + $0x1d8] sm:$0xff] }
 0x871   :  { %v1209_v18 = vpop.permute.xlu2 %1208 }
 0x872   :  { %v1211_v15 = vadd.f32 %v1209_v18, %v1158_v23  ;;  %v4625_v23 = vld [vmem:[%s5580_s3 + $0x1f8] sm:$0xff]  ;;  %v4657_v18 = vld [vmem:[%s5580_s3 + $0x1d0] sm:$0xff] }
 0x874   :  { %2479 = vtanh.f32 %v1211_v15  ;;  %v4663_v15 = vld [vmem:[%s5580_s3 + $0x1c8] sm:$0xff] }
 0x87a   :  { %v2480_v26 = vpop.eup %2479 }
 0x87b   :  { %1215 = vrot.lane.b32.xlu0 %v2480_v26, %s2766_s23  ;;  %v4669_v26 = vld [vmem:[%s5580_s3 + $0x1c0] sm:$0xff] }
 0x8ed   :  { %v1216_v42 = vpop.permute.xlu0 %1215 }
 0x8ee   :  { %v1218_v8 = vmul.f32 %v1216_v42, %v1213_v52  ;;  %v4675_v52 = vld [vmem:[%s5580_s3 + $0x1b8] sm:$0xff]  ;;  %v4681_v42 = vld [vmem:[%s5580_s3 + $0x1b0] sm:$0xff] }
 0x8f0   :  { %v4605_v30 = vadd.f32 %v1219_v49, %v1218_v8  ;;  %v4687_v49 = vld [vmem:[%s5580_s3 + $0x1a8] sm:$0xff]  ;;  %v4693_v8 = vld [vmem:[%s5580_s3 + $0x1a0] sm:$0xff] }
 0x8f1   :  { %6115 = vst [vmem:[#allocation66_spill] sm:$0xff] %v4687_v49 }
 0x8f2   :  { %1228 = vrot.lane.b32.xlu0 %v4605_v30, %s2767_s30  ;;  %1225 = vrot.lane.b32.xlu2 %v4605_v30, %s2768_s7  ;;  %6116 = vst [vmem:[#allocation70_spill] sm:$0xff] %v4693_v8 }
 0x8f3   :  { %1222 = vrot.lane.b32.xlu1 %v4605_v30, %s2766_s23 }
 0x94c   :  { %v1226_v36 = vpop.permute.xlu2 %1225 }
 0x964   :  { %v1229_v50 = vpop.permute.xlu0 %1228 }
 0x965   :  { %v4613_v33 = vpop.permute.xlu1 %1222 }
 0x966   :  { %v1231_v41 = vsel %vm263_vm1, %v4613_v33, %v4605_v30 }
 0x967   :  { %v1232_v51 = vsel %vm491_vm3, %v1231_v41, %v1226_v36  ;;  %v4699_v36 = vld [vmem:[%s5580_s3 + $0x198] sm:$0xff]  ;;  %v4705_v41 = vld [vmem:[%s5580_s3 + $0x190] sm:$0xff] }
 0x968   :  { %v1233_v57 = vsel %vm493_vm4, %v1232_v51, %v1229_v50  ;;  %6117 = vst [vmem:[#allocation74_spill] sm:$0xff] %v4699_v36  ;;  %v4711_v50 = vld [vmem:[%s5580_s3 + $0x188] sm:$0xff]  ;;  %v4717_v51 = vld [vmem:[%s5580_s3 + $0x180] sm:$0xff] }
 0x969   :  { %1249 = vmatpush.msra.mxu0 %v1233_v57  ;;  %6118 = vst [vmem:[#allocation78_spill] sm:$0xff] %v4705_v41  ;;  %v4723_v57 = vld [vmem:[%s5580_s3 + $0x3f8] sm:$0xff] }
 0x96a   :  { %2404 = vmatmul.msk.f32.vlgmr.msra.gmra.mxu0 %vm182_vm0, %v6023_v9  ;;  %6119 = vst [vmem:[#allocation82_spill] sm:$0xff] %v4711_v50 }
 0x96b   :  { %1342 = vmatpush.msrb.mxu0 %v4625_v23  ;;  %6120 = vst [vmem:[#allocation86_spill] sm:$0xff] %v4717_v51 }
 0x96c   :  { %6121 = vst [vmem:[#allocation90_spill] sm:$0xff] %v4723_v57 }
 0x96d   :  { %1343 = vmatpush.msrb.mxu0 %v4631_v44 }
 0x96f   :  { %1344 = vmatpush.msrb.mxu0 %v4637_v62 }
 0x971   :  { %1345 = vmatpush.msrb.mxu0 %v4643_v31 }
 0x972   :  { %2405 = vmatmul.msk.f32.gmra.mxu0 %vm182_vm0, %v6028_v21 }
 0x973   :  { %1346 = vmatpush.msrb.mxu0 %v4651_v28 }
 0x975   :  { %1347 = vmatpush.msrb.mxu0 %v4657_v18 }
 0x977   :  { %1348 = vmatpush.msrb.mxu0 %v4663_v15 }
 0x979   :  { %1349 = vmatpush.msrb.mxu0 %v4669_v26 }
 0x97b   :  { %1350 = vmatpush.msrb.mxu0 %v4675_v52 }
 0x97d   :  { %1351 = vmatpush.msrb.mxu0 %v4681_v42 }
 0x97f   :  { %1352 = vmatpush.msrb.mxu0 %v4687_v49 }
 0x981   :  { %1353 = vmatpush.msrb.mxu0 %v4693_v8 }
 0x983   :  { %1354 = vmatpush.msrb.mxu0 %v4699_v36 }
 0x985   :  { %1355 = vmatpush.msrb.mxu0 %v4705_v41  ;;  %v4729_v41 = vld [vmem:[%s5580_s3 + $0x3f0] sm:$0xff] }
 0x986   :  { %6122 = vst [vmem:[#allocation94_spill] sm:$0xff] %v4729_v41 }
 0x987   :  { %1356 = vmatpush.msrb.mxu0 %v4711_v50  ;;  %v4735_v50 = vld [vmem:[%s5580_s3 + $0x3e8] sm:$0xff] }
 0x988   :  { %6123 = vst [vmem:[#allocation98_spill] sm:$0xff] %v4735_v50 }
 0x989   :  { %1357 = vmatpush.msrb.mxu0 %v4717_v51  ;;  %v4741_v51 = vld [vmem:[%s5580_s3 + $0x3e0] sm:$0xff] }
 0x98a   :  { %6124 = vst [vmem:[#allocation102_spill] sm:$0xff] %v4741_v51 }
 0x98b   :  { %1434 = vmatpush.msra.mxu0 %v4723_v57  ;;  %v4747_v57 = vld [vmem:[%s5580_s3 + $0x3d8] sm:$0xff] }
 0x98c   :  { %6125 = vst [vmem:[#allocation18_spill] sm:$0xff] %v4747_v57 }
 0x98d   :  { %1435 = vmatpush.msra.mxu0 %v4729_v41  ;;  %v4753_v41 = vld [vmem:[%s5580_s3 + $0x3d0] sm:$0xff] }
 0x98e   :  { %6126 = vst [vmem:[#allocation21_spill] sm:$0xff] %v4753_v41 }
 0x98f   :  { %1436 = vmatpush.msra.mxu0 %v4735_v50  ;;  %v4759_v50 = vld [vmem:[%s5580_s3 + $0x3c8] sm:$0xff] }
 0x990   :  { %6127 = vst [vmem:[#allocation23_spill] sm:$0xff] %v4759_v50 }
 0x991   :  { %1437 = vmatpush.msra.mxu0 %v4741_v51  ;;  %v4765_v51 = vld [vmem:[%s5580_s3 + $0x3c0] sm:$0xff] }
 0x992   :  { %6128 = vst [vmem:[#allocation25_spill] sm:$0xff] %v4765_v51 }
 0x993   :  { %1438 = vmatpush.msra.mxu0 %v4747_v57  ;;  %v4771_v57 = vld [vmem:[%s5580_s3 + $0x3b8] sm:$0xff] }
 0x994   :  { %6129 = vst [vmem:[#allocation27_spill] sm:$0xff] %v4771_v57 }
 0x995   :  { %1439 = vmatpush.msra.mxu0 %v4753_v41  ;;  %v4777_v41 = vld [vmem:[%s5580_s3 + $0x3b0] sm:$0xff] }
 0x996   :  { %6130 = vst [vmem:[#allocation29_spill] sm:$0xff] %v4777_v41 }
 0x997   :  { %1440 = vmatpush.msra.mxu0 %v4759_v50  ;;  %v4783_v50 = vld [vmem:[%s5580_s3 + $0x3a8] sm:$0xff] }
 0x998   :  { %6131 = vst [vmem:[#allocation31_spill] sm:$0xff] %v4783_v50 }
 0x999   :  { %1441 = vmatpush.msra.mxu0 %v4765_v51  ;;  %v4789_v51 = vld [vmem:[%s5580_s3 + $0x3a0] sm:$0xff] }
 0x99a   :  { %6132 = vst [vmem:[#allocation32_spill] sm:$0xff] %v4789_v51 }
 0x99b   :  { %1442 = vmatpush.msra.mxu0 %v4771_v57  ;;  %v4795_v57 = vld [vmem:[%s5580_s3 + $0x398] sm:$0xff] }
 0x99c   :  { %6133 = vst [vmem:[#allocation35_spill] sm:$0xff] %v4795_v57 }
 0x99d   :  { %1443 = vmatpush.msra.mxu0 %v4777_v41  ;;  %v4801_v41 = vld [vmem:[%s5580_s3 + $0x390] sm:$0xff] }
 0x99e   :  { %6134 = vst [vmem:[#allocation38_spill] sm:$0xff] %v4801_v41 }
 0x99f   :  { %1444 = vmatpush.msra.mxu0 %v4783_v50  ;;  %v4807_v50 = vld [vmem:[%s5580_s3 + $0x388] sm:$0xff] }
 0x9a1   :  { %1445 = vmatpush.msra.mxu0 %v4789_v51  ;;  %v4813_v51 = vld [vmem:[%s5580_s3 + $0x380] sm:$0xff] }
 0x9a2   :  { %6135 = vst [vmem:[#allocation41_spill] sm:$0xff] %v4813_v51 }
 0x9a3   :  { %1446 = vmatpush.msra.mxu0 %v4795_v57 }
 0x9a5   :  { %1447 = vmatpush.msra.mxu0 %v4801_v41 }
 0x9a7   :  { %1448 = vmatpush.msra.mxu0 %v4807_v50 }
 0x9a9   :  { %1449 = vmatpush.msra.mxu0 %v4813_v51 }
 0x9e7   :  { %v1251_v57 = vpop.f32.mrf.mxu0 }
 0x9e8   :  { %v1257_v36 = vmul.f32 %v1251_v57, %v6057_v7  ;;  %v1258_v8 = vmul.f32 %v1251_v57, %v6058_v17  ;;  %v1259_v41 = vmul.f32 %v1251_v57, %v3818_v27  ;;  %v1260_v49 = vmul.f32 %v1251_v57, %v6059_v13 }
 0x9ea   :  { %1289 = vmatmul.f32.vlgmr.msra.gmra.mxu1 %v1257_v36  ;;  %1312 = vmatmul.f32.vlgmr.msrb.gmra.mxu2 %v1258_v8 }
 0x9eb   :  { %1335 = vmatmul.f32.vlgmr.msrb.gmra.mxu3 %v1259_v41  ;;  %1358 = vmatmul.f32.vlgmr.msrb.gmra.mxu0 %v1260_v49  ;;  %v6136_v49 = vld [vmem:[#allocation118_spill] sm:$0xff] }
 0x9ec   :  { %1515 = vmatpush.msrb.mxu2 %v3820_v43  ;;  %1614 = vmatpush.msrb.mxu0 %v4098_v53  ;;  %v1261_v53 = vmul.f32 %v1251_v57, %v3859_v2  ;;  %v1263_v41 = vmul.f32 %v1251_v57, %v6136_v49 }
 0x9ee   :  { %1516 = vmatpush.msrb.mxu2 %v3826_v20  ;;  %1615 = vmatpush.msrb.mxu0 %v4105_v61  ;;  %v1262_v61 = vmul.f32 %v1251_v57, %v3862_v34 }
 0x9ef   :  { %v1254_v51 = vpop.f32.mrf.mxu0 }
 0x9f0   :  { %1517 = vmatpush.msrb.mxu2 %v3829_v40  ;;  %v1265_v17 = vmul.f32 %v1254_v51, %v3833_v10  ;;  %v1266_v27 = vmul.f32 %v1254_v51, %v3838_v55  ;;  %v1267_v36 = vmul.f32 %v1254_v51, %v3840_v24  ;;  %v1268_v8 = vmul.f32 %v1254_v51, %v3835_v6 }
 0x9f1   :  { %1616 = vmatpush.msrb.mxu0 %v4116_v3  ;;  %v1264_v3 = vmul.f32 %v1251_v57, %v3865_v45  ;;  %v1272_v57 = vmul.f32 %v1254_v51, %v3884_v60 }
 0x9f2   :  { %1518 = vmatpush.msrb.mxu2 %v3844_v32  ;;  %1292 = vmatmul.f32.gmra.mxu1 %v1265_v17  ;;  %v6138_v17 = vld [vmem:[#allocation34_spill] sm:$0xff] }
 0x9f3   :  { %1315 = vmatmul.f32.gmra.mxu2 %v1266_v27  ;;  %1338 = vmatmul.f32.gmra.mxu3 %v1267_v36  ;;  %v6137_v27 = vld [vmem:[#allocation51_spill] sm:$0xff] }
 0x9f4   :  { %1361 = vmatmul.f32.gmra.mxu0 %v1268_v8  ;;  %v6141_v8 = vld [vmem:[#allocation122_spill] sm:$0xff] }
 0x9f5   :  { %1617 = vmatpush.msrb.mxu0 %v4123_v59  ;;  %v6139_v59 = vld [vmem:[#allocation65_spill] sm:$0xff] }
 0x9f7   :  { %1618 = vmatpush.msrb.mxu0 %v4129_v25  ;;  %v6140_v25 = vld [vmem:[#allocation119_spill] sm:$0xff] }
 0x9f8   :  { %v1269_v36 = vmul.f32 %v1254_v51, %v6140_v25 }
 0x9f9   :  { %1619 = vmatpush.msrb.mxu0 %v4138_v63  ;;  %v1270_v63 = vmul.f32 %v1254_v51, %v3880_v46 }
 0x9fa   :  { %1381 = vmatmul.f32.vlgmr.msrb.gmra.mxu1 %v1261_v53  ;;  %v1271_v53 = vmul.f32 %v1254_v51, %v6141_v8  ;;  %v6150_v51 = vld [vmem:[#allocation49_spill] sm:$0xff] }
 0x9fb   :  { %1404 = vmatmul.f32.vlgmr.msra.gmra.mxu2 %v1262_v61  ;;  %1427 = vmatmul.f32.vlgmr.msra.gmra.mxu3 %v1263_v41  ;;  %v6143_v61 = vld [vmem:[#allocation69_spill] sm:$0xff]  ;;  %v6144_v41 = vld [vmem:[#allocation40_spill] sm:$0xff] }
 0x9fc   :  { %1450 = vmatmul.f32.vlgmr.msra.gmra.mxu0 %v1264_v3  ;;  %1660 = vmatpush.msra.mxu2 %v4145_v47  ;;  %v6142_v47 = vld [vmem:[#allocation37_spill] sm:$0xff] }
 0x9fd   :  { %1620 = vmatpush.msrb.mxu0 %v6137_v27  ;;  %v6145_v3 = vld [vmem:[#allocation73_spill] sm:$0xff] }
 0x9fe   :  { %1661 = vmatpush.msra.mxu2 %v6138_v17  ;;  %v6147_v27 = vld [vmem:[#allocation77_spill] sm:$0xff]  ;;  %v6148_v17 = vld [vmem:[#allocation46_spill] sm:$0xff] }
 0x9ff   :  { %1621 = vmatpush.msrb.mxu0 %v6139_v59  ;;  %v6151_v59 = vld [vmem:[#allocation85_spill] sm:$0xff] }
 0xa00   :  { %1662 = vmatpush.msra.mxu2 %v4170_v48  ;;  %v6146_v48 = vld [vmem:[#allocation43_spill] sm:$0xff] }
 0xa01   :  { %1622 = vmatpush.msrb.mxu0 %v4178_v16  ;;  %v6149_v16 = vld [vmem:[#allocation81_spill] sm:$0xff] }
 0xa02   :  { %1384 = vmatmul.f32.gmra.mxu1 %v1269_v36  ;;  %1663 = vmatpush.msra.mxu2 %v6142_v47  ;;  %v6152_v36 = vld [vmem:[#allocation53_spill] sm:$0xff]  ;;  %v6156_v47 = vld [vmem:[#allocation71_spill] sm:$0xff] }
 0xa03   :  { %1407 = vmatmul.f32.gmra.mxu2 %v1270_v63  ;;  %1430 = vmatmul.f32.gmra.mxu3 %v1271_v53  ;;  %v6153_v63 = vld [vmem:[#allocation89_spill] sm:$0xff]  ;;  %v6154_v53 = vld [vmem:[#allocation67_spill] sm:$0xff] }
 0xa04   :  { %1453 = vmatmul.f32.gmra.mxu0 %v1272_v57  ;;  %1664 = vmatpush.msra.mxu2 %v6143_v61  ;;  %v6155_v57 = vld [vmem:[#allocation93_spill] sm:$0xff] }
 0xa05   :  { %1623 = vmatpush.msrb.mxu0 %v6144_v41  ;;  %v6157_v61 = vld [vmem:[#allocation97_spill] sm:$0xff]  ;;  %v6158_v41 = vld [vmem:[#allocation75_spill] sm:$0xff] }
 0xa06   :  { %1665 = vmatpush.msra.mxu2 %v6145_v3  ;;  %v6159_v3 = vld [vmem:[#allocation101_spill] sm:$0xff] }
 0xa07   :  { %1624 = vmatpush.msrb.mxu0 %v6146_v48  ;;  %v6161_v48 = vld [vmem:[#allocation83_spill] sm:$0xff] }
 0xa08   :  { %1666 = vmatpush.msra.mxu2 %v6147_v27  ;;  %v6162_v27 = vld [vmem:[#allocation87_spill] sm:$0xff] }
 0xa09   :  { %1625 = vmatpush.msrb.mxu0 %v6148_v17  ;;  %v6163_v17 = vld [vmem:[#allocation91_spill] sm:$0xff] }
 0xa0a   :  { %1667 = vmatpush.msra.mxu2 %v6149_v16  ;;  %v6164_v16 = vld [vmem:[#allocation95_spill] sm:$0xff] }
 0xa0b   :  { %2408 = vmatmul.msk.f32.vlgmr.msrb.gmra.mxu2 %vm263_vm1, %v4613_v33  ;;  %1626 = vmatpush.msrb.mxu0 %v6150_v51  ;;  %v6160_v33 = vld [vmem:[#allocation79_spill] sm:$0xff] }
 0xa0c   :  { %1668 = vmatpush.msra.mxu2 %v6151_v59  ;;  %v6165_v51 = vld [vmem:[#allocation99_spill] sm:$0xff] }
 0xa0d   :  { %1627 = vmatpush.msrb.mxu0 %v6152_v36  ;;  %v6166_v59 = vld [vmem:[#allocation103_spill] sm:$0xff]  ;;  %v6167_v36 = vld [vmem:[#allocation6_spill] sm:$0xff] }
 0xa0e   :  { %1669 = vmatpush.msra.mxu2 %v6153_v63  ;;  %v6168_v63 = vld [vmem:[#allocation7_spill] sm:$0xff] }
 0xa0f   :  { %1628 = vmatpush.msrb.mxu0 %v6154_v53  ;;  %v6169_v53 = vld [vmem:[#allocation9_spill] sm:$0xff] }
 0xa10   :  { %1670 = vmatpush.msra.mxu2 %v6155_v57  ;;  %v4881_v57 = vld [vmem:[%s5580_s3 + $0x248] sm:$0xff] }
 0xa11   :  { %1629 = vmatpush.msrb.mxu0 %v6156_v47  ;;  %6170 = vst [vmem:[#allocation44_spill] sm:$0xff] %v4881_v57  ;;  %v6171_v47 = vld [vmem:[#allocation5_spill] sm:$0xff] }
 0xa12   :  { %1671 = vmatpush.msra.mxu2 %v6157_v61  ;;  %v4888_v61 = vld [vmem:[%s5580_s3 + $0x240] sm:$0xff] }
 0xa13   :  { %1706 = vmatpush.msra.mxu0 %v6158_v41  ;;  %6172 = vst [vmem:[#allocation47_spill] sm:$0xff] %v4888_v61  ;;  %v6173_v41 = vld [vmem:[#allocation10_spill] sm:$0xff] }
 0xa14   :  { %1672 = vmatpush.msra.mxu2 %v6159_v3  ;;  %v4895_v3 = vld [vmem:[%s5580_s3 + $0x238] sm:$0xff] }
 0xa15   :  { %1707 = vmatpush.msra.mxu0 %v6160_v33  ;;  %6174 = vst [vmem:[#allocation50_spill] sm:$0xff] %v4895_v3  ;;  %v6175_v33 = vld [vmem:[#allocation8_spill] sm:$0xff] }
 0xa16   :  { %1673 = vmatpush.msra.mxu2 %v6161_v48  ;;  %v4902_v48 = vld [vmem:[%s5580_s3 + $0x230] sm:$0xff] }
 0xa17   :  { %1708 = vmatpush.msra.mxu0 %v6162_v27  ;;  %6176 = vst [vmem:[#allocation54_spill] sm:$0xff] %v4902_v48  ;;  %v6177_v27 = vld [vmem:[#allocation11_spill] sm:$0xff] }
 0xa18   :  { %1674 = vmatpush.msra.mxu2 %v6163_v17  ;;  %v4909_v17 = vld [vmem:[%s5580_s3 + $0x228] sm:$0xff] }
 0xa19   :  { %1709 = vmatpush.msra.mxu0 %v6164_v16  ;;  %6178 = vst [vmem:[#allocation55_spill] sm:$0xff] %v4909_v17  ;;  %v4915_v16 = vld [vmem:[%s5580_s3 + $0x348] sm:$0xff] }
 0xa1a   :  { %1675 = vmatpush.msra.mxu2 %v6165_v51  ;;  %6179 = vst [vmem:[#allocation56_spill] sm:$0xff] %v4915_v16  ;;  %v4921_v51 = vld [vmem:[%s5580_s3 + $0x220] sm:$0xff] }
 0xa1b   :  { %1710 = vmatpush.msra.mxu0 %v6166_v59  ;;  %6180 = vst [vmem:[#allocation57_spill] sm:$0xff] %v4921_v51  ;;  %v4927_v59 = vld [vmem:[%s5580_s3 + $0x340] sm:$0xff] }
 0xa1c   :  { %1752 = vmatpush.msrb.mxu2 %v6167_v36  ;;  %6181 = vst [vmem:[#allocation58_spill] sm:$0xff] %v4927_v59  ;;  %v4933_v36 = vld [vmem:[%s5580_s3 + $0x218] sm:$0xff] }
 0xa1d   :  { %1711 = vmatpush.msra.mxu0 %v6168_v63  ;;  %6182 = vst [vmem:[#allocation59_spill] sm:$0xff] %v4933_v36  ;;  %v4939_v63 = vld [vmem:[%s5580_s3 + $0x338] sm:$0xff] }
 0xa1e   :  { %1753 = vmatpush.msrb.mxu2 %v6169_v53  ;;  %6183 = vst [vmem:[#allocation60_spill] sm:$0xff] %v4939_v63  ;;  %v4945_v53 = vld [vmem:[%s5580_s3 + $0x210] sm:$0xff] }
 0xa1f   :  { %1712 = vmatpush.msra.mxu0 %v4881_v57  ;;  %6184 = vst [vmem:[#allocation61_spill] sm:$0xff] %v4945_v53 }
 0xa20   :  { %1754 = vmatpush.msrb.mxu2 %v6171_v47  ;;  %v4951_v47 = vld [vmem:[%s5580_s3 + $0x330] sm:$0xff] }
 0xa21   :  { %1713 = vmatpush.msra.mxu0 %v4888_v61  ;;  %6185 = vst [vmem:[#allocation62_spill] sm:$0xff] %v4951_v47 }
 0xa22   :  { %1755 = vmatpush.msrb.mxu2 %v6173_v41  ;;  %v4957_v41 = vld [vmem:[%s5580_s3 + $0x208] sm:$0xff] }
 0xa23   :  { %1714 = vmatpush.msra.mxu0 %v4895_v3  ;;  %6186 = vst [vmem:[#allocation63_spill] sm:$0xff] %v4957_v41 }
 0xa24   :  { %1756 = vmatpush.msrb.mxu2 %v6175_v33  ;;  %v4963_v33 = vld [vmem:[%s5580_s3 + $0x328] sm:$0xff] }
 0xa25   :  { %1715 = vmatpush.msra.mxu0 %v4902_v48  ;;  %6187 = vst [vmem:[#allocation64_spill] sm:$0xff] %v4963_v33 }
 0xa26   :  { %1757 = vmatpush.msrb.mxu2 %v6177_v27  ;;  %v4969_v27 = vld [vmem:[%s5580_s3 + $0x200] sm:$0xff] }
 0xa27   :  { %1716 = vmatpush.msra.mxu0 %v4909_v17  ;;  %6188 = vst [vmem:[#allocation68_spill] sm:$0xff] %v4969_v27 }
 0xa28   :  { %1758 = vmatpush.msrb.mxu2 %v4915_v16 }
 0xa29   :  { %1717 = vmatpush.msra.mxu0 %v4921_v51 }
 0xa2a   :  { %1759 = vmatpush.msrb.mxu2 %v4927_v59 }
 0xa2b   :  { %1718 = vmatpush.msra.mxu0 %v4933_v36 }
 0xa2c   :  { %1760 = vmatpush.msrb.mxu2 %v4939_v63 }
 0xa2d   :  { %1719 = vmatpush.msra.mxu0 %v4945_v53 }
 0xa2e   :  { %1761 = vmatpush.msrb.mxu2 %v4951_v47  ;;  %v4975_v47 = vld [vmem:[%s5580_s3 + $0x320] sm:$0xff] }
 0xa2f   :  { %1720 = vmatpush.msra.mxu0 %v4957_v41  ;;  %6189 = vst [vmem:[#allocation72_spill] sm:$0xff] %v4975_v47  ;;  %v4981_v41 = vld [vmem:[%s5580_s3 + $0x318] sm:$0xff] }
 0xa30   :  { %1762 = vmatpush.msrb.mxu2 %v4963_v33  ;;  %6190 = vst [vmem:[#allocation76_spill] sm:$0xff] %v4981_v41  ;;  %v4987_v33 = vld [vmem:[%s5580_s3 + $0x310] sm:$0xff] }
 0xa31   :  { %1721 = vmatpush.msra.mxu0 %v4969_v27  ;;  %6191 = vst [vmem:[#allocation80_spill] sm:$0xff] %v4987_v33  ;;  %v4993_v27 = vld [vmem:[%s5580_s3 + $0x308] sm:$0xff] }
 0xa32   :  { %1763 = vmatpush.msrb.mxu2 %v4975_v47  ;;  %6192 = vst [vmem:[#allocation84_spill] sm:$0xff] %v4993_v27  ;;  %v4999_v47 = vld [vmem:[%s5580_s3 + $0x300] sm:$0xff] }
 0xa33   :  { %6193 = vst [vmem:[#allocation88_spill] sm:$0xff] %v4999_v47 }
 0xa34   :  { %1764 = vmatpush.msrb.mxu2 %v4981_v41 }
 0xa36   :  { %1765 = vmatpush.msrb.mxu2 %v4987_v33 }
 0xa38   :  { %1766 = vmatpush.msrb.mxu2 %v4993_v27 }
 0xa3a   :  { %1767 = vmatpush.msrb.mxu2 %v4999_v47 }
 0xa67   :  { %v1290_v41 = vpop.f32.mrf.mxu1 }
 0xa68   :  { %v1359_v53 = vpop.f32.mrf.mxu0 }
 0xa6d   :  { %v1313_v63 = vpop.f32.mrf.mxu2 }
 0xa6e   :  { %v1336_v36 = vpop.f32.mrf.mxu3  ;;  %v1314_v48 = vadd.f32 %v1313_v63, %v1290_v41 }
 0xa6f   :  { %v1293_v59 = vpop.f32.mrf.mxu1 }
 0xa70   :  { %v1337_v61 = vadd.f32 %v1336_v36, %v1314_v48 }
 0xa71   :  { %v1362_v33 = vpop.f32.mrf.mxu0 }
 0xa72   :  { %v1360_v46 = vadd.f32 %v1359_v53, %v1337_v61 }
 0xa76   :  { %v1316_v51 = vpop.f32.mrf.mxu2  ;;  %v1339_v16 = vpop.f32.mrf.mxu3 }
 0xa77   :  { %v1382_v17 = vpop.f32.mrf.mxu1  ;;  %v1317_v3 = vadd.f32 %v1316_v51, %v1293_v59 }
 0xa78   :  { %v1383_v45 = vadd.f32 %v1382_v17, %v1360_v46 }
 0xa79   :  { %v1340_v60 = vadd.f32 %v1339_v16, %v1317_v3  ;;  %v1451_v8 = vpop.f32.mrf.mxu0  ;;  %v5005_v3 = vld [vmem:[%s5578_s1 + $0x4] ss:$0 sm:$0xff] }
 0xa7b   :  { %v1363_v47 = vadd.f32 %v1362_v33, %v1340_v60  ;;  %v6201_v60 = vld [vmem:[#allocation20_spill] sm:$0xff] }
 0xa7e   :  { %v1405_v27 = vpop.f32.mrf.mxu2  ;;  %v1428_v57 = vpop.f32.mrf.mxu3 }
 0xa7f   :  { %v1385_v25 = vpop.f32.mrf.mxu1  ;;  %v1406_v49 = vadd.f32 %v1405_v27, %v1383_v45  ;;  %v6200_v45 = vld [vmem:[#allocation19_spill] sm:$0xff] }
 0xa80   :  { %v1386_v34 = vadd.f32 %v1385_v25, %v1363_v47  ;;  %v5051_v25 = vld [vmem:[%s5578_s1 + $0x3] ss:$0 sm:$0xff] }
 0xa81   :  { %v1429_v24 = vadd.f32 %v1428_v57, %v1406_v49  ;;  %v1454_v10 = vpop.f32.mrf.mxu0 }
 0xa83   :  { %v1452_v63 = vadd.f32 %v1451_v8, %v1429_v24 }
 0xa86   :  { %v1408_v2 = vpop.f32.mrf.mxu2  ;;  %v1431_v6 = vpop.f32.mrf.mxu3 }
 0xa87   :  { %v1409_v32 = vadd.f32 %v1408_v2, %v1386_v34  ;;  %v6198_v2 = vld [vmem:[#allocation16_spill] sm:$0xff]  ;;  %v6199_v34 = vld [vmem:[#allocation17_spill] sm:$0xff] }
 0xa89   :  { %v1432_v55 = vadd.f32 %v1431_v6, %v1409_v32  ;;  %v6196_v6 = vld [vmem:[#allocation14_spill] sm:$0xff] }
 0xa8b   :  { %v1455_v40 = vadd.f32 %v1454_v10, %v1432_v55  ;;  %v6194_v55 = vld [vmem:[#allocation12_spill] sm:$0xff]  ;;  %v6195_v10 = vld [vmem:[#allocation13_spill] sm:$0xff] }
 0xa8d   :  { %1471 = vmatpush.msra.mxu1 %v1455_v40  ;;  %v6197_v40 = vld [vmem:[#allocation15_spill] sm:$0xff] }
 0xa8e   :  { %v1520_v48 = vpop.f32.mrf.mxu2 }
 0xa8f   :  { %v1521_v46 = vadd.f32 %v5005_v3, %v1520_v48  ;;  %1472 = vmatpush.msra.mxu1 %v1452_v63 }
 0xa90   :  { %2406 = vmatmul.msk.f32.vlgmr.msra.gmra.mxu1 %vm455_vm2, %v3976_v54 }
 0xa91   :  { %1493 = vmatpush.msrb.mxu1 %v3981_v14  ;;  %1544 = vrot.lane.b32.xlu1 %v1521_v46, %s2767_s30 }
 0xa93   :  { %1494 = vmatpush.msrb.mxu1 %v3985_v29 }
 0xa95   :  { %1495 = vmatpush.msrb.mxu1 %v3989_v37 }
 0xa97   :  { %1496 = vmatpush.msrb.mxu1 %v3993_v0 }
 0xa99   :  { %1637 = vmatpush.msra.mxu1 %v4410_v12  ;;  %v6202_v12 = vld [vmem:[#allocation22_spill] sm:$0xff] }
 0xa9b   :  { %1638 = vmatpush.msra.mxu1 %v4416_v39  ;;  %v6203_v39 = vld [vmem:[#allocation24_spill] sm:$0xff] }
 0xa9d   :  { %1639 = vmatpush.msra.mxu1 %v4422_v35  ;;  %v6204_v35 = vld [vmem:[#allocation26_spill] sm:$0xff] }
 0xa9f   :  { %1640 = vmatpush.msra.mxu1 %v4428_v38  ;;  %v6205_v38 = vld [vmem:[#allocation28_spill] sm:$0xff] }
 0xaa1   :  { %1641 = vmatpush.msra.mxu1 %v4434_v22  ;;  %v6206_v22 = vld [vmem:[#allocation30_spill] sm:$0xff] }
 0xaa3   :  { %1642 = vmatpush.msra.mxu1 %v4440_v58  ;;  %v6207_v58 = vld [vmem:[#allocation33_spill] sm:$0xff] }
 0xaa5   :  { %1643 = vmatpush.msra.mxu1 %v4446_v1  ;;  %v6208_v1 = vld [vmem:[#allocation36_spill] sm:$0xff] }
 0xaa7   :  { %1644 = vmatpush.msra.mxu1 %v4452_v5  ;;  %v6209_v5 = vld [vmem:[#allocation39_spill] sm:$0xff] }
 0xaa9   :  { %1645 = vmatpush.msra.mxu1 %v4458_v56  ;;  %v6210_v56 = vld [vmem:[#allocation42_spill] sm:$0xff] }
 0xaab   :  { %1646 = vmatpush.msra.mxu1 %v4464_v4  ;;  %v6211_v4 = vld [vmem:[#allocation45_spill] sm:$0xff] }
 0xaad   :  { %1647 = vmatpush.msra.mxu1 %v4470_v11  ;;  %v6212_v11 = vld [vmem:[#allocation48_spill] sm:$0xff] }
 0xaaf   :  { %1648 = vmatpush.msra.mxu1 %v4476_v19  ;;  %v6213_v19 = vld [vmem:[#allocation52_spill] sm:$0xff] }
 0xab1   :  { %1649 = vmatpush.msra.mxu1 %v6194_v55 }
 0xab3   :  { %1650 = vmatpush.msra.mxu1 %v6195_v10 }
 0xab5   :  { %1651 = vmatpush.msra.mxu1 %v6196_v6 }
 0xab7   :  { %1652 = vmatpush.msra.mxu1 %v6197_v40 }
 0xb03   :  { %v1545_v48 = vpop.permute.xlu1 %1544 }
 0xb0d   :  { %v1474_v24 = vpop.f32.mrf.mxu1 }
 0xb0e   :  { %v1477_v32 = vmax.f32 %v1474_v24, 0.0 }
 0xb10   :  { %2407 = vmatmul.msk.f32.vlgmr.msrb.gmra.mxu1 %vm263_vm1, %v1477_v32 }
 0xb11   :  { %1729 = vmatpush.msrb.mxu1 %v6198_v2 }
 0xb13   :  { %1730 = vmatpush.msrb.mxu1 %v6199_v34 }
 0xb15   :  { %1731 = vmatpush.msrb.mxu1 %v6200_v45 }
 0xb17   :  { %1732 = vmatpush.msrb.mxu1 %v6201_v60 }
 0xb19   :  { %1733 = vmatpush.msrb.mxu1 %v6202_v12 }
 0xb1b   :  { %1734 = vmatpush.msrb.mxu1 %v6203_v39 }
 0xb1d   :  { %1735 = vmatpush.msrb.mxu1 %v6204_v35 }
 0xb1f   :  { %1736 = vmatpush.msrb.mxu1 %v6205_v38 }
 0xb21   :  { %1737 = vmatpush.msrb.mxu1 %v6206_v22  ;;  %v6218_v22 = vld [vmem:[#allocation82_spill] sm:$0xff] }
 0xb23   :  { %1738 = vmatpush.msrb.mxu1 %v6207_v58  ;;  %v6225_v58 = vld [vmem:[#allocation21_spill] sm:$0xff] }
 0xb25   :  { %1739 = vmatpush.msrb.mxu1 %v6208_v1  ;;  %v6226_v1 = vld [vmem:[#allocation23_spill] sm:$0xff] }
 0xb27   :  { %1740 = vmatpush.msrb.mxu1 %v6209_v5  ;;  %v6227_v5 = vld [vmem:[#allocation25_spill] sm:$0xff] }
 0xb29   :  { %1741 = vmatpush.msrb.mxu1 %v6210_v56  ;;  %v6228_v56 = vld [vmem:[#allocation27_spill] sm:$0xff] }
 0xb2b   :  { %1742 = vmatpush.msrb.mxu1 %v6211_v4  ;;  %v6229_v4 = vld [vmem:[#allocation29_spill] sm:$0xff] }
 0xb2d   :  { %1743 = vmatpush.msrb.mxu1 %v6212_v11  ;;  %v6230_v11 = vld [vmem:[#allocation31_spill] sm:$0xff] }
 0xb2f   :  { %1744 = vmatpush.msrb.mxu1 %v6213_v19  ;;  %v6231_v19 = vld [vmem:[#allocation32_spill] sm:$0xff] }
 0xb8d   :  { %v1498_v49 = vpop.f32.mrf.mxu1 }
 0xb8e   :  { %v1499_v8 = vadd.f32 %v5051_v25, %v1498_v49  ;;  %v6232_v49 = vld [vmem:[#allocation35_spill] sm:$0xff] }
 0xb90   :  { %v1523_v57 = vadd.f32 %v1521_v46, %v1499_v8 }
 0xb92   :  { %v2409_v61 = vmul.f32 -1.442695, %v1523_v57  ;;  %v6234_v57 = vld [vmem:[#allocation41_spill] sm:$0xff] }
 0xb94   :  { %2481 = vpow2.f32 %v2409_v61 }
 0xb9a   :  { %v2482_v17 = vpop.eup %2481 }
 0xb9b   :  { %v1527_v16 = vadd.f32 1.0, %v2482_v17 }
 0xb9d   :  { %2483 = vrcp.f32 %v1527_v16  ;;  %v1539_v53 = vand.u32 2147483648, %v1527_v16  ;;  %v1537_v41 = vand.u32 2147483647, %v1527_v16  ;;  %vm1533_vm14 = vweird.f32 %v1527_v16 }
 0xb9f   :  { %v1540_v27 = vor.u32 1.1754944e-38, %v1539_v53  ;;  %vm1538_vm5 = vcmp.eq.f32.partialorder %v1537_v41, 8.507059e+37 }
 0xba3   :  { %v2484_v51 = vpop.eup %2483 }
 0xba4   :  { %v1529_v59 = vmul.f32 %v2484_v51, %v1527_v16  ;;  %vm1534_vm13 = vweird.f32 %v2484_v51  ;;  %v6235_v16 = vld [vmem:[#allocation107_spill] sm:$0xff] }
 0xba5   :  { %vm1535_vm15 = vmor %vm1533_vm14, %vm1534_vm13 }
 0xba6   :  { %v1530_v36 = vsub.f32 1.0, %v1529_v59  ;;  %v6236_v59 = vld [vmem:[#allocation108_spill] sm:$0xff] }
 0xba8   :  { %v1531_v47 = vmul.f32 %v2484_v51, %v1530_v36 }
 0xbaa   :  { %v1532_v33 = vadd.f32 %v2484_v51, %v1531_v47  ;;  %v2631_v47 = vld [vmem:[%s5580_s3 + $0x70] sm:$0xff] }
 0xbac   :  { %v1536_v63 = vsel %vm1535_vm15, %v2484_v51, %v1532_v33  ;;  %v6237_v33 = vld [vmem:[#allocation109_spill] sm:$0xff] }
 0xbad   :  { %v1541_v46 = vsel %vm1538_vm5, %v1540_v27, %v1536_v63  ;;  %v6238_v27 = vld [vmem:[#allocation110_spill] sm:$0xff] }
 0xbae   :  { %v1547_v55 = vmul.f32 %v1545_v48, %v1541_v46  ;;  %v1554_v24 = vsub.f32 1.0, %v1541_v46  ;;  %v1560_v2 = vmul.f32 %v1541_v46, %v4605_v30  ;;  %v6239_v48 = vld [vmem:[#allocation112_spill] sm:$0xff] }
 0xbb0   :  { %1549 = vrot.lane.b32.xlu2 %v1547_v55, %s2767_s30  ;;  %v6240_v55 = vld [vmem:[#allocation113_spill] sm:$0xff] }
 0xc0a   :  { %v1550_v10 = vpop.permute.xlu2 %1549 }
 0xc0b   :  { %v1552_v6 = vadd.f32 %v1550_v10, %v1499_v8  ;;  %v6233_v8 = vld [vmem:[#allocation38_spill] sm:$0xff] }
 0xc0d   :  { %2485 = vtanh.f32 %v1552_v6  ;;  %v6241_v6 = vld [vmem:[#allocation111_spill] sm:$0xff] }
 0xc13   :  { %v2486_v40 = vpop.eup %2485 }
 0xc14   :  { %1556 = vrot.lane.b32.xlu0 %v2486_v40, %s2766_s23 }
 0xc86   :  { %v1557_v32 = vpop.permute.xlu0 %1556 }
 0xc87   :  { %v1559_v34 = vmul.f32 %v1557_v32, %v1554_v24  ;;  %v2632_v24 = vld [vmem:[%s5580_s3 + $0x68] sm:$0xff] }
 0xc88   :  { %v6242_v32 = vld [vmem:[#allocation114_spill] sm:$0xff] }
 0xc89   :  { %v5057_v45 = vadd.f32 %v1560_v2, %v1559_v34  ;;  %v2633_v2 = vld [vmem:[%s5580_s3 + $0x60] sm:$0xff]  ;;  %v2634_v34 = vld [vmem:[%s5580_s3 + $0x58] sm:$0xff] }
 0xc8b   :  { %1569 = vrot.lane.b32.xlu0 %v5057_v45, %s2767_s30  ;;  %1566 = vrot.lane.b32.xlu2 %v5057_v45, %s2768_s7 }
 0xc8c   :  { %1563 = vrot.lane.b32.xlu1 %v5057_v45, %s2766_s23 }
 0xce5   :  { %v1567_v12 = vpop.permute.xlu2 %1566 }
 0xcfd   :  { %v1570_v30 = vpop.permute.xlu0 %1569 }
 0xcfe   :  { %v5065_v60 = vpop.permute.xlu1 %1563 }
 0xcff   :  { %v1572_v39 = vsel %vm263_vm1, %v5065_v60, %v5057_v45 }
 0xd00   :  { %v1573_v35 = vsel %vm491_vm3, %v1572_v39, %v1567_v12  ;;  %v6243_v12 = vld [vmem:[#allocation115_spill] sm:$0xff] }
 0xd01   :  { %v1574_v38 = vsel %vm493_vm4, %v1573_v35, %v1570_v30  ;;  %v6244_v30 = vld [vmem:[#allocation116_spill] sm:$0xff] }
 0xd02   :  { %1590 = vmatpush.msrb.mxu3 %v1574_v38  ;;  %v6245_v38 = vld [vmem:[#allocation118_spill] sm:$0xff] }
 0xd03   :  { %2410 = vmatmul.msk.f32.vlgmr.msrb.gmra.mxu3 %vm182_vm0, %v6023_v9 }
 0xd04   :  { %1683 = vmatpush.msra.mxu3 %v4625_v23  ;;  %v6214_v23 = vld [vmem:[#allocation66_spill] sm:$0xff] }
 0xd06   :  { %1684 = vmatpush.msra.mxu3 %v4631_v44  ;;  %v6215_v44 = vld [vmem:[#allocation70_spill] sm:$0xff] }
 0xd08   :  { %1685 = vmatpush.msra.mxu3 %v4637_v62  ;;  %v6216_v62 = vld [vmem:[#allocation74_spill] sm:$0xff] }
 0xd0a   :  { %1686 = vmatpush.msra.mxu3 %v4643_v31  ;;  %v6217_v31 = vld [vmem:[#allocation78_spill] sm:$0xff] }
 0xd0b   :  { %2411 = vmatmul.msk.f32.gmra.mxu3 %vm182_vm0, %v6028_v21 }
 0xd0c   :  { %1687 = vmatpush.msra.mxu3 %v4651_v28  ;;  %v6219_v28 = vld [vmem:[#allocation86_spill] sm:$0xff] }
 0xd0e   :  { %1688 = vmatpush.msra.mxu3 %v4657_v18  ;;  %v6220_v18 = vld [vmem:[#allocation90_spill] sm:$0xff] }
 0xd10   :  { %1689 = vmatpush.msra.mxu3 %v4663_v15  ;;  %v6221_v15 = vld [vmem:[#allocation94_spill] sm:$0xff] }
 0xd12   :  { %1690 = vmatpush.msra.mxu3 %v4669_v26  ;;  %v6222_v26 = vld [vmem:[#allocation98_spill] sm:$0xff] }
 0xd14   :  { %1691 = vmatpush.msra.mxu3 %v4675_v52  ;;  %v6223_v52 = vld [vmem:[#allocation102_spill] sm:$0xff] }
 0xd16   :  { %1692 = vmatpush.msra.mxu3 %v4681_v42  ;;  %v6224_v42 = vld [vmem:[#allocation18_spill] sm:$0xff] }
 0xd18   :  { %1693 = vmatpush.msra.mxu3 %v6214_v23 }
 0xd1a   :  { %1694 = vmatpush.msra.mxu3 %v6215_v44  ;;  %v2635_v44 = vld [vmem:[%s5580_s3 + $0x50] sm:$0xff] }
 0xd1c   :  { %1695 = vmatpush.msra.mxu3 %v6216_v62  ;;  %v6246_v62 = vld [vmem:[#allocation117_spill] sm:$0xff] }
 0xd1e   :  { %1696 = vmatpush.msra.mxu3 %v6217_v31 }
 0xd20   :  { %1697 = vmatpush.msra.mxu3 %v6218_v22  ;;  %v2636_v22 = vld [vmem:[%s5580_s3 + $0x178] sm:$0xff] }
 0xd22   :  { %1698 = vmatpush.msra.mxu3 %v6219_v28  ;;  %v2637_v28 = vld [vmem:[%s5580_s3 + $0x48] sm:$0xff] }
 0xd24   :  { %1775 = vmatpush.msrb.mxu3 %v6220_v18  ;;  %v2638_v18 = vld [vmem:[%s5580_s3 + $0x170] sm:$0xff] }
 0xd26   :  { %1776 = vmatpush.msrb.mxu3 %v6221_v15  ;;  %v2639_v15 = vld [vmem:[%s5580_s3 + $0x40] sm:$0xff] }
 0xd28   :  { %1777 = vmatpush.msrb.mxu3 %v6222_v26  ;;  %v6247_v26 = vld [vmem:[#allocation119_spill] sm:$0xff] }
 0xd2a   :  { %1778 = vmatpush.msrb.mxu3 %v6223_v52 }
 0xd2c   :  { %1779 = vmatpush.msrb.mxu3 %v6224_v42  ;;  %v2640_v42 = vld [vmem:[%s5580_s3 + $0x168] sm:$0xff] }
 0xd2e   :  { %1780 = vmatpush.msrb.mxu3 %v6225_v58  ;;  %v6248_v58 = vld [vmem:[#allocation120_spill] sm:$0xff] }
 0xd30   :  { %1781 = vmatpush.msrb.mxu3 %v6226_v1 }
 0xd32   :  { %1782 = vmatpush.msrb.mxu3 %v6227_v5  ;;  %v6249_v5 = vld [vmem:[#allocation122_spill] sm:$0xff] }
 0xd34   :  { %1783 = vmatpush.msrb.mxu3 %v6228_v56 }
 0xd36   :  { %1784 = vmatpush.msrb.mxu3 %v6229_v4  ;;  %v2641_v4 = vld [vmem:[%s5580_s3 + $0x38] sm:$0xff] }
 0xd38   :  { %1785 = vmatpush.msrb.mxu3 %v6230_v11  ;;  %v6250_v11 = vld [vmem:[#allocation121_spill] sm:$0xff] }
 0xd3a   :  { %1786 = vmatpush.msrb.mxu3 %v6231_v19 }
 0xd3c   :  { %1787 = vmatpush.msrb.mxu3 %v6232_v49  ;;  %v2642_v49 = vld [vmem:[%s5580_s3 + $0x160] sm:$0xff] }
 0xd3e   :  { %1788 = vmatpush.msrb.mxu3 %v6233_v8  ;;  %v2643_v8 = vld [vmem:[%s5580_s3 + $0x158] sm:$0xff] }
 0xd40   :  { %1789 = vmatpush.msrb.mxu3 %v4807_v50  ;;  %v2630_v50 = vld [vmem:[%s5580_s3 + $0x78] sm:$0xff] }
 0xd42   :  { %1790 = vmatpush.msrb.mxu3 %v6234_v57  ;;  %v2644_v57 = vld [vmem:[%s5580_s3 + $0x30] sm:$0xff] }
 0xd86   :  { %v1592_v61 = vpop.f32.mrf.mxu3 }
 0xd87   :  { %v1598_v17 = vmul.f32 %v1592_v61, %v6057_v7  ;;  %v1599_v51 = vmul.f32 %v1592_v61, %v6235_v16  ;;  %v1600_v36 = vmul.f32 %v1592_v61, %v6236_v59  ;;  %v1601_v53 = vmul.f32 %v1592_v61, %v6059_v13 }
 0xd88   :  { %v1602_v39 = vmul.f32 %v1592_v61, %v6243_v12  ;;  %v1603_v35 = vmul.f32 %v1592_v61, %v6244_v30  ;;  %v1604_v23 = vmul.f32 %v1592_v61, %v6245_v38  ;;  %v1605_v31 = vmul.f32 %v1592_v61, %v6246_v62  ;;  %v2645_v61 = vld [vmem:[%s5580_s3 + $0x150] sm:$0xff] }
 0xd89   :  { %1630 = vmatmul.f32.vlgmr.msrb.gmra.mxu0 %v1598_v17  ;;  %1653 = vmatmul.f32.vlgmr.msra.gmra.mxu1 %v1599_v51  ;;  %v2646_v17 = vld [vmem:[%s5580_s3 + $0x28] sm:$0xff] }
 0xd8a   :  { %1676 = vmatmul.f32.vlgmr.msra.gmra.mxu2 %v1600_v36  ;;  %1699 = vmatmul.f32.vlgmr.msra.gmra.mxu3 %v1601_v53  ;;  %v2647_v51 = vld [vmem:[%s5580_s3 + $0x148] sm:$0xff]  ;;  %v2648_v36 = vld [vmem:[%s5580_s3 + $0x20] sm:$0xff] }
 0xd8b   :  { %1856 = vmatpush.msra.mxu1 %v3820_v43  ;;  %1955 = vmatpush.msra.mxu3 %v2630_v50  ;;  %v2649_v53 = vld [vmem:[%s5580_s3 + $0x140] sm:$0xff]  ;;  %v2650_v50 = vld [vmem:[%s5580_s3 + $0x18] sm:$0xff] }
 0xd8d   :  { %1857 = vmatpush.msra.mxu1 %v3826_v20  ;;  %1956 = vmatpush.msra.mxu3 %v2631_v47  ;;  %v2651_v47 = vld [vmem:[%s5580_s3 + $0x138] sm:$0xff] }
 0xd8e   :  { %v1595_v41 = vpop.f32.mrf.mxu3 }
 0xd8f   :  { %1858 = vmatpush.msra.mxu1 %v6237_v33  ;;  %v1606_v63 = vmul.f32 %v1595_v41, %v6238_v27  ;;  %v1607_v46 = vmul.f32 %v1595_v41, %v6239_v48  ;;  %v1608_v10 = vmul.f32 %v1595_v41, %v6240_v55  ;;  %v1609_v40 = vmul.f32 %v1595_v41, %v6241_v6 }
 0xd90   :  { %1957 = vmatpush.msra.mxu3 %v2632_v24  ;;  %v1610_v52 = vmul.f32 %v1595_v41, %v6247_v26  ;;  %v1611_v1 = vmul.f32 %v1595_v41, %v6248_v58  ;;  %v1612_v56 = vmul.f32 %v1595_v41, %v6249_v5  ;;  %v1613_v19 = vmul.f32 %v1595_v41, %v6250_v11  ;;  %v2652_v41 = vld [vmem:[%s5580_s3 + $0x10] sm:$0xff]  ;;  %v2658_v24 = vld [vmem:[%s5580_s3 + $0x278] sm:$0xff] }
 0xd91   :  { %1859 = vmatpush.msra.mxu1 %v6242_v32  ;;  %1633 = vmatmul.f32.gmra.mxu0 %v1606_v63  ;;  %v2653_v63 = vld [vmem:[%s5580_s3 + $0x130] sm:$0xff] }
 0xd92   :  { %1656 = vmatmul.f32.gmra.mxu1 %v1607_v46  ;;  %1679 = vmatmul.f32.gmra.mxu2 %v1608_v10  ;;  %v2655_v46 = vld [vmem:[%s5580_s3 + $0x128] sm:$0xff]  ;;  %v2656_v10 = vld [vmem:[%s5580_s3] sm:$0xff] }
 0xd93   :  { %1702 = vmatmul.f32.gmra.mxu3 %v1609_v40  ;;  %v2657_v40 = vld [vmem:[%s5580_s3 + $0x120] sm:$0xff] }
 0xd94   :  { %1958 = vmatpush.msra.mxu3 %v2633_v2  ;;  %v2659_v2 = vld [vmem:[%s5580_s3 + $0x118] sm:$0xff] }
 0xd96   :  { %1959 = vmatpush.msra.mxu3 %v2634_v34  ;;  %v2660_v34 = vld [vmem:[%s5580_s3 + $0x270] sm:$0xff] }
 0xd98   :  { %1960 = vmatpush.msra.mxu3 %v2635_v44  ;;  %v2664_v44 = vld [vmem:[%s5580_s3 + $0x260] sm:$0xff] }
 0xd99   :  { %1722 = vmatmul.f32.vlgmr.msra.gmra.mxu0 %v1602_v39  ;;  %v2661_v39 = vld [vmem:[%s5580_s3 + $0x110] sm:$0xff] }
 0xd9a   :  { %1745 = vmatmul.f32.vlgmr.msrb.gmra.mxu1 %v1603_v35  ;;  %1768 = vmatmul.f32.vlgmr.msrb.gmra.mxu2 %v1604_v23  ;;  %v2662_v35 = vld [vmem:[%s5580_s3 + $0x268] sm:$0xff] }
 0xd9b   :  { %1791 = vmatmul.f32.vlgmr.msrb.gmra.mxu3 %v1605_v31  ;;  %2001 = vmatpush.msrb.mxu1 %v2636_v22  ;;  %v2663_v23 = vld [vmem:[%s5580_s3 + $0x108] sm:$0xff]  ;;  %v2665_v31 = vld [vmem:[%s5580_s3 + $0x100] sm:$0xff]  ;;  %v2666_v22 = vld [vmem:[%s5580_s3 + $0x258] sm:$0xff] }
 0xd9c   :  { %1961 = vmatpush.msra.mxu3 %v2637_v28  ;;  %v2667_v28 = vld [vmem:[%s5580_s3 + $0x378] sm:$0xff] }
 0xd9d   :  { %2002 = vmatpush.msrb.mxu1 %v2638_v18  ;;  %v2668_v18 = vld [vmem:[%s5580_s3 + $0x250] sm:$0xff] }
 0xd9e   :  { %1962 = vmatpush.msra.mxu3 %v2639_v15  ;;  %v2669_v15 = vld [vmem:[%s5580_s3 + $0x370] sm:$0xff] }
 0xd9f   :  { %2003 = vmatpush.msrb.mxu1 %v2640_v42  ;;  %v2670_v42 = vld [vmem:[%s5580_s3 + $0x368] sm:$0xff] }
 0xda0   :  { %1963 = vmatpush.msra.mxu3 %v2641_v4  ;;  %v6253_v4 = vld [vmem:[#allocation50_spill] sm:$0xff] }
 0xda1   :  { %1725 = vmatmul.f32.gmra.mxu0 %v1610_v52  ;;  %2004 = vmatpush.msrb.mxu1 %v2642_v49  ;;  %v6251_v52 = vld [vmem:[#allocation44_spill] sm:$0xff]  ;;  %v6254_v49 = vld [vmem:[#allocation54_spill] sm:$0xff] }
 0xda2   :  { %1748 = vmatmul.f32.gmra.mxu1 %v1611_v1  ;;  %1771 = vmatmul.f32.gmra.mxu2 %v1612_v56  ;;  %v6252_v1 = vld [vmem:[#allocation47_spill] sm:$0xff]  ;;  %v2671_v56 = vld [vmem:[%s5580_s3 + $0x360] sm:$0xff] }
 0xda3   :  { %1794 = vmatmul.f32.gmra.mxu3 %v1613_v19  ;;  %2005 = vmatpush.msrb.mxu1 %v2643_v8  ;;  %v2672_v19 = vld [vmem:[%s5580_s3 + $0x358] sm:$0xff]  ;;  %v2673_v8 = vld [vmem:[%s5580_s3 + $0x350] sm:$0xff] }
 0xda4   :  { %1964 = vmatpush.msra.mxu3 %v2644_v57  ;;  %v6255_v57 = vld [vmem:[#allocation55_spill] sm:$0xff] }
 0xda5   :  { %2006 = vmatpush.msrb.mxu1 %v2645_v61  ;;  %v6256_v61 = vld [vmem:[#allocation56_spill] sm:$0xff] }
 0xda6   :  { %1965 = vmatpush.msra.mxu3 %v2646_v17  ;;  %v6257_v17 = vld [vmem:[#allocation57_spill] sm:$0xff] }
 0xda7   :  { %2007 = vmatpush.msrb.mxu1 %v2647_v51  ;;  %v6258_v51 = vld [vmem:[#allocation58_spill] sm:$0xff] }
 0xda8   :  { %1966 = vmatpush.msra.mxu3 %v2648_v36  ;;  %v6259_v36 = vld [vmem:[#allocation59_spill] sm:$0xff] }
 0xda9   :  { %2008 = vmatpush.msrb.mxu1 %v2649_v53  ;;  %v6260_v53 = vld [vmem:[#allocation60_spill] sm:$0xff] }
 0xdaa   :  { %2414 = vmatmul.msk.f32.vlgmr.msra.gmra.mxu1 %vm263_vm1, %v5065_v60  ;;  %1967 = vmatpush.msra.mxu3 %v2650_v50  ;;  %v2654_v60 = vld [vmem:[%s5580_s3 + $0x8] sm:$0xff] }
 0xdab   :  { %2009 = vmatpush.msrb.mxu1 %v2651_v47  ;;  %v6261_v50 = vld [vmem:[#allocation61_spill] sm:$0xff]  ;;  %v6262_v47 = vld [vmem:[#allocation62_spill] sm:$0xff] }
 0xdac   :  { %1968 = vmatpush.msra.mxu3 %v2652_v41  ;;  %v6263_v41 = vld [vmem:[#allocation63_spill] sm:$0xff] }
 0xdad   :  { %2010 = vmatpush.msrb.mxu1 %v2653_v63  ;;  %v6264_v63 = vld [vmem:[#allocation64_spill] sm:$0xff] }
 0xdae   :  { %1969 = vmatpush.msra.mxu3 %v2654_v60  ;;  %v6265_v60 = vld [vmem:[#allocation68_spill] sm:$0xff] }
 0xdaf   :  { %2011 = vmatpush.msrb.mxu1 %v2655_v46  ;;  %v6266_v46 = vld [vmem:[#allocation72_spill] sm:$0xff] }
 0xdb0   :  { %1970 = vmatpush.msra.mxu3 %v2656_v10  ;;  %v6267_v10 = vld [vmem:[#allocation76_spill] sm:$0xff] }
 0xdb1   :  { %2012 = vmatpush.msrb.mxu1 %v2657_v40  ;;  %v6268_v40 = vld [vmem:[#allocation80_spill] sm:$0xff] }
 0xdb2   :  { %2047 = vmatpush.msrb.mxu3 %v2658_v24  ;;  %v6269_v24 = vld [vmem:[#allocation84_spill] sm:$0xff] }
 0xdb3   :  { %2013 = vmatpush.msrb.mxu1 %v2659_v2  ;;  %v6270_v2 = vld [vmem:[#allocation88_spill] sm:$0xff] }
 0xdb4   :  { %2048 = vmatpush.msrb.mxu3 %v2660_v34 }
 0xdb5   :  { %2014 = vmatpush.msrb.mxu1 %v2661_v39 }
 0xdb6   :  { %2049 = vmatpush.msrb.mxu3 %v2662_v35 }
 0xdb7   :  { %2015 = vmatpush.msrb.mxu1 %v2663_v23 }
 0xdb8   :  { %2050 = vmatpush.msrb.mxu3 %v2664_v44 }
 0xdb9   :  { %2016 = vmatpush.msrb.mxu1 %v2665_v31 }
 0xdba   :  { %2051 = vmatpush.msrb.mxu3 %v2666_v22 }
 0xdbb   :  { %2093 = vmatpush.msra.mxu1 %v2667_v28 }
 0xdbc   :  { %2052 = vmatpush.msrb.mxu3 %v2668_v18 }
 0xdbd   :  { %2094 = vmatpush.msra.mxu1 %v2669_v15 }
 0xdbe   :  { %2053 = vmatpush.msrb.mxu3 %v6251_v52 }
 0xdbf   :  { %2095 = vmatpush.msra.mxu1 %v2670_v42 }
 0xdc0   :  { %2054 = vmatpush.msrb.mxu3 %v6252_v1 }
 0xdc1   :  { %2096 = vmatpush.msra.mxu1 %v2671_v56 }
 0xdc2   :  { %2055 = vmatpush.msrb.mxu3 %v6253_v4 }
 0xdc3   :  { %2097 = vmatpush.msra.mxu1 %v2672_v19 }
 0xdc4   :  { %2056 = vmatpush.msrb.mxu3 %v6254_v49 }
 0xdc5   :  { %2098 = vmatpush.msra.mxu1 %v2673_v8 }
 0xdc6   :  { %2057 = vmatpush.msrb.mxu3 %v6255_v57 }
 0xdc7   :  { %2099 = vmatpush.msra.mxu1 %v6256_v61 }
 0xdc8   :  { %2058 = vmatpush.msrb.mxu3 %v6257_v17 }
 0xdc9   :  { %2100 = vmatpush.msra.mxu1 %v6258_v51 }
 0xdca   :  { %2059 = vmatpush.msrb.mxu3 %v6259_v36 }
 0xdcb   :  { %2101 = vmatpush.msra.mxu1 %v6260_v53 }
 0xdcc   :  { %2060 = vmatpush.msrb.mxu3 %v6261_v50 }
 0xdcd   :  { %2102 = vmatpush.msra.mxu1 %v6262_v47 }
 0xdce   :  { %2061 = vmatpush.msrb.mxu3 %v6263_v41 }
 0xdcf   :  { %2103 = vmatpush.msra.mxu1 %v6264_v63 }
 0xdd0   :  { %2062 = vmatpush.msrb.mxu3 %v6265_v60 }
 0xdd1   :  { %2104 = vmatpush.msra.mxu1 %v6266_v46 }
 0xdd3   :  { %2105 = vmatpush.msra.mxu1 %v6267_v10 }
 0xdd5   :  { %2106 = vmatpush.msra.mxu1 %v6268_v40 }
 0xdd7   :  { %2107 = vmatpush.msra.mxu1 %v6269_v24  ;;  %v2674_v24 = vld [vmem:[%s5580_s3 + $0xf8] sm:$0xff] }
 0xdd9   :  { %2108 = vmatpush.msra.mxu1 %v6270_v2  ;;  %v2675_v2 = vld [vmem:[%s5580_s3 + $0xf0] sm:$0xff] }
 0xe06   :  { %v1631_v34 = vpop.f32.mrf.mxu0  ;;  %v1654_v39 = vpop.f32.mrf.mxu1 }
 0xe07   :  { %v1655_v52 = vadd.f32 %v1654_v39, %v1631_v34  ;;  %v2676_v34 = vld [vmem:[%s5580_s3 + $0xe8] sm:$0xff]  ;;  %v2677_v39 = vld [vmem:[%s5580_s3 + $0xe0] sm:$0xff] }
 0xe0d   :  { %v1677_v35 = vpop.f32.mrf.mxu2  ;;  %v1700_v23 = vpop.f32.mrf.mxu3 }
 0xe0e   :  { %v1634_v44 = vpop.f32.mrf.mxu0  ;;  %v1678_v1 = vadd.f32 %v1677_v35, %v1655_v52  ;;  %v2678_v35 = vld [vmem:[%s5580_s3 + $0xd8] sm:$0xff] }
 0xe0f   :  { %v1657_v31 = vpop.f32.mrf.mxu1  ;;  %v2686_v52 = vld [vmem:[%s5580_s3 + $0x98] sm:$0xff] }
 0xe10   :  { %v1658_v42 = vadd.f32 %v1657_v31, %v1634_v44  ;;  %v1701_v19 = vadd.f32 %v1700_v23, %v1678_v1  ;;  %v2679_v23 = vld [vmem:[%s5580_s3 + $0xd0] sm:$0xff]  ;;  %v2680_v44 = vld [vmem:[%s5580_s3 + $0xc8] sm:$0xff]  ;;  %v2681_v31 = vld [vmem:[%s5580_s3 + $0xc0] sm:$0xff] }
 0xe11   :  { %v2688_v1 = vld [vmem:[%s5580_s3 + $0x88] sm:$0xff] }
 0xe15   :  { %v1680_v22 = vpop.f32.mrf.mxu2 }
 0xe16   :  { %v1703_v28 = vpop.f32.mrf.mxu3  ;;  %v1723_v18 = vpop.f32.mrf.mxu0  ;;  %v1681_v56 = vadd.f32 %v1680_v22, %v1658_v42  ;;  %v2682_v22 = vld [vmem:[%s5580_s3 + $0xb8] sm:$0xff]  ;;  %v2687_v42 = vld [vmem:[%s5580_s3 + $0x90] sm:$0xff] }
 0xe17   :  { %v1746_v15 = vpop.f32.mrf.mxu1  ;;  %v1724_v17 = vadd.f32 %v1723_v18, %v1701_v19  ;;  %v2684_v18 = vld [vmem:[%s5580_s3 + $0xa8] sm:$0xff] }
 0xe18   :  { %v1704_v49 = vadd.f32 %v1703_v28, %v1681_v56  ;;  %v2683_v28 = vld [vmem:[%s5580_s3 + $0xb0] sm:$0xff]  ;;  %v2689_v56 = vld [vmem:[%s5580_s3 + $0x80] sm:$0xff] }
 0xe19   :  { %v1747_v36 = vadd.f32 %v1746_v15, %v1724_v17  ;;  %v2685_v15 = vld [vmem:[%s5580_s3 + $0xa0] sm:$0xff]  ;;  %v2694_v17 = vld [vmem:[%s5580_s3 + $0x2d8] sm:$0xff] }
 0xe1d   :  { %v1769_v4 = vpop.f32.mrf.mxu2 }
 0xe1e   :  { %v1792_v8 = vpop.f32.mrf.mxu3  ;;  %v1726_v57 = vpop.f32.mrf.mxu0  ;;  %v1770_v47 = vadd.f32 %v1769_v4, %v1747_v36  ;;  %v2696_v36 = vld [vmem:[%s5580_s3 + $0x2c8] sm:$0xff] }
 0xe1f   :  { %v1749_v61 = vpop.f32.mrf.mxu1  ;;  %v1727_v51 = vadd.f32 %v1726_v57, %v1704_v49  ;;  %v2690_v49 = vld [vmem:[%s5580_s3 + $0x2f8] sm:$0xff]  ;;  %v2692_v57 = vld [vmem:[%s5580_s3 + $0x2e8] sm:$0xff] }
 0xe20   :  { %v1793_v40 = vadd.f32 %v1792_v8, %v1770_v47  ;;  %v2691_v8 = vld [vmem:[%s5580_s3 + $0x2f0] sm:$0xff] }
 0xe21   :  { %v1750_v53 = vadd.f32 %v1749_v61, %v1727_v51  ;;  %v2693_v61 = vld [vmem:[%s5580_s3 + $0x2e0] sm:$0xff]  ;;  %v2695_v51 = vld [vmem:[%s5580_s3 + $0x2d0] sm:$0xff] }
 0xe22   :  { %v2699_v47 = vld [vmem:[%s5580_s3 + $0x2b0] sm:$0xff] }
 0xe25   :  { %v1772_v50 = vpop.f32.mrf.mxu2 }
 0xe26   :  { %v1773_v41 = vadd.f32 %v1772_v50, %v1750_v53  ;;  %v1795_v63 = vpop.f32.mrf.mxu3  ;;  %v2697_v53 = vld [vmem:[%s5580_s3 + $0x2c0] sm:$0xff]  ;;  %v2698_v50 = vld [vmem:[%s5580_s3 + $0x2b8] sm:$0xff] }
 0xe27   :  { %v1861_v60 = vpop.f32.mrf.mxu1 }
 0xe28   :  { %v1796_v46 = vadd.f32 %v1795_v63, %v1773_v41  ;;  %v5283_v10 = vadd.f32 %v5005_v3, %v1861_v60  ;;  %v2700_v41 = vld [vmem:[%s5580_s3 + $0x2a8] sm:$0xff]  ;;  %v2701_v63 = vld [vmem:[%s5580_s3 + $0x2a0] sm:$0xff]  ;;  %v2702_v60 = vld [vmem:[%s5580_s3 + $0x298] sm:$0xff] }
 0xe2a   :  { %1885 = vrot.lane.b32.xlu1 %v5283_v10, %s2767_s30  ;;  %1812 = vmatpush.msrb.mxu0 %v1796_v46  ;;  %v2703_v46 = vld [vmem:[%s5580_s3 + $0x290] sm:$0xff] }
 0xe2c   :  { %1813 = vmatpush.msrb.mxu0 %v1793_v40  ;;  %v2704_v40 = vld [vmem:[%s5580_s3 + $0x288] sm:$0xff] }
 0xe2d   :  { %2412 = vmatmul.msk.f32.vlgmr.msrb.gmra.mxu0 %vm455_vm2, %v3976_v54 }
 0xe2e   :  { %1834 = vmatpush.msra.mxu0 %v3981_v14 }
 0xe30   :  { %1835 = vmatpush.msra.mxu0 %v3985_v29 }
 0xe32   :  { %1836 = vmatpush.msra.mxu0 %v3989_v37 }
 0xe34   :  { %1837 = vmatpush.msra.mxu0 %v3993_v0 }
 0xe36   :  { %1978 = vmatpush.msrb.mxu0 %v2674_v24  ;;  %v2705_v24 = vld [vmem:[%s5580_s3 + $0x280] sm:$0xff] }
 0xe38   :  { %1979 = vmatpush.msrb.mxu0 %v2675_v2 }
 0xe3a   :  { %1980 = vmatpush.msrb.mxu0 %v2676_v34 }
 0xe3c   :  { %1981 = vmatpush.msrb.mxu0 %v2677_v39 }
 0xe3e   :  { %1982 = vmatpush.msrb.mxu0 %v2678_v35 }
 0xe40   :  { %1983 = vmatpush.msrb.mxu0 %v2679_v23 }
 0xe42   :  { %1984 = vmatpush.msrb.mxu0 %v2680_v44 }
 0xe44   :  { %1985 = vmatpush.msrb.mxu0 %v2681_v31 }
 0xe46   :  { %1986 = vmatpush.msrb.mxu0 %v2682_v22 }
 0xe48   :  { %1987 = vmatpush.msrb.mxu0 %v2683_v28 }
 0xe4a   :  { %1988 = vmatpush.msrb.mxu0 %v2684_v18 }
 0xe4c   :  { %1989 = vmatpush.msrb.mxu0 %v2685_v15 }
 0xe4e   :  { %1990 = vmatpush.msrb.mxu0 %v2686_v52 }
 0xe50   :  { %1991 = vmatpush.msrb.mxu0 %v2687_v42 }
 0xe52   :  { %1992 = vmatpush.msrb.mxu0 %v2688_v1 }
 0xe54   :  { %1993 = vmatpush.msrb.mxu0 %v2689_v56 }
 0xeaa   :  { %v1815_v4 = vpop.f32.mrf.mxu0 }
 0xeab   :  { %v1818_v19 = vmax.f32 %v1815_v4, 0.0  ;;  %v1886_v4 = vpop.permute.xlu1 %1885 }
 0xead   :  { %2413 = vmatmul.msk.f32.vlgmr.msra.gmra.mxu0 %vm263_vm1, %v1818_v19 }
 0xeae   :  { %2070 = vmatpush.msra.mxu0 %v2690_v49 }
 0xeb0   :  { %2071 = vmatpush.msra.mxu0 %v2691_v8 }
 0xeb2   :  { %2072 = vmatpush.msra.mxu0 %v2692_v57 }
 0xeb4   :  { %2073 = vmatpush.msra.mxu0 %v2693_v61 }
 0xeb6   :  { %2074 = vmatpush.msra.mxu0 %v2694_v17 }
 0xeb8   :  { %2075 = vmatpush.msra.mxu0 %v2695_v51 }
 0xeba   :  { %2076 = vmatpush.msra.mxu0 %v2696_v36 }
 0xebc   :  { %2077 = vmatpush.msra.mxu0 %v2697_v53 }
 0xebe   :  { %2078 = vmatpush.msra.mxu0 %v2698_v50 }
 0xec0   :  { %2079 = vmatpush.msra.mxu0 %v2699_v47 }
 0xec2   :  { %2080 = vmatpush.msra.mxu0 %v2700_v41 }
 0xec4   :  { %2081 = vmatpush.msra.mxu0 %v2701_v63 }
 0xec6   :  { %2082 = vmatpush.msra.mxu0 %v2702_v60 }
 0xec8   :  { %2083 = vmatpush.msra.mxu0 %v2703_v46  ;;  %v2706_v46 = vld [vmem:[%s5580_s3 + $0x1f8] sm:$0xff] }
 0xeca   :  { %2084 = vmatpush.msra.mxu0 %v2704_v40  ;;  %v2707_v40 = vld [vmem:[%s5580_s3 + $0x1f0] sm:$0xff] }
 0xecc   :  { %2085 = vmatpush.msra.mxu0 %v2705_v24  ;;  %v2708_v24 = vld [vmem:[%s5580_s3 + $0x1e8] sm:$0xff] }
 0xf2a   :  { %v1839_v2 = vpop.f32.mrf.mxu0 }
 0xf2b   :  { %v1840_v34 = vadd.f32 %v5051_v25, %v1839_v2  ;;  %v2709_v2 = vld [vmem:[%s5580_s3 + $0x1e0] sm:$0xff] }
 0xf2d   :  { %v1864_v39 = vadd.f32 %v5283_v10, %v1840_v34 }
 0xf2f   :  { %v2415_v35 = vmul.f32 -1.442695, %v1864_v39  ;;  %v2712_v39 = vld [vmem:[%s5580_s3 + $0x1c8] sm:$0xff] }
 0xf31   :  { %2487 = vpow2.f32 %v2415_v35  ;;  %v2713_v35 = vld [vmem:[%s5580_s3 + $0x1c0] sm:$0xff] }
 0xf37   :  { %v2488_v23 = vpop.eup %2487 }
 0xf38   :  { %v1868_v44 = vadd.f32 1.0, %v2488_v23  ;;  %v2715_v23 = vld [vmem:[%s5580_s3 + $0x1b0] sm:$0xff] }
 0xf3a   :  { %2489 = vrcp.f32 %v1868_v44  ;;  %v1880_v18 = vand.u32 2147483648, %v1868_v44  ;;  %v1878_v52 = vand.u32 2147483647, %v1868_v44  ;;  %vm1874_vm7 = vweird.f32 %v1868_v44 }
 0xf3c   :  { %v1881_v1 = vor.u32 1.1754944e-38, %v1880_v18  ;;  %vm1879_vm9 = vcmp.eq.f32.partialorder %v1878_v52, 8.507059e+37  ;;  %v2720_v18 = vld [vmem:[%s5580_s3 + $0x188] sm:$0xff]  ;;  %v2722_v52 = vld [vmem:[%s5580_s3 + $0x3f8] sm:$0xff] }
 0xf40   :  { %v2490_v31 = vpop.eup %2489 }
 0xf41   :  { %v1870_v22 = vmul.f32 %v2490_v31, %v1868_v44  ;;  %vm1875_vm6 = vweird.f32 %v2490_v31  ;;  %v2716_v44 = vld [vmem:[%s5580_s3 + $0x1a8] sm:$0xff] }
 0xf42   :  { %vm1876_vm8 = vmor %vm1874_vm7, %vm1875_vm6 }
 0xf43   :  { %v1871_v28 = vsub.f32 1.0, %v1870_v22  ;;  %v2718_v22 = vld [vmem:[%s5580_s3 + $0x198] sm:$0xff] }
 0xf45   :  { %v1872_v15 = vmul.f32 %v2490_v31, %v1871_v28  ;;  %v2719_v28 = vld [vmem:[%s5580_s3 + $0x190] sm:$0xff] }
 0xf47   :  { %v1873_v42 = vadd.f32 %v2490_v31, %v1872_v15  ;;  %v2721_v15 = vld [vmem:[%s5580_s3 + $0x180] sm:$0xff] }
 0xf49   :  { %v1877_v56 = vsel %vm1876_vm8, %v2490_v31, %v1873_v42  ;;  %v2717_v31 = vld [vmem:[%s5580_s3 + $0x1a0] sm:$0xff]  ;;  %v2723_v42 = vld [vmem:[%s5580_s3 + $0x3f0] sm:$0xff] }
 0xf4a   :  { %v1882_v10 = vsel %vm1879_vm9, %v1881_v1, %v1877_v56  ;;  %v2724_v1 = vld [vmem:[%s5580_s3 + $0x3e8] sm:$0xff]  ;;  %v2725_v56 = vld [vmem:[%s5580_s3 + $0x3e0] sm:$0xff] }
 0xf4b   :  { %v1888_v19 = vmul.f32 %v1886_v4, %v1882_v10  ;;  %v1895_v61 = vsub.f32 1.0, %v1882_v10  ;;  %v1901_v51 = vmul.f32 %v1882_v10, %v5057_v45  ;;  %v2726_v4 = vld [vmem:[%s5580_s3 + $0x3d8] sm:$0xff]  ;;  %v2727_v10 = vld [vmem:[%s5580_s3 + $0x3d0] sm:$0xff] }
 0xf4d   :  { %1890 = vrot.lane.b32.xlu2 %v1888_v19, %s2767_s30  ;;  %v2728_v19 = vld [vmem:[%s5580_s3 + $0x3c8] sm:$0xff] }
 0xfa7   :  { %v1891_v49 = vpop.permute.xlu2 %1890 }
 0xfa8   :  { %v1893_v8 = vadd.f32 %v1891_v49, %v1840_v34  ;;  %v2711_v34 = vld [vmem:[%s5580_s3 + $0x1d0] sm:$0xff]  ;;  %v2729_v49 = vld [vmem:[%s5580_s3 + $0x3c0] sm:$0xff] }
 0xfaa   :  { %2491 = vtanh.f32 %v1893_v8  ;;  %v2730_v8 = vld [vmem:[%s5580_s3 + $0x3b8] sm:$0xff] }
 0xfb0   :  { %v2492_v57 = vpop.eup %2491 }
 0xfb1   :  { %1897 = vrot.lane.b32.xlu0 %v2492_v57, %s2766_s23  ;;  %v2731_v57 = vld [vmem:[%s5580_s3 + $0x3b0] sm:$0xff] }
0x1023   :  { %v1898_v17 = vpop.permute.xlu0 %1897 }
0x1024   :  { %v1900_v36 = vmul.f32 %v1898_v17, %v1895_v61  ;;  %v2732_v61 = vld [vmem:[%s5580_s3 + $0x3a8] sm:$0xff]  ;;  %v2733_v17 = vld [vmem:[%s5580_s3 + $0x3a0] sm:$0xff] }
0x1026   :  { %v5395_v53 = vadd.f32 %v1901_v51, %v1900_v36  ;;  %v2734_v51 = vld [vmem:[%s5580_s3 + $0x398] sm:$0xff]  ;;  %v2735_v36 = vld [vmem:[%s5580_s3 + $0x390] sm:$0xff] }
0x1028   :  { %1910 = vrot.lane.b32.xlu0 %v5395_v53, %s2767_s30  ;;  %1907 = vrot.lane.b32.xlu2 %v5395_v53, %s2768_s7 }
0x1029   :  { %1904 = vrot.lane.b32.xlu1 %v5395_v53, %s2766_s23 }
0x1082   :  { %v1908_v47 = vpop.permute.xlu2 %1907 }
0x109a   :  { %v1911_v45 = vpop.permute.xlu0 %1910 }
0x109b   :  { %v5403_v50 = vpop.permute.xlu1 %1904 }
0x109c   :  { %v1913_v41 = vsel %vm263_vm1, %v5403_v50, %v5395_v53 }
0x109d   :  { %v1914_v63 = vsel %vm491_vm3, %v1913_v41, %v1908_v47  ;;  %v2736_v47 = vld [vmem:[%s5580_s3 + $0x388] sm:$0xff]  ;;  %v2737_v41 = vld [vmem:[%s5580_s3 + $0x380] sm:$0xff] }
0x109e   :  { %v1915_v60 = vsel %vm493_vm4, %v1914_v63, %v1911_v45 }
0x109f   :  { %1931 = vmatpush.msra.mxu2 %v1915_v60 }
0x10a0   :  { %2416 = vmatmul.msk.f32.vlgmr.msra.gmra.mxu2 %vm182_vm0, %v6023_v9  ;;  %v2710_v9 = vld [vmem:[%s5580_s3 + $0x1d8] sm:$0xff] }
0x10a1   :  { %2024 = vmatpush.msrb.mxu2 %v2706_v46 }
0x10a3   :  { %2025 = vmatpush.msrb.mxu2 %v2707_v40 }
0x10a5   :  { %2026 = vmatpush.msrb.mxu2 %v2708_v24 }
0x10a7   :  { %2027 = vmatpush.msrb.mxu2 %v2709_v2 }
0x10a8   :  { %2417 = vmatmul.msk.f32.gmra.mxu2 %vm182_vm0, %v6028_v21  ;;  %v2714_v21 = vld [vmem:[%s5580_s3 + $0x1b8] sm:$0xff] }
0x10a9   :  { %2028 = vmatpush.msrb.mxu2 %v2710_v9 }
0x10ab   :  { %2029 = vmatpush.msrb.mxu2 %v2711_v34 }
0x10ad   :  { %2030 = vmatpush.msrb.mxu2 %v2712_v39 }
0x10af   :  { %2031 = vmatpush.msrb.mxu2 %v2713_v35 }
0x10b1   :  { %2032 = vmatpush.msrb.mxu2 %v2714_v21 }
0x10b3   :  { %2033 = vmatpush.msrb.mxu2 %v2715_v23 }
0x10b5   :  { %2034 = vmatpush.msrb.mxu2 %v2716_v44 }
0x10b7   :  { %2035 = vmatpush.msrb.mxu2 %v2717_v31 }
0x10b9   :  { %2036 = vmatpush.msrb.mxu2 %v2718_v22 }
0x10bb   :  { %2037 = vmatpush.msrb.mxu2 %v2719_v28 }
0x10bd   :  { %2038 = vmatpush.msrb.mxu2 %v2720_v18 }
0x10bf   :  { %2039 = vmatpush.msrb.mxu2 %v2721_v15 }
0x10c1   :  { %2116 = vmatpush.msra.mxu2 %v2722_v52 }
0x10c3   :  { %2117 = vmatpush.msra.mxu2 %v2723_v42 }
0x10c5   :  { %2118 = vmatpush.msra.mxu2 %v2724_v1 }
0x10c7   :  { %2119 = vmatpush.msra.mxu2 %v2725_v56 }
0x10c9   :  { %2120 = vmatpush.msra.mxu2 %v2726_v4 }
0x10cb   :  { %2121 = vmatpush.msra.mxu2 %v2727_v10 }
0x10cd   :  { %2122 = vmatpush.msra.mxu2 %v2728_v19 }
0x10cf   :  { %2123 = vmatpush.msra.mxu2 %v2729_v49 }
0x10d1   :  { %2124 = vmatpush.msra.mxu2 %v2730_v8 }
0x10d3   :  { %2125 = vmatpush.msra.mxu2 %v2731_v57 }
0x10d5   :  { %2126 = vmatpush.msra.mxu2 %v2732_v61 }
0x10d7   :  { %2127 = vmatpush.msra.mxu2 %v2733_v17 }
0x10d9   :  { %2128 = vmatpush.msra.mxu2 %v2734_v51 }
0x10db   :  { %2129 = vmatpush.msra.mxu2 %v2735_v36 }
0x10dd   :  { %2130 = vmatpush.msra.mxu2 %v2736_v47 }
0x10df   :  { %2131 = vmatpush.msra.mxu2 %v2737_v41 }
0x1123   :  { %v1933_v45 = vpop.f32.mrf.mxu2 }
0x1124   :  { %v1939_v63 = vmul.f32 %v1933_v45, %v6057_v7  ;;  %v1940_v60 = vmul.f32 %v1933_v45, %v6235_v16  ;;  %v1941_v46 = vmul.f32 %v1933_v45, %v6236_v59  ;;  %v1942_v40 = vmul.f32 %v1933_v45, %v6059_v13 }
0x1125   :  { %v1945_v13 = vmul.f32 %v1933_v45, %v6245_v38 }
0x1126   :  { %1971 = vmatmul.f32.vlgmr.msra.gmra.mxu3 %v1939_v63  ;;  %1994 = vmatmul.f32.vlgmr.msrb.gmra.mxu0 %v1940_v60 }
0x1127   :  { %2017 = vmatmul.f32.vlgmr.msrb.gmra.mxu1 %v1941_v46  ;;  %2040 = vmatmul.f32.vlgmr.msrb.gmra.mxu2 %v1942_v40 }
0x1128   :  { %2197 = vmatpush.msrb.mxu0 %v3820_v43  ;;  %v1943_v43 = vmul.f32 %v1933_v45, %v6243_v12 }
0x112a   :  { %2198 = vmatpush.msrb.mxu0 %v3826_v20  ;;  %v1944_v20 = vmul.f32 %v1933_v45, %v6244_v30 }
0x112b   :  { %v1936_v24 = vpop.f32.mrf.mxu2 }
0x112c   :  { %2199 = vmatpush.msrb.mxu0 %v6237_v33  ;;  %v1947_v2 = vmul.f32 %v1936_v24, %v6238_v27  ;;  %v1948_v7 = vmul.f32 %v1936_v24, %v6239_v48  ;;  %v1949_v16 = vmul.f32 %v1936_v24, %v6240_v55  ;;  %v1950_v59 = vmul.f32 %v1936_v24, %v6241_v6 }
0x112d   :  { %v1946_v33 = vmul.f32 %v1933_v45, %v6246_v62  ;;  %v1951_v27 = vmul.f32 %v1936_v24, %v6247_v26  ;;  %v1952_v48 = vmul.f32 %v1936_v24, %v6248_v58  ;;  %v1953_v55 = vmul.f32 %v1936_v24, %v6249_v5 }
0x112e   :  { %2200 = vmatpush.msrb.mxu0 %v6242_v32  ;;  %1974 = vmatmul.f32.gmra.mxu3 %v1947_v2  ;;  %v1954_v6 = vmul.f32 %v1936_v24, %v6250_v11 }
0x112f   :  { %1997 = vmatmul.f32.gmra.mxu0 %v1948_v7  ;;  %2020 = vmatmul.f32.gmra.mxu1 %v1949_v16 }
0x1130   :  { %2043 = vmatmul.f32.gmra.mxu2 %v1950_v59 }
0x1136   :  { %2063 = vmatmul.f32.vlgmr.msrb.gmra.mxu3 %v1943_v43  ;;  %v36_v43 = vld [vmem:[%s5577_s0 + $0x10] sm:$0x3] }
0x1137   :  { %2086 = vmatmul.f32.vlgmr.msra.gmra.mxu0 %v1944_v20  ;;  %2109 = vmatmul.f32.vlgmr.msra.gmra.mxu1 %v1945_v13 }
0x1138   :  { %2132 = vmatmul.f32.vlgmr.msra.gmra.mxu2 %v1946_v33 }
0x113e   :  { %2066 = vmatmul.f32.gmra.mxu3 %v1951_v27 }
0x113f   :  { %2089 = vmatmul.f32.gmra.mxu0 %v1952_v48  ;;  %2112 = vmatmul.f32.gmra.mxu1 %v1953_v55  ;;  %v35_v55 = vld [vmem:[%s5577_s0 + $0x58] sm:$0xff] }
0x1140   :  { %2135 = vmatmul.f32.gmra.mxu2 %v1954_v6  ;;  %v34_v6 = vld [vmem:[%s5577_s0 + $0x40] sm:$0xff] }
0x1141   :  { %2288 = vmatpush.msrb.mxu2 %v35_v55 }
0x1143   :  { %2289 = vmatpush.msrb.mxu2 %v34_v6 }
0x1147   :  { %2420 = vmatmul.msk.f32.vlgmr.msrb.gmra.mxu0 %vm263_vm1, %v5403_v50 }
0x11a3   :  { %v1995_v32 = vpop.f32.mrf.mxu0 }
0x11a4   :  { %v2018_v12 = vpop.f32.mrf.mxu1 }
0x11a9   :  { %v1972_v30 = vpop.f32.mrf.mxu3 }
0x11aa   :  { %v2041_v38 = vpop.f32.mrf.mxu2  ;;  %v1996_v58 = vadd.f32 %v1995_v32, %v1972_v30  ;;  %v2738_v32 = vld [vmem:[%s5577_s0 + $0x28] sm:$0xff] }
0x11ab   :  { %2290 = vmatpush.msrb.mxu2 %v2738_v32 }
0x11ac   :  { %v1998_v62 = vpop.f32.mrf.mxu0  ;;  %v2021_v9 = vpop.f32.mrf.mxu1  ;;  %v2019_v5 = vadd.f32 %v2018_v12, %v1996_v58 }
0x11ae   :  { %v2042_v23 = vadd.f32 %v2041_v38, %v2019_v5 }
0x11b1   :  { %v1975_v26 = vpop.f32.mrf.mxu3 }
0x11b2   :  { %v1999_v35 = vadd.f32 %v1998_v62, %v1975_v26 }
0x11b3   :  { %v2044_v34 = vpop.f32.mrf.mxu2 }
0x11b4   :  { %v2087_v39 = vpop.f32.mrf.mxu0  ;;  %v2110_v11 = vpop.f32.mrf.mxu1  ;;  %v2022_v44 = vadd.f32 %v2021_v9, %v1999_v35 }
0x11b6   :  { %v2045_v50 = vadd.f32 %v2044_v34, %v2022_v44 }
0x11b9   :  { %v2064_v21 = vpop.f32.mrf.mxu3 }
0x11ba   :  { %v2065_v28 = vadd.f32 %v2064_v21, %v2042_v23 }
0x11bb   :  { %v2133_v22 = vpop.f32.mrf.mxu2 }
0x11bc   :  { %v2090_v31 = vpop.f32.mrf.mxu0  ;;  %v2088_v15 = vadd.f32 %v2087_v39, %v2065_v28  ;;  %v2113_v56 = vpop.f32.mrf.mxu1  ;;  %v45_v39 = vld [vmem:[%s5578_s1 + $0x5] ss:$0 sm:$0xff] }
0x11be   :  { %v2111_v10 = vadd.f32 %v2110_v11, %v2088_v15  ;;  %v46_v11 = vld [vmem:[%s5578_s1 + $0x6] ss:$0 sm:$0xff] }
0x11c0   :  { %v2134_v57 = vadd.f32 %v2133_v22, %v2111_v10  ;;  %v47_v22 = vld [vmem:[%s5578_s1 + $0x7] ss:$0 sm:$0xff] }
0x11c1   :  { %v2067_v18 = vpop.f32.mrf.mxu3 }
0x11c2   :  { %v2068_v52 = vadd.f32 %v2067_v18, %v2045_v50 }
0x11c3   :  { %v2136_v49 = vpop.f32.mrf.mxu2 }
0x11c4   :  { %v2091_v42 = vadd.f32 %v2090_v31, %v2068_v52  ;;  %v2202_v1 = vpop.f32.mrf.mxu0 }
0x11c5   :  { %v2203_v4 = vadd.f32 %v5005_v3, %v2202_v1 }
0x11c6   :  { %v2114_v19 = vadd.f32 %v2113_v56, %v2091_v42 }
0x11c7   :  { %2226 = vrot.lane.b32.xlu1 %v2203_v4, %s2767_s30 }
0x11c8   :  { %v2137_v8 = vadd.f32 %v2136_v49, %v2114_v19 }
0x11ca   :  { %2153 = vmatpush.msra.mxu3 %v2137_v8 }
0x11cc   :  { %2154 = vmatpush.msra.mxu3 %v2134_v57 }
0x11cd   :  { %2418 = vmatmul.msk.f32.vlgmr.msra.gmra.mxu3 %vm455_vm2, %v3976_v54 }
0x11ce   :  { %2175 = vmatpush.msrb.mxu3 %v3981_v14 }
0x11d0   :  { %2176 = vmatpush.msrb.mxu3 %v3985_v29 }
0x11d2   :  { %2177 = vmatpush.msrb.mxu3 %v3989_v37 }
0x11d4   :  { %2178 = vmatpush.msrb.mxu3 %v3993_v0 }
0x1250   :  { %v2156_v3 = vpop.f32.mrf.mxu3 }
0x1251   :  { %v2159_v61 = vmax.f32 %v2156_v3, 0.0 }
0x1253   :  { %2419 = vmatmul.msk.f32.vlgmr.msrb.gmra.mxu3 %vm263_vm1, %v2159_v61 }
0x12d6   :  { %v2180_v17 = vpop.f32.mrf.mxu3 }
0x12d7   :  { %v2181_v51 = vadd.f32 %v5051_v25, %v2180_v17  ;;  %v2227_v25 = vpop.permute.xlu1 %2226 }
0x12d9   :  { %v2205_v36 = vadd.f32 %v2203_v4, %v2181_v51 }
0x12db   :  { %v2421_v47 = vmul.f32 -1.442695, %v2205_v36 }
0x12dd   :  { %2493 = vpow2.f32 %v2421_v47 }
0x12e3   :  { %v2494_v41 = vpop.eup %2493 }
0x12e4   :  { %v2209_v54 = vadd.f32 1.0, %v2494_v41 }
0x12e6   :  { %2495 = vrcp.f32 %v2209_v54  ;;  %v2221_v63 = vand.u32 2147483648, %v2209_v54  ;;  %v2219_v0 = vand.u32 2147483647, %v2209_v54  ;;  %vm2215_vm4 = vweird.f32 %v2209_v54 }
0x12e8   :  { %v2222_v46 = vor.u32 1.1754944e-38, %v2221_v63  ;;  %vm2220_vm11 = vcmp.eq.f32.partialorder %v2219_v0, 8.507059e+37 }
0x12ec   :  { %v2496_v14 = vpop.eup %2495 }
0x12ed   :  { %v2211_v45 = vmul.f32 %v2496_v14, %v2209_v54  ;;  %vm2216_vm3 = vweird.f32 %v2496_v14 }
0x12ee   :  { %vm2217_vm10 = vmor %vm2215_vm4, %vm2216_vm3 }
0x12ef   :  { %v2212_v29 = vsub.f32 1.0, %v2211_v45 }
0x12f1   :  { %v2213_v37 = vmul.f32 %v2496_v14, %v2212_v29 }
0x12f3   :  { %v2214_v60 = vadd.f32 %v2496_v14, %v2213_v37 }
0x12f5   :  { %v2218_v40 = vsel %vm2217_vm10, %v2496_v14, %v2214_v60 }
0x12f6   :  { %v2223_v24 = vsel %vm2220_vm11, %v2222_v46, %v2218_v40 }
0x12f7   :  { %v2229_v2 = vmul.f32 %v2227_v25, %v2223_v24  ;;  %v2236_v20 = vsub.f32 1.0, %v2223_v24  ;;  %v2242_v33 = vmul.f32 %v2223_v24, %v5395_v53  ;;  %v2739_v53 = vld [vmem:[%s5577_s0 + $0x10] sm:$0xff] }
0x12f8   :  { %2291 = vmatpush.msrb.mxu2 %v2739_v53  ;;  %v2464_v38 = vpack.i.bf16 %v2739_v53, %v2738_v32 }
0x12f9   :  { %2231 = vrot.lane.b32.xlu2 %v2229_v2, %s2767_s30 }
0x1301   :  { %2245 = vrot.lane.b32.xlu2 %v36_v43, %s2770_s17 }
0x1353   :  { %v2232_v7 = vpop.permute.xlu2 %2231 }
0x1354   :  { %v2234_v16 = vadd.f32 %v2232_v7, %v2181_v51 }
0x1356   :  { %2497 = vtanh.f32 %v2234_v16 }
0x135b   :  { %v2246_v12 = vpop.permute.xlu2 %2245 }
0x135c   :  { %v2498_v59 = vpop.eup %2497 }
0x135d   :  { %2238 = vrot.lane.b32.xlu0 %v2498_v59, %s2766_s23 }
0x13cf   :  { %v2239_v13 = vpop.permute.xlu0 %2238 }
0x13d0   :  { %v2241_v27 = vmul.f32 %v2239_v13, %v2236_v20 }
0x13d2   :  { %v2243_v48 = vadd.f32 %v2242_v33, %v2241_v27 }
0x13d4   :  { %2248 = vrot.lane.b32.xlu1 %v2243_v48, %s2766_s23  ;;  %s2771_s23 = smov 112  }
0x13d5   :  { %2465 = vrot.lane.b32.xlu0 %v2464_v38, %s2771_s23 }
0x13dc   :  { %2327 = vrot.lane.b32.xlu1 %v2739_v53, %s2772_s24 }
0x1446   :  { %v2249_v30 = vpop.permute.xlu1 %2248 }
0x1447   :  { %2268 = vmatpush.msrb.mxu1 %v2249_v30  ;;  %v2466_v9 = vpop.permute.xlu0 %2465 }
0x1448   :  { %2422 = vmatmul.msk.f32.vlgmr.msrb.gmra.mxu1 %vm182_vm0, %v2246_v12  ;;  %v2468_v26 = vunpack.i.h.bf16 %v2466_v9  ;;  %v2467_v34 = vunpack.i.l.bf16 %v2466_v9 }
0x144a   :  { %2320 = vmatpush.msra.mxu3 %v2467_v34 }
0x144c   :  { %2321 = vmatpush.msra.mxu3 %v2468_v26 }
0x144e   :  { %v2328_v58 = vpop.permute.xlu1 %2327 }
0x144f   :  { %2348 = vmatpush.msra.mxu0 %v2328_v58 }
0x14c5   :  { %v2270_v62 = vpop.f32.mrf.mxu1 }
0x14c6   :  { %2423 = vmatmul.msk.f32.vlgmr.msrb.gmra.mxu2 %vm263_vm1, %v2270_v62  ;;  %vm2353_vm1 = vcmask 9216  }
0x1549   :  { %v2293_v5 = vpop.f32.mrf.mxu2 }
0x154a   :  { %v2294_v35 = vadd.f32 %v2293_v5, %v45_v39 }
0x154c   :  { %v2296_v21 = vmax.f32 %v2294_v35, 0.0 }
0x154e   :  { %2424 = vmatmul.msk.f32.vlgmr.msra.gmra.mxu3 %vm455_vm2, %v2296_v21 }
0x15d1   :  { %v2323_v23 = vpop.f32.mrf.mxu3 }
0x15d2   :  { %v2324_v44 = vadd.f32 %v2323_v23, %v46_v11 }
0x15d4   :  { %v2326_v31 = vmax.f32 %v2324_v44, 0.0 }
0x15d6   :  { %2425 = vmatmul.msk.f32.vlgmr.msra.gmra.mxu0 %vm182_vm0, %v2326_v31 }
0x1653   :  { %v2350_v28 = vpop.f32.mrf.mxu0 }
0x1654   :  { %v2351_v50 = vadd.f32 %v2350_v28, %v47_v22 }
0x1656   :  { %2354 = vst.msk [vmem:[#allocation2] sm:$0x3] %vm2353_vm1, %v2351_v50 }
0x1657   :  { %2365 = dma.vmem_to_hbm [thread:$0]  %s2361_s29, 32, %s2363_s10, [#allocation3]  }
0x1658   :  { %2764 = dma.done.wait [#allocation3], 32  }
0x1659   :  { %2765 = vsyncadd [#allocation3], 4294967264 }
0x165a   :  { %2370 = vsyncpa [#allocation3], 1 }

</bundles_post_ra>
